<compile_context>
chip_gen: v7x
topology: tpu7x:2x2x1
jax: 0.10.0
libtpu: 0.0.40
codegen_flags: <defaults>
</compile_context>

<pallas_src>
import functools
import math

import jax
import jax.numpy as jnp
from jax.experimental import pallas as pl
from jax.experimental.pallas import tpu as pltpu

_NEG_LARGE = -1e30   # finite "minus infinity": avoids -inf - (-inf) = NaN hazards
_LANES = 128


def _attention_head_kernel(qids_ref, kids_ref, x_ref, w_ref, o_ref,
                           q_sc, m_sc, l_sc, acc_sc, kv_sc,
                           *, head_size, mxu_dtype, approx_recip):
    """One (batch, lower-triangular (q_tile, kv_tile)) step of causal attention.

    qids_ref/kids_ref : SMEM int32[n_steps] compacted (q_tile, kv_tile) schedule
    x_ref  : (bs, C)     q-side activation tile (already in mxu_dtype)
    w_ref  : (C, 3*Hp)   fused, lane-padded [Wq | Wk | Wv] (mxu_dtype)
    o_ref  : (bs, Hp)    lane-dense (padded) output tile
    q_sc   : (bs, Hp)    scaled Q projection, persists across kv steps
    m_sc / l_sc / acc_sc : online-softmax running state (f32)
    kv_sc  : (Tp, 2*Hp)  per-batch K|V cache, filled tile-by-tile on diagonal steps
    """
    t = pl.program_id(1)
    qi = qids_ref[t]
    ki = kids_ref[t]
    bs = x_ref.shape[0]
    hp = q_sc.shape[-1]

    @pl.when(ki == 0)
    def _init():
        m_sc[...] = jnp.full_like(m_sc, _NEG_LARGE)
        l_sc[...] = jnp.zeros_like(l_sc)
        acc_sc[...] = jnp.zeros_like(acc_sc)
        # Q projection once per (batch, q_tile); softmax scale folded in here so
        # the per-kv-step scores matmul needs no extra multiply.
        q = jnp.dot(x_ref[...], w_ref[:, :hp], preferred_element_type=jnp.float32)
        q_sc[...] = (q * (head_size ** -0.5)).astype(q_sc.dtype)

    def _scores(k):
        # scores = (q * scale) @ k^T, contracting last dims (no explicit .T).
        return jax.lax.dot_general(q_sc[...], k, (((1,), (1,)), ((), ())),
                                   preferred_element_type=jnp.float32)

    def _online_update(s, v):
        m_prev = m_sc[...]
        m_new = jnp.maximum(m_prev, jnp.max(s, axis=-1, keepdims=True))
        alpha = jnp.exp(m_prev - m_new)
        p = jnp.exp(s - m_new)
        l_sc[...] = alpha * l_sc[...] + jnp.sum(p, axis=-1, keepdims=True)
        acc_sc[...] = alpha * acc_sc[...] + jnp.dot(
            p.astype(mxu_dtype), v, preferred_element_type=jnp.float32)
        m_sc[...] = m_new

    @pl.when(ki == qi)
    def _diagonal_step():
        # First (and only) visit of kv tile `ki`: since block_q == block_k, the
        # resident q-side x tile is exactly the rows we need, so project K|V
        # here (one fused MXU matmul), cache it for later q tiles, and run the
        # mask-straddling diagonal score block.
        kv = jnp.dot(x_ref[...], w_ref[:, hp:], preferred_element_type=jnp.float32)
        kv = kv.astype(mxu_dtype)                                   # (bs, 2*Hp)
        start = pl.multiple_of(ki * bs, bs)
        kv_sc[pl.ds(start, bs), :] = kv
        k = kv[:, :hp]
        v = kv[:, hp:]
        s = _scores(k)
        # Diagonal tile: local causal mask (absolute offsets cancel because
        # q_start == k_start).  Interior tiles below never need the mask.
        r = jax.lax.broadcasted_iota(jnp.int32, (bs, bs), 0)
        c = jax.lax.broadcasted_iota(jnp.int32, (bs, bs), 1)
        s = jnp.where(c <= r, s, jnp.float32(_NEG_LARGE))
        _online_update(s, v)

        # The diagonal step is also the last kv step for this q tile: finalize.
        # TODO(synk): dropout on the attention probabilities is identity here
        # (eval-mode semantics); training mode would need pltpu.prng_seed +
        # pltpu.stateful_bernoulli and a 1/(1-p) rescale.
        inv_l = pl.reciprocal(l_sc[...], approx=approx_recip)
        o_ref[...] = (acc_sc[...] * inv_l).astype(o_ref.dtype)

    @pl.when(ki != qi)
    def _interior_step():
        # Strictly-below-diagonal tile: K|V already cached, no mask needed.
        start = pl.multiple_of(ki * bs, bs)
        kv = kv_sc[pl.ds(start, bs), :]
        _online_update(_scores(kv[:, :hp]), kv[:, hp:])


def _round_up(n, m):
    return ((n + m - 1) // m) * m


def _vmem_limit_bytes():
    # Generation-aware VMEM scoped limit: v5e/v6e have 128 MiB per TensorCore,
    # v7x only 64 MiB -- never request the full physical capacity.
    try:
        cap = int(pltpu.get_tpu_info().vmem_capacity_bytes)
    except Exception:
        cap = 64 * 1024 * 1024          # conservative fallback (safe on v7x)
    return min(96 * 1024 * 1024, (cap * 3) // 4)


def attention_head(x, wk, wq, wv, *, block_size=512,
                   mxu_dtype=jnp.bfloat16, out_dtype=None):
    """Causal attention head: softmax((x@wq)(x@wk)^T / sqrt(H)) @ (x@wv).

    x : (B, T, C); wk/wq/wv : (C, H).  Returns (B, T, H) in `out_dtype`
    (default x.dtype).  `mxu_dtype` controls matmul-operand precision (bf16 by
    default, f32 accumulation); softmax statistics are always f32.
    """
    B, T, C = x.shape
    H = wq.shape[1]
    out_dtype = x.dtype if out_dtype is None else out_dtype
    if block_size % _LANES != 0:
        raise ValueError("block_size must be a multiple of 128")

    # Lane-dense padding of the head dim: H < 128 would otherwise force masked
    # partial stores and mostly-empty Q/K/V vregs.  Zero columns are exact.
    Hp = _round_up(max(H, _LANES), _LANES)

    def _pad_w(w):
        return jnp.pad(w, ((0, 0), (0, Hp - H))) if Hp != H else w

    # Fused projection weight [Wq | Wk | Wv], cast to the MXU dtype on the host
    # so the kernel does no per-step casting.  One weight input / one DMA.
    # (Grid-invariant; double-buffered footprint is tiny at these C, so we skip
    #  pl.Buffered(1) single-buffering.)
    w_fused = jnp.concatenate([_pad_w(wq), _pad_w(wk), _pad_w(wv)],
                              axis=1).astype(mxu_dtype)              # (C, 3*Hp)

    # Tile the (zero-padded) sequence; padding T is exact for causal attention:
    # padded keys sit strictly above the diagonal of every valid query row.
    bs = min(block_size, _round_up(T, _LANES))
    Tp = _round_up(T, bs)
    xm = x.astype(mxu_dtype)
    if Tp != T:
        xm = jnp.pad(xm, ((0, 0), (0, Tp - T), (0, 0)))
    nq = Tp // bs

    # Compacted lower-triangular (q_tile, kv_tile) schedule: no grid step is
    # spent on fully-masked upper-triangular tiles.  For q tile qi the kv tiles
    # run 0..qi; the diagonal step (ki == qi) is both the first visit of kv
    # tile ki (fills the K|V cache) and the last kv step (finalize the output).
    qids_l, kids_l = [], []
    for q_idx in range(nq):
        for k_idx in range(q_idx + 1):
            qids_l.append(q_idx)
            kids_l.append(k_idx)
    n_steps = len(qids_l)
    qids = jnp.asarray(qids_l, dtype=jnp.int32)
    kids = jnp.asarray(kids_l, dtype=jnp.int32)

    kernel = functools.partial(
        _attention_head_kernel,
        head_size=H,
        mxu_dtype=mxu_dtype,
        approx_recip=(jnp.dtype(mxu_dtype) != jnp.dtype(jnp.float32)))

    out_padded = pl.pallas_call(
        kernel,
        out_shape=jax.ShapeDtypeStruct((B, Tp, Hp), out_dtype),
        grid_spec=pltpu.PrefetchScalarGridSpec(
            num_scalar_prefetch=2,
            grid=(B, n_steps),
            in_specs=[
                # q-side tile of x (also the K|V source on diagonal steps)
                pl.BlockSpec((pl.Squeezed(), bs, C),
                             lambda b, t, qids, kids: (b, qids[t], 0)),
                # fused weights: constant across the whole grid
                pl.BlockSpec((C, 3 * Hp),
                             lambda b, t, qids, kids: (0, 0)),
            ],
            out_specs=pl.BlockSpec((pl.Squeezed(), bs, Hp),
                                   lambda b, t, qids, kids: (b, qids[t], 0)),
            scratch_shapes=[
                pltpu.VMEM((bs, Hp), mxu_dtype),        # q_sc (scaled Q)
                pltpu.VMEM((bs, 1), jnp.float32),       # m_sc (running max)
                pltpu.VMEM((bs, 1), jnp.float32),       # l_sc (running denom)
                pltpu.VMEM((bs, Hp), jnp.float32),      # acc_sc
                pltpu.VMEM((Tp, 2 * Hp), mxu_dtype),    # per-batch K|V cache
            ],
        ),
        compiler_params=pltpu.CompilerParams(
            # Batch axis may be megacore-sharded (v7x, 2 TCs); the compacted
            # (q,kv) axis carries online-softmax / cache state -> arbitrary.
            # This is safe under sharding: the schedule restarts (t=0) for
            # every batch, so each core refills its own caches before use.
            dimension_semantics=("parallel", "arbitrary"),
            vmem_limit_bytes=_vmem_limit_bytes(),
        ),
    )(qids, kids, xm, w_fused)

    out = out_padded
    if Tp != T:
        out = out[:, :T, :]
    if Hp != H:
        out = out[..., :H]
    return out


def reference_attention_head(x, wk, wq, wv):
    """Pure-JAX f32 reference mirroring the PyTorch forward (eval mode)."""
    k = x @ wk
    q = x @ wq
    v = x @ wv
    scores = (q @ jnp.swapaxes(k, -2, -1)) * (k.shape[-1] ** -0.5)
    T = x.shape[1]
    tril = jnp.tril(jnp.ones((T, T)))
    scores = jnp.where(tril == 0, -jnp.inf, scores)
    p = jax.nn.softmax(scores, axis=-1)
    return p @ v


if __name__ == "__main__":
    # Small shapes consistent with the module: batch=2, seq=200 tokens (NOT a
    # tile multiple -> exercises the zero-padding path), embedding=64 channels,
    # head_size=16.  block_size=128 gives 2 q tiles / 3 compacted grid steps
    # per batch (diag, cached-interior, diag): the full flash + K|V-cache path.
    B, T, C, H = 2, 200, 64, 16

    key = jax.random.PRNGKey(0)
    kx, kk, kq, kv = jax.random.split(key, 4)

    x = jax.random.normal(kx, (B, T, C), dtype=jnp.float32)
    bound = 1.0 / math.sqrt(C)
    wk = jax.random.uniform(kk, (C, H), minval=-bound, maxval=bound, dtype=jnp.float32)
    wq = jax.random.uniform(kq, (C, H), minval=-bound, maxval=bound, dtype=jnp.float32)
    wv = jax.random.uniform(kv, (C, H), minval=-bound, maxval=bound, dtype=jnp.float32)

    ref = reference_attention_head(x, wk, wq, wv)

    # f32 MXU operands + exact reciprocal: tight-ish check of the compacted-grid
    # / cached-K|V online-softmax structure.
    out = attention_head(x, wk, wq, wv, block_size=128, mxu_dtype=jnp.float32)
    out = jax.block_until_ready(out)
    assert out.shape == (B, T, H)
    assert jnp.allclose(out, ref, atol=1e-2, rtol=1e-2), "f32 mismatch vs reference"

    # Default bf16 MXU operands (f32 accumulation / softmax): looser tolerance.
    out_bf16 = attention_head(x, wk, wq, wv, block_size=128)
    out_bf16 = jax.block_until_ready(out_bf16)
    assert out_bf16.shape == (B, T, H)
    assert jnp.allclose(out_bf16.astype(jnp.float32), ref, atol=6e-2, rtol=6e-2), \
        "bf16 mismatch vs reference"

    print("KERNEL_OK")
</pallas_src>

<mosaic_0001>
module attributes {stable_mosaic.version = 11 : i64} {
  func.func @_attention_head_kernel(%arg0: i32, %arg1: i32, %arg2: memref<3xi32, #tpu.memory_space<smem>>, %arg3: memref<3xi32, #tpu.memory_space<smem>>, %arg4: memref<1x128x64xf32, #tpu.memory_space<vmem>>, %arg5: memref<64x384xf32, #tpu.memory_space<vmem>>, %arg6: memref<1x128x128xf32, #tpu.memory_space<vmem>>, %arg7: memref<128x128xf32, #tpu.memory_space<vmem>>, %arg8: memref<128x1xf32, #tpu.memory_space<vmem>>, %arg9: memref<128x1xf32, #tpu.memory_space<vmem>>, %arg10: memref<128x128xf32, #tpu.memory_space<vmem>>, %arg11: memref<256x256xf32, #tpu.memory_space<vmem>>) attributes {dimension_semantics = [#tpu.dimension_semantics<parallel>, #tpu.dimension_semantics<arbitrary>], iteration_bounds = array<i64: 2, 3>, scalar_prefetch = 2 : i64, scratch_operands = 5 : i64, tpu.core_type = #tpu.core_type<tc>, window_params = [{transform_indices = @transform_0, window_bounds = array<i64: 1, 128, 64>}, {pipeline_mode = #tpu.pipeline_mode<synchronous>, transform_indices = @transform_1, window_bounds = array<i64: 64, 384>}, {transform_indices = @transform_2, window_bounds = array<i64: 1, 128, 128>}]} {
    %0 = arith.index_cast %arg1 : i32 to index
    %1 = memref.load %arg2[%0] : memref<3xi32, #tpu.memory_space<smem>>
    %2 = arith.index_cast %arg1 : i32 to index
    %3 = memref.load %arg3[%2] : memref<3xi32, #tpu.memory_space<smem>>
    %c0_i32 = arith.constant 0 : i32
    %4 = arith.cmpi eq, %3, %c0_i32 : i32
    %5 = arith.extui %4 : i1 to i32
    %c0_i32_0 = arith.constant 0 : i32
    %6 = arith.cmpi ne, %5, %c0_i32_0 : i32
    scf.if %6 {
      %cst = arith.constant -1.000000e+30 : f32
      %13 = vector.broadcast %cst : f32 to vector<128x1xf32>
      %c0 = arith.constant 0 : index
      %c0_3 = arith.constant 0 : index
      %14 = vector.load %arg8[%c0, %c0_3] : memref<128x1xf32, #tpu.memory_space<vmem>>, vector<128x1xf32>
      tpu.vector_store %arg8[%c0, %c0_3], %13 {strides = array<i32>} : memref<128x1xf32, #tpu.memory_space<vmem>>, vector<128x1xf32>,
      %cst_4 = arith.constant 0.000000e+00 : f32
      %15 = vector.broadcast %cst_4 : f32 to vector<128x1xf32>
      %c0_5 = arith.constant 0 : index
      %c0_6 = arith.constant 0 : index
      %16 = vector.load %arg9[%c0_5, %c0_6] : memref<128x1xf32, #tpu.memory_space<vmem>>, vector<128x1xf32>
      tpu.vector_store %arg9[%c0_5, %c0_6], %15 {strides = array<i32>} : memref<128x1xf32, #tpu.memory_space<vmem>>, vector<128x1xf32>,
      %cst_7 = arith.constant 0.000000e+00 : f32
      %17 = vector.broadcast %cst_7 : f32 to vector<128x128xf32>
      %c0_8 = arith.constant 0 : index
      %c0_9 = arith.constant 0 : index
      %18 = vector.load %arg10[%c0_8, %c0_9] : memref<128x128xf32, #tpu.memory_space<vmem>>, vector<128x128xf32>
      tpu.vector_store %arg10[%c0_8, %c0_9], %17 {strides = array<i32>} : memref<128x128xf32, #tpu.memory_space<vmem>>, vector<128x128xf32>,
      %c0_10 = arith.constant 0 : index
      %c0_11 = arith.constant 0 : index
      %c0_12 = arith.constant 0 : index
      %19 = vector.load %arg4[%c0_10, %c0_11, %c0_12] : memref<1x128x64xf32, #tpu.memory_space<vmem>>, vector<1x128x64xf32>
      %20 = vector.shape_cast %19 : vector<1x128x64xf32> to vector<128x64xf32>
      %c0_13 = arith.constant 0 : index
      %c0_14 = arith.constant 0 : index
      %21 = vector.load %arg5[%c0_13, %c0_14] : memref<64x384xf32, #tpu.memory_space<vmem>>, vector<64x128xf32>
      %cst_15 = arith.constant dense<0.000000e+00> : vector<128x128xf32>
      %22 = tpu.matmul %20, %21, %cst_15 {dimension_numbers = #tpu.dot_dimension_numbers<[1], [0], [0], [1], [0, 0, 1, 1], [], []>} : vector<128x64xf32>, vector<64x128xf32>, vector<128x128xf32> -> vector<128x128xf32>
      %cst_16 = arith.constant 2.500000e-01 : f32
      %23 = vector.broadcast %cst_16 : f32 to vector<128x128xf32>
      %24 = arith.mulf %22, %23 : vector<128x128xf32>
      %c0_17 = arith.constant 0 : index
      %c0_18 = arith.constant 0 : index
      %25 = vector.load %arg7[%c0_17, %c0_18] : memref<128x128xf32, #tpu.memory_space<vmem>>, vector<128x128xf32>
      tpu.vector_store %arg7[%c0_17, %c0_18], %24 {strides = array<i32>} : memref<128x128xf32, #tpu.memory_space<vmem>>, vector<128x128xf32>,
    } else {
    }
    %7 = arith.cmpi eq, %3, %1 : i32
    %8 = arith.extui %7 : i1 to i32
    %c0_i32_1 = arith.constant 0 : i32
    %9 = arith.cmpi ne, %8, %c0_i32_1 : i32
    scf.if %9 {
      %c0 = arith.constant 0 : index
      %c0_3 = arith.constant 0 : index
      %c0_4 = arith.constant 0 : index
      %13 = vector.load %arg4[%c0, %c0_3, %c0_4] : memref<1x128x64xf32, #tpu.memory_space<vmem>>, vector<1x128x64xf32>
      %14 = vector.shape_cast %13 : vector<1x128x64xf32> to vector<128x64xf32>
      %c0_5 = arith.constant 0 : index
      %c128 = arith.constant 128 : index
      %15 = vector.load %arg5[%c0_5, %c128] : memref<64x384xf32, #tpu.memory_space<vmem>>, vector<64x256xf32>
      %cst = arith.constant dense<0.000000e+00> : vector<128x256xf32>
      %16 = tpu.matmul %14, %15, %cst {dimension_numbers = #tpu.dot_dimension_numbers<[1], [0], [0], [1], [0, 0, 1, 1], [], []>} : vector<128x64xf32>, vector<64x256xf32>, vector<128x256xf32> -> vector<128x256xf32>
      %c128_i32 = arith.constant 128 : i32
      %17 = arith.muli %3, %c128_i32 : i32
      %18 = tpu.assume_multiple %17, 128 : i32
      %19 = arith.index_cast %18 : i32 to index
      %c0_6 = arith.constant 0 : index
      %20 = vector.load %arg11[%19, %c0_6] : memref<256x256xf32, #tpu.memory_space<vmem>>, vector<128x256xf32>
      tpu.vector_store %arg11[%19, %c0_6], %16 {strides = array<i32>} : memref<256x256xf32, #tpu.memory_space<vmem>>, vector<128x256xf32>,
      %21 = vector.extract_strided_slice %16 {offsets = [0, 0], sizes = [128, 128], strides = [1, 1]} : vector<128x256xf32> to vector<128x128xf32>
      %22 = vector.extract_strided_slice %16 {offsets = [0, 128], sizes = [128, 128], strides = [1, 1]} : vector<128x256xf32> to vector<128x128xf32>
      %c0_7 = arith.constant 0 : index
      %c0_8 = arith.constant 0 : index
      %23 = vector.load %arg7[%c0_7, %c0_8] : memref<128x128xf32, #tpu.memory_space<vmem>>, vector<128x128xf32>
      %cst_9 = arith.constant dense<0.000000e+00> : vector<128x128xf32>
      %24 = tpu.matmul %23, %21, %cst_9 {dimension_numbers = #tpu.dot_dimension_numbers<[1], [1], [0], [0], [0, 0, 1, 0], [], []>} : vector<128x128xf32>, vector<128x128xf32>, vector<128x128xf32> -> vector<128x128xf32>
      %25 = tpu.iota {dimensions = array<i32: 0>} : vector<128x128xi32>
      %26 = tpu.iota {dimensions = array<i32: 1>} : vector<128x128xi32>
      %27 = arith.cmpi sle, %26, %25 : vector<128x128xi32>
      %cst_10 = arith.constant -1.000000e+30 : f32
      %28 = vector.broadcast %cst_10 : f32 to vector<128x128xf32>
      %29 = arith.select %27, %24, %28 : vector<128x128xi1>, vector<128x128xf32>
      %c0_11 = arith.constant 0 : index
      %c0_12 = arith.constant 0 : index
      %30 = vector.load %arg8[%c0_11, %c0_12] : memref<128x1xf32, #tpu.memory_space<vmem>>, vector<128x1xf32>
      %cst_13 = arith.constant dense<0xFF800000> : vector<128xf32>
      %31 = vector.multi_reduction <maximumf>, %29, %cst_13 [1] : vector<128x128xf32> to vector<128xf32>
      %32 = vector.shape_cast %31 : vector<128xf32> to vector<128x1xf32>
      %33 = arith.maximumf %30, %32 : vector<128x1xf32>
      %34 = arith.subf %30, %33 : vector<128x1xf32>
      %35 = math.exp %34 : vector<128x1xf32>
      %36 = vector.broadcast %33 : vector<128x1xf32> to vector<128x128xf32>
      %37 = arith.subf %29, %36 : vector<128x128xf32>
      %38 = math.exp %37 : vector<128x128xf32>
      %c0_14 = arith.constant 0 : index
      %c0_15 = arith.constant 0 : index
      %39 = vector.load %arg9[%c0_14, %c0_15] : memref<128x1xf32, #tpu.memory_space<vmem>>, vector<128x1xf32>
      %40 = arith.mulf %35, %39 : vector<128x1xf32>
      %cst_16 = arith.constant dense<0.000000e+00> : vector<128xf32>
      %41 = vector.multi_reduction <add>, %38, %cst_16 [1] : vector<128x128xf32> to vector<128xf32>
      %42 = vector.shape_cast %41 : vector<128xf32> to vector<128x1xf32>
      %43 = arith.addf %40, %42 : vector<128x1xf32>
      %c0_17 = arith.constant 0 : index
      %c0_18 = arith.constant 0 : index
      %44 = vector.load %arg9[%c0_17, %c0_18] : memref<128x1xf32, #tpu.memory_space<vmem>>, vector<128x1xf32>
      tpu.vector_store %arg9[%c0_17, %c0_18], %43 {strides = array<i32>} : memref<128x1xf32, #tpu.memory_space<vmem>>, vector<128x1xf32>,
      %c0_19 = arith.constant 0 : index
      %c0_20 = arith.constant 0 : index
      %45 = vector.load %arg10[%c0_19, %c0_20] : memref<128x128xf32, #tpu.memory_space<vmem>>, vector<128x128xf32>
      %46 = vector.broadcast %35 : vector<128x1xf32> to vector<128x128xf32>
      %47 = arith.mulf %46, %45 : vector<128x128xf32>
      %cst_21 = arith.constant dense<0.000000e+00> : vector<128x128xf32>
      %48 = tpu.matmul %38, %22, %cst_21 {dimension_numbers = #tpu.dot_dimension_numbers<[1], [0], [0], [1], [0, 0, 1, 1], [], []>} : vector<128x128xf32>, vector<128x128xf32>, vector<128x128xf32> -> vector<128x128xf32>
      %49 = arith.addf %47, %48 : vector<128x128xf32>
      %c0_22 = arith.constant 0 : index
      %c0_23 = arith.constant 0 : index
      %50 = vector.load %arg10[%c0_22, %c0_23] : memref<128x128xf32, #tpu.memory_space<vmem>>, vector<128x128xf32>
      tpu.vector_store %arg10[%c0_22, %c0_23], %49 {strides = array<i32>} : memref<128x128xf32, #tpu.memory_space<vmem>>, vector<128x128xf32>,
      %c0_24 = arith.constant 0 : index
      %c0_25 = arith.constant 0 : index
      %51 = vector.load %arg8[%c0_24, %c0_25] : memref<128x1xf32, #tpu.memory_space<vmem>>, vector<128x1xf32>
      tpu.vector_store %arg8[%c0_24, %c0_25], %33 {strides = array<i32>} : memref<128x1xf32, #tpu.memory_space<vmem>>, vector<128x1xf32>,
      %c0_26 = arith.constant 0 : index
      %c0_27 = arith.constant 0 : index
      %52 = vector.load %arg9[%c0_26, %c0_27] : memref<128x1xf32, #tpu.memory_space<vmem>>, vector<128x1xf32>
      %53 = tpu.reciprocal %52 : vector<128x1xf32> -> vector<128x1xf32>
      %c0_28 = arith.constant 0 : index
      %c0_29 = arith.constant 0 : index
      %54 = vector.load %arg10[%c0_28, %c0_29] : memref<128x128xf32, #tpu.memory_space<vmem>>, vector<128x128xf32>
      %55 = vector.broadcast %53 : vector<128x1xf32> to vector<128x128xf32>
      %56 = arith.mulf %54, %55 : vector<128x128xf32>
      %c0_30 = arith.constant 0 : index
      %c0_31 = arith.constant 0 : index
      %c0_32 = arith.constant 0 : index
      %57 = vector.load %arg6[%c0_30, %c0_31, %c0_32] : memref<1x128x128xf32, #tpu.memory_space<vmem>>, vector<1x128x128xf32>
      %58 = vector.shape_cast %57 : vector<1x128x128xf32> to vector<128x128xf32>
      %59 = vector.shape_cast %56 : vector<128x128xf32> to vector<1x128x128xf32>
      tpu.vector_store %arg6[%c0_30, %c0_31, %c0_32], %59 {strides = array<i32>} : memref<1x128x128xf32, #tpu.memory_space<vmem>>, vector<1x128x128xf32>,
    } else {
    }
    %10 = arith.cmpi ne, %3, %1 : i32
    %11 = arith.extui %10 : i1 to i32
    %c0_i32_2 = arith.constant 0 : i32
    %12 = arith.cmpi ne, %11, %c0_i32_2 : i32
    scf.if %12 {
      %c128_i32 = arith.constant 128 : i32
      %13 = arith.muli %3, %c128_i32 : i32
      %14 = tpu.assume_multiple %13, 128 : i32
      %15 = arith.index_cast %14 : i32 to index
      %c0 = arith.constant 0 : index
      %16 = vector.load %arg11[%15, %c0] : memref<256x256xf32, #tpu.memory_space<vmem>>, vector<128x256xf32>
      %17 = vector.extract_strided_slice %16 {offsets = [0, 0], sizes = [128, 128], strides = [1, 1]} : vector<128x256xf32> to vector<128x128xf32>
      %c0_3 = arith.constant 0 : index
      %c0_4 = arith.constant 0 : index
      %18 = vector.load %arg7[%c0_3, %c0_4] : memref<128x128xf32, #tpu.memory_space<vmem>>, vector<128x128xf32>
      %cst = arith.constant dense<0.000000e+00> : vector<128x128xf32>
      %19 = tpu.matmul %18, %17, %cst {dimension_numbers = #tpu.dot_dimension_numbers<[1], [1], [0], [0], [0, 0, 1, 0], [], []>} : vector<128x128xf32>, vector<128x128xf32>, vector<128x128xf32> -> vector<128x128xf32>
      %20 = vector.extract_strided_slice %16 {offsets = [0, 128], sizes = [128, 128], strides = [1, 1]} : vector<128x256xf32> to vector<128x128xf32>
      %c0_5 = arith.constant 0 : index
      %c0_6 = arith.constant 0 : index
      %21 = vector.load %arg8[%c0_5, %c0_6] : memref<128x1xf32, #tpu.memory_space<vmem>>, vector<128x1xf32>
      %cst_7 = arith.constant dense<0xFF800000> : vector<128xf32>
      %22 = vector.multi_reduction <maximumf>, %19, %cst_7 [1] : vector<128x128xf32> to vector<128xf32>
      %23 = vector.shape_cast %22 : vector<128xf32> to vector<128x1xf32>
      %24 = arith.maximumf %21, %23 : vector<128x1xf32>
      %25 = arith.subf %21, %24 : vector<128x1xf32>
      %26 = math.exp %25 : vector<128x1xf32>
      %27 = vector.broadcast %24 : vector<128x1xf32> to vector<128x128xf32>
      %28 = arith.subf %19, %27 : vector<128x128xf32>
      %29 = math.exp %28 : vector<128x128xf32>
      %c0_8 = arith.constant 0 : index
      %c0_9 = arith.constant 0 : index
      %30 = vector.load %arg9[%c0_8, %c0_9] : memref<128x1xf32, #tpu.memory_space<vmem>>, vector<128x1xf32>
      %31 = arith.mulf %26, %30 : vector<128x1xf32>
      %cst_10 = arith.constant dense<0.000000e+00> : vector<128xf32>
      %32 = vector.multi_reduction <add>, %29, %cst_10 [1] : vector<128x128xf32> to vector<128xf32>
      %33 = vector.shape_cast %32 : vector<128xf32> to vector<128x1xf32>
      %34 = arith.addf %31, %33 : vector<128x1xf32>
      %c0_11 = arith.constant 0 : index
      %c0_12 = arith.constant 0 : index
      %35 = vector.load %arg9[%c0_11, %c0_12] : memref<128x1xf32, #tpu.memory_space<vmem>>, vector<128x1xf32>
      tpu.vector_store %arg9[%c0_11, %c0_12], %34 {strides = array<i32>} : memref<128x1xf32, #tpu.memory_space<vmem>>, vector<128x1xf32>,
      %c0_13 = arith.constant 0 : index
      %c0_14 = arith.constant 0 : index
      %36 = vector.load %arg10[%c0_13, %c0_14] : memref<128x128xf32, #tpu.memory_space<vmem>>, vector<128x128xf32>
      %37 = vector.broadcast %26 : vector<128x1xf32> to vector<128x128xf32>
      %38 = arith.mulf %37, %36 : vector<128x128xf32>
      %cst_15 = arith.constant dense<0.000000e+00> : vector<128x128xf32>
      %39 = tpu.matmul %29, %20, %cst_15 {dimension_numbers = #tpu.dot_dimension_numbers<[1], [0], [0], [1], [0, 0, 1, 1], [], []>} : vector<128x128xf32>, vector<128x128xf32>, vector<128x128xf32> -> vector<128x128xf32>
      %40 = arith.addf %38, %39 : vector<128x128xf32>
      %c0_16 = arith.constant 0 : index
      %c0_17 = arith.constant 0 : index
      %41 = vector.load %arg10[%c0_16, %c0_17] : memref<128x128xf32, #tpu.memory_space<vmem>>, vector<128x128xf32>
      tpu.vector_store %arg10[%c0_16, %c0_17], %40 {strides = array<i32>} : memref<128x128xf32, #tpu.memory_space<vmem>>, vector<128x128xf32>,
      %c0_18 = arith.constant 0 : index
      %c0_19 = arith.constant 0 : index
      %42 = vector.load %arg8[%c0_18, %c0_19] : memref<128x1xf32, #tpu.memory_space<vmem>>, vector<128x1xf32>
      tpu.vector_store %arg8[%c0_18, %c0_19], %24 {strides = array<i32>} : memref<128x1xf32, #tpu.memory_space<vmem>>, vector<128x1xf32>,
    } else {
    }
    return
  }
  func.func @transform_0(%arg0: i32, %arg1: i32, %arg2: memref<3xi32, #tpu.memory_space<smem>>, %arg3: memref<3xi32, #tpu.memory_space<smem>>) -> (i32, i32, i32) {
    %0 = arith.index_cast %arg1 : i32 to index
    %1 = memref.load %arg2[%0] : memref<3xi32, #tpu.memory_space<smem>>
    %c0_i32 = arith.constant 0 : i32
    %c0_i32_0 = arith.constant 0 : i32
    return %arg0, %1, %c0_i32 : i32, i32, i32
  }
  func.func @transform_1(%arg0: i32, %arg1: i32, %arg2: memref<3xi32, #tpu.memory_space<smem>>, %arg3: memref<3xi32, #tpu.memory_space<smem>>) -> (i32, i32) {
    %c0_i32 = arith.constant 0 : i32
    %c0_i32_0 = arith.constant 0 : i32
    %c0_i32_1 = arith.constant 0 : i32
    return %c0_i32, %c0_i32_0 : i32, i32
  }
  func.func @transform_2(%arg0: i32, %arg1: i32, %arg2: memref<3xi32, #tpu.memory_space<smem>>, %arg3: memref<3xi32, #tpu.memory_space<smem>>) -> (i32, i32, i32) {
    %0 = arith.index_cast %arg1 : i32 to index
    %1 = memref.load %arg2[%0] : memref<3xi32, #tpu.memory_space<smem>>
    %c0_i32 = arith.constant 0 : i32
    %c0_i32_0 = arith.constant 0 : i32
    return %arg0, %1, %c0_i32 : i32, i32, i32
  }
}

</mosaic_0001>

<bundles_post_ra>
// kernel: tpu_custom_call.1
= control target key start
LH: loop header
LB: loop body
LE: loop exit
PB: predicated region body
PF: predicated region fallthrough
CT: control target
= control target key end

     0   :  { %s5001_s0 = inlined_call_operand.vmem [shape: s32[3], index: 0, kind: input, shape index: {}]   ;;  %s5002_s2 = inlined_call_operand.vmem [shape: f32[2,256,64], index: 2, kind: input, shape index: {}]   ;;  %s5003_s3 = inlined_call_operand.vmem [shape: f32[64,384], index: 3, kind: input, shape index: {}]   ;;  %s5004_s4 = inlined_call_operand.hbm [shape: f32[2,256,128], index: 4, kind: output, shape index: {}]   ;;  %s5005_s1 = inlined_call_operand.vmem [shape: s32[3], index: 1, kind: input, shape index: {}]  }
   0x1   :  { %s9_s17 = sshll.u32 %s5001_s0, 4  ;;  %s13_s20 = sshll.u32 %s5005_s1, 4  ;;  %s10_s17 = int_to_ptr.vmem [resolvable:$true] %s9_s17  ;;  %s14_s20 = int_to_ptr.vmem [resolvable:$true] %s13_s20 }
   0x2   :  { %s3650_s21 = scalar_lea.vmem %s10_s17, 16  ;;  %p3655_p1 = scmp.lt.s32.totalorder %s10_s17, %s10_s17 }
   0x3   :  { %p3651_p0 = scmp.ne.s32.totalorder %s10_s17, %s3650_s21  ;;  %p3656_p2 = scmp.lt.s32.totalorder %s3650_s21, %s3650_s21 }
   0x5   :  { %p3657_p3 = por %p3656_p2, %p3655_p1 }
   0x7   :  { %p3658_p4 = pnand %p3657_p3, %p3651_p0 }
   0x9   :  { %3661 = shalt.err (!%p3658_p4)  }
   0xa   :  { %s3772_s22 = smov [#allocation8]   ;;  %s3662_s23 = scalar_lea.vmem %s14_s20, 16 }
   0xb   :  { %12 = dma.vmem_to_smem %s10_s17, 16, %s3772_s22, [#allocation7] }
   0xc   :  { %p3663_p5 = scmp.ne.s32.totalorder %s14_s20, %s3662_s23  ;;  %p3667_p6 = scmp.lt.s32.totalorder %s14_s20, %s14_s20 }
   0xd   :  { %p3668_p7 = scmp.lt.s32.totalorder %s3662_s23, %s3662_s23 }
   0xf   :  { %p3669_p8 = por %p3668_p7, %p3667_p6 }
  0x11   :  { %p3670_p9 = pnand %p3669_p8, %p3663_p5 }
  0x13   :  { %3673 = shalt.err (!%p3670_p9)  }
  0x14   :  { %s3773_s0 = smov [#allocation9]  }
  0x15   :  { %16 = dma.vmem_to_smem %s14_s20, 16, %s3773_s0, [#allocation7] }
  0x16   :  { %3734 = dma.done.wait [#allocation7], 32 }
  0x17   :  { %3735 = vsyncadd [#allocation7], 4294967264 }
  0x18   :  { %18 = sfence }
  0x19   :  { %19 = vsyncpa [#allocation11], 0 }
  0x1a   :  { %21 = vsyncpa [#allocation11 + $0x1], 0  ;;  %s3813_s1 = smov 0   ;;  %s3815_s24 = smov 0  }
  0x1b   :  { %s3817_s25 = smov 0   ;;  %s3819_s26 = smov 0  }
  0x1c   :  { %s3821_s27 = smov 0   ;;  %s3823_s28 = smov 0  }
  0x1d   :  { %s3825_s29 = smov 0   ;;  %s3827_s30 = smov 0  }
  0x1e LB: > { %s2746_s5 = sadd.s32 4294967295, %s3770_s30   ;;  %s2747_s6 = sadd.s32 4294967294, %s3770_s30   ;;  %s3770_s30 = sphi %s3827_s30, %s27_s30   ;;  %s3766_s29 = sphi %s3825_s29, %s5029_s29   ;;  %s3762_s28 = sphi %s3823_s28, %s5028_s28   ;;  %s3758_s27 = sphi %s3821_s27, %s5027_s27   ;;  %s3754_s26 = sphi %s3819_s26, %s5026_s26   ;;  %s3750_s25 = sphi %s3817_s25, %s5025_s25   ;;  %s3746_s24 = sphi %s3815_s24, %s5024_s24   ;;  %s3742_s1 = sphi %s3813_s1, %s5023_s1  }
  0x1f   : > { %s36_s7 = sadd.s32 1, %s3762_s28  ;;  %s39_s8 = sadd.s32 1, %s3766_s29 }
  0x20   : > { %p37_p10 = scmp.ge.s32.totalorder %s36_s7, 3  ;;  %s94_s9 = sld [smem:[#allocation8 + %s3762_s28]] }
  0x21   : > { %p111_p11 = scmp.ne.s32.totalorder %s3750_s25, %s3746_s24  ;;  %p112_p12 = scmp.eq.s32.totalorder %s2746_s5, 5 }
  0x22   : > { %s5031_s7 = smov (%p37_p10, %s36_s7), 0  ;;  %s5033_s8 = smov (!%p37_p10, %s39_s8), %s3766_s29 }
  0x23   : > { %s95_s10 = sld [smem:[#allocation8 + %s5031_s7]]  ;;  %p41_p13 = scmp.ge.s32.totalorder %s5033_s8, 2 }
  0x24   : > { %p117_p0 = scmp.ne.s32.totalorder %s3746_s24, %s3742_s1  ;;  %p3866_p1 = por %p112_p12, %p111_p11 }
  0x25   : > { %p118_p2 = scmp.eq.s32.totalorder %s2747_s6, 5  ;;  %s5035_s8 = smov (%p41_p13, %s5033_s8), 0 }
  0x26   : > { %p2750_p4 = scmp.ge.s32.totalorder %s3770_s30, 1  ;;  %s96_s13 = ssub.s32 %s3766_s29, %s5035_s8 }
  0x27   : > { %p3872_p3 = por %p118_p2, %p117_p0  ;;  %p154_p5 = scmp.lt.s32.totalorder %s3770_s30, 7 }
  0x28   : > { %s101_s15 = sadd.s32 1, %s3750_s25 }
  0x29   : > { %s97_s14 = ssub.s32 %s94_s9, %s95_s10  ;;  %p155_p6 = pnand %p2750_p4, %p154_p5 }
  0x2a   : > { %s98_s16 = sor.u32 %s97_s14, %s96_s13  ;;  %s5006_s18 = sand.u32 (!%p155_p6), 1, %s3746_s24  }
  0x2b   : > { %p99_p7 = scmp.eq.s32.totalorder %s98_s16, 0  ;;  %158 = sbr.rel (%p155_p6) target bundleno = 2309 (0x905), region = 28 }
  0x2c   : > { %s181_s19 = sld [smem:[#allocation8 + %s3754_s26]] (!%p155_p6)  ;;  %s2751_s20 = sshll.u32 (!%p155_p6), %s5006_s18, 7 }
  0x2d   : > { %s3882_s17 = scalar_select %p99_p7, %s3750_s25, %s101_s15  }
  0x2e   : > { %p183_p8 = scmp.lt.s32.totalorder (!%p155_p6), %s3758_s27, 1  ;;  %s3890_s21 = sld [smem:[#allocation8 + %s3754_s26]] (!%p155_p6) }
  0x2f   : > { %s3894_s23 = sld [smem:[#allocation9 + %s3754_s26]] (!%p155_p6)  ;;  %s3901_s15 = scalar_lea.vmem (!%p155_p6), [#allocation10], %s2751_s20 }
  0x32   : > { %s184_s22 = scalar_select %p183_p8, %s3758_s27, 1 }
  0x33   : > { %s2752_s0 = sshll.u32 %s181_s19, 4 }
  0x34   : > { %p185_p9 = scmp.lt.s32.totalorder %s2752_s0, 31  ;;  %s2753_s5 = sshll.u32 %s184_s22, 5 }
  0x35   : > { %p2755_p10 = scmp.ne.s32.totalorder %s3894_s23, 0 }
  0x36   : > { %s5037_s0 = smov (!%p185_p9, %s2752_s0), 31  ;;  %vm201_vm0 = vcmask (!%p2755_p10), 7168   ;;  %v266_v0 = vld [vmem:[%s5003_s3] sm:$0xff] (!%p2755_p10)  ;;  %v267_v1 = vld [vmem:[%s5003_s3 + $0x18] sm:$0xff] (!%p2755_p10)  ;;  %v3774_v2 = vmov (!%p2755_p10), -1e+30  }
  0x37   : > { %s188_s6 = sadd.s32 %s2753_s5, %s5037_s0  ;;  %200 = sbr.rel (%p2755_p10) target bundleno = 301 (0x12d), region = 32  ;;  %202 = vst.msk [vmem:[#allocation3] sm:$0xff] (!%p2755_p10), %vm201_vm0, %v3774_v2  ;;  %203 = vst.msk [vmem:[#allocation3 + $0x8] sm:$0xff] (!%p2755_p10), %vm201_vm0, %v3774_v2  ;;  %v3775_v3 = vmov (!%p2755_p10), 0.0   ;;  %v3220_v4 = vpack.c.bf16 (!%p2755_p10), %v267_v1, %v266_v0  ;;  %v268_v5 = vld [vmem:[%s5003_s3 + $0x30] sm:$0xff] (!%p2755_p10)  ;;  %v269_v6 = vld [vmem:[%s5003_s3 + $0x48] sm:$0xff] (!%p2755_p10) }
  0x38   : > { %s2754_s9 = sshll.u32 %s188_s6, 3  ;;  %204 = vst.msk [vmem:[#allocation3 + $0x10] sm:$0xff] (!%p2755_p10), %vm201_vm0, %v3774_v2  ;;  %205 = vst.msk [vmem:[#allocation3 + $0x18] sm:$0xff] (!%p2755_p10), %vm201_vm0, %v3774_v2  ;;  %v3224_v7 = vpack.c.bf16 (!%p2755_p10), %v269_v6, %v268_v5  ;;  %v270_v8 = vld [vmem:[%s5003_s3 + $0x60] sm:$0xff] (!%p2755_p10)  ;;  %v271_v9 = vld [vmem:[%s5003_s3 + $0x78] sm:$0xff] (!%p2755_p10)  ;;  %vm274_vm1 = vcmask (!%p2755_p10), 523264  }
  0x39   : > { %s3899_s14 = scalar_lea.vmem %s5002_s2, %s2754_s9  ;;  %206 = vst.msk [vmem:[#allocation3 + $0x20] sm:$0xff] (!%p2755_p10), %vm201_vm0, %v3774_v2  ;;  %207 = vst.msk [vmem:[#allocation3 + $0x28] sm:$0xff] (!%p2755_p10), %vm201_vm0, %v3774_v2  ;;  %3221 = vmatprep.subr.bf16.mxu0 (!%p2755_p10), %v3220_v4  ;;  %3380 = vmatprep.subr.bf16.mxu1 (!%p2755_p10), %v3220_v4  ;;  %v3228_v12 = vpack.c.bf16 (!%p2755_p10), %v271_v9, %v270_v8  ;;  %v272_v13 = vld [vmem:[%s5003_s3 + $0x90] sm:$0xff] (!%p2755_p10)  ;;  %v273_v14 = vld [vmem:[%s5003_s3 + $0xa8] sm:$0xff] (!%p2755_p10) }
  0x3a   : > { %208 = vst.msk [vmem:[#allocation3 + $0x30] sm:$0xff] (!%p2755_p10), %vm201_vm0, %v3774_v2  ;;  %209 = vst.msk [vmem:[#allocation3 + $0x38] sm:$0xff] (!%p2755_p10), %vm201_vm0, %v3774_v2  ;;  %v250_v10 = vld [vmem:[%s3899_s14] sm:$0xff] (!%p2755_p10)  ;;  %3223 = vmatpush3.bf16.msra.mxu0 (!%p2755_p10), %v3220_v4  ;;  %3384 = vmatpush3.bf16.msra.mxu1 (!%p2755_p10), %v3220_v4  ;;  %v3232_v15 = vpack.c.bf16 (!%p2755_p10), %v273_v14, %v272_v13  ;;  %v251_v16 = vld [vmem:[%s3899_s14 + $0x8] sm:$0xff] (!%p2755_p10) }
  0x3b   : > { %210 = vst.msk [vmem:[#allocation3 + $0x40] sm:$0xff] (!%p2755_p10), %vm201_vm0, %v3774_v2  ;;  %211 = vst.msk [vmem:[#allocation3 + $0x48] sm:$0xff] (!%p2755_p10), %vm201_vm0, %v3774_v2  ;;  %v258_v11 = vld [vmem:[%s3899_s14 + $0x40] sm:$0xff] (!%p2755_p10)  ;;  %3225 = vmatprep.subr.bf16.mxu0 (!%p2755_p10), %v3224_v7  ;;  %3381 = vmatprep.subr.bf16.mxu1 (!%p2755_p10), %v3224_v7  ;;  %v259_v17 = vld [vmem:[%s3899_s14 + $0x48] sm:$0xff] (!%p2755_p10) }
  0x3c   : > { %212 = vst.msk [vmem:[#allocation3 + $0x50] sm:$0xff] (!%p2755_p10), %vm201_vm0, %v3774_v2  ;;  %213 = vst.msk [vmem:[#allocation3 + $0x58] sm:$0xff] (!%p2755_p10), %vm201_vm0, %v3774_v2  ;;  %2972 = vmatprep.mubr.msk.f32.mxu0 (!%p2755_p10), %vm274_vm1, %v250_v10  ;;  %2984 = vmatprep.mubr.msk.f32.mxu1 (!%p2755_p10), %vm274_vm1, %v258_v11  ;;  %v252_v18 = vld [vmem:[%s3899_s14 + $0x10] sm:$0xff] (!%p2755_p10)  ;;  %v253_v20 = vld [vmem:[%s3899_s14 + $0x18] sm:$0xff] (!%p2755_p10) }
  0x3d   : > { %214 = vst.msk [vmem:[#allocation3 + $0x60] sm:$0xff] (!%p2755_p10), %vm201_vm0, %v3774_v2  ;;  %215 = vst.msk [vmem:[#allocation3 + $0x68] sm:$0xff] (!%p2755_p10), %vm201_vm0, %v3774_v2  ;;  %v260_v19 = vld [vmem:[%s3899_s14 + $0x50] sm:$0xff] (!%p2755_p10)  ;;  %v261_v21 = vld [vmem:[%s3899_s14 + $0x58] sm:$0xff] (!%p2755_p10) }
  0x3e   : > { %216 = vst.msk [vmem:[#allocation3 + $0x70] sm:$0xff] %vm201_vm0, %v3774_v2  ;;  %217 = vst.msk [vmem:[#allocation3 + $0x78] sm:$0xff] %vm201_vm0, %v3774_v2  ;;  %3227 = vmatpush3.bf16.msra.mxu0 %v3224_v7  ;;  %3385 = vmatpush3.bf16.msra.mxu1 %v3224_v7  ;;  %v254_v22 = vld [vmem:[%s3899_s14 + $0x20] sm:$0xff]  ;;  %v255_v24 = vld [vmem:[%s3899_s14 + $0x28] sm:$0xff] }
  0x3f   : > { %218 = vst.msk [vmem:[#allocation4] sm:$0xff] %vm201_vm0, %v3775_v3  ;;  %219 = vst.msk [vmem:[#allocation4 + $0x8] sm:$0xff] %vm201_vm0, %v3775_v3  ;;  %3229 = vmatprep.subr.bf16.mxu0 %v3228_v12  ;;  %3382 = vmatprep.subr.bf16.mxu1 %v3228_v12  ;;  %v262_v23 = vld [vmem:[%s3899_s14 + $0x60] sm:$0xff]  ;;  %v263_v25 = vld [vmem:[%s3899_s14 + $0x68] sm:$0xff] }
  0x40   : > { %220 = vst.msk [vmem:[#allocation4 + $0x10] sm:$0xff] %vm201_vm0, %v3775_v3  ;;  %221 = vst.msk [vmem:[#allocation4 + $0x18] sm:$0xff] %vm201_vm0, %v3775_v3  ;;  %v256_v26 = vld [vmem:[%s3899_s14 + $0x30] sm:$0xff]  ;;  %v257_v28 = vld [vmem:[%s3899_s14 + $0x38] sm:$0xff] }
  0x41   : > { %222 = vst.msk [vmem:[#allocation4 + $0x20] sm:$0xff] %vm201_vm0, %v3775_v3  ;;  %223 = vst.msk [vmem:[#allocation4 + $0x28] sm:$0xff] %vm201_vm0, %v3775_v3  ;;  %v264_v27 = vld [vmem:[%s3899_s14 + $0x70] sm:$0xff]  ;;  %v265_v29 = vld [vmem:[%s3899_s14 + $0x78] sm:$0xff] }
  0x42   : > { %224 = vst.msk [vmem:[#allocation4 + $0x30] sm:$0xff] %vm201_vm0, %v3775_v3  ;;  %225 = vst.msk [vmem:[#allocation4 + $0x38] sm:$0xff] %vm201_vm0, %v3775_v3  ;;  %3231 = vmatpush3.bf16.msra.mxu0 %v3228_v12  ;;  %3386 = vmatpush3.bf16.msra.mxu1 %v3228_v12 }
  0x43   : > { %226 = vst.msk [vmem:[#allocation4 + $0x40] sm:$0xff] %vm201_vm0, %v3775_v3  ;;  %227 = vst.msk [vmem:[#allocation4 + $0x48] sm:$0xff] %vm201_vm0, %v3775_v3  ;;  %3233 = vmatprep.subr.bf16.mxu0 %v3232_v15  ;;  %3383 = vmatprep.subr.bf16.mxu1 %v3232_v15 }
  0x44   : > { %228 = vst.msk [vmem:[#allocation4 + $0x50] sm:$0xff] %vm201_vm0, %v3775_v3  ;;  %229 = vst.msk [vmem:[#allocation4 + $0x58] sm:$0xff] %vm201_vm0, %v3775_v3 }
  0x45   : > { %230 = vst.msk [vmem:[#allocation4 + $0x60] sm:$0xff] %vm201_vm0, %v3775_v3  ;;  %231 = vst.msk [vmem:[#allocation4 + $0x68] sm:$0xff] %vm201_vm0, %v3775_v3 }
  0x46   : > { %232 = vst.msk [vmem:[#allocation4 + $0x70] sm:$0xff] %vm201_vm0, %v3775_v3  ;;  %233 = vst.msk [vmem:[#allocation4 + $0x78] sm:$0xff] %vm201_vm0, %v3775_v3  ;;  %3235 = vmatpush3.bf16.msra.mxu0 %v3232_v15  ;;  %3387 = vmatpush3.bf16.msra.mxu1 %v3232_v15 }
  0x47   : > { %234 = vst [vmem:[#allocation5] sm:$0xff] %v3775_v3  ;;  %235 = vst [vmem:[#allocation5 + $0x8] sm:$0xff] %v3775_v3 }
  0x48   : > { %236 = vst [vmem:[#allocation5 + $0x10] sm:$0xff] %v3775_v3  ;;  %237 = vst [vmem:[#allocation5 + $0x18] sm:$0xff] %v3775_v3 }
  0x49   : > { %238 = vst [vmem:[#allocation5 + $0x20] sm:$0xff] %v3775_v3  ;;  %239 = vst [vmem:[#allocation5 + $0x28] sm:$0xff] %v3775_v3  ;;  %2973 = vmatmul.mubr.msk.f32.vlgmr.msra.gmra.mrb[0].mxu0 %vm274_vm1, %v251_v16  ;;  %2985 = vmatmul.mubr.msk.f32.vlgmr.msra.gmra.mrb[0].mxu1 %vm274_vm1, %v259_v17 }
  0x4a   : > { %240 = vst [vmem:[#allocation5 + $0x30] sm:$0xff] %v3775_v3  ;;  %241 = vst [vmem:[#allocation5 + $0x38] sm:$0xff] %v3775_v3  ;;  %2975 = vmatprep.mubr.msk.f32.mxu0 %vm274_vm1, %v252_v18  ;;  %2987 = vmatprep.mubr.msk.f32.mxu1 %vm274_vm1, %v260_v19 }
  0x4b   : > { %242 = vst [vmem:[#allocation5 + $0x40] sm:$0xff] %v3775_v3  ;;  %243 = vst [vmem:[#allocation5 + $0x48] sm:$0xff] %v3775_v3 }
  0x4c   : > { %244 = vst [vmem:[#allocation5 + $0x50] sm:$0xff] %v3775_v3  ;;  %245 = vst [vmem:[#allocation5 + $0x58] sm:$0xff] %v3775_v3 }
  0x4d   : > { %246 = vst [vmem:[#allocation5 + $0x60] sm:$0xff] %v3775_v3  ;;  %247 = vst [vmem:[#allocation5 + $0x68] sm:$0xff] %v3775_v3  ;;  %2976 = vmatmul.mubr.msk.f32.gmra.mrb[2].mxu0 %vm274_vm1, %v253_v20  ;;  %2988 = vmatmul.mubr.msk.f32.gmra.mrb[2].mxu1 %vm274_vm1, %v261_v21 }
  0x4e   : > { %248 = vst [vmem:[#allocation5 + $0x70] sm:$0xff] %v3775_v3  ;;  %249 = vst [vmem:[#allocation5 + $0x78] sm:$0xff] %v3775_v3  ;;  %2978 = vmatprep.mubr.msk.f32.mxu0 %vm274_vm1, %v254_v22  ;;  %2990 = vmatprep.mubr.msk.f32.mxu1 %vm274_vm1, %v262_v23 }
  0x51   : > { %2979 = vmatmul.mubr.msk.f32.gmra.mrb[4].mxu0 %vm274_vm1, %v255_v24  ;;  %2991 = vmatmul.mubr.msk.f32.gmra.mrb[4].mxu1 %vm274_vm1, %v263_v25 }
  0x52   : > { %2981 = vmatprep.mubr.msk.f32.mxu0 %vm274_vm1, %v256_v26  ;;  %2993 = vmatprep.mubr.msk.f32.mxu1 %vm274_vm1, %v264_v27 }
  0x55   : > { %2982 = vmatmul.mubr.msk.f32.gmra.mrb[6].mxu0 %vm274_vm1, %v257_v28  ;;  %2994 = vmatmul.mubr.msk.f32.gmra.mrb[6].mxu1 %vm274_vm1, %v265_v29 }
 0x11c   : > { %v2974_v30 = vpop.f32.mrb[0].mxu0  ;;  %v2986_v31 = vpop.f32.mrb[0].mxu1 }
 0x11d   : > { %v469_v32 = vmul.f32 0.25, %v2974_v30  ;;  %v477_v33 = vmul.f32 0.25, %v2986_v31  ;;  %v389_v34 = vpop.f32.mrb[1].mxu0  ;;  %v429_v35 = vpop.f32.mrb[1].mxu1 }
 0x11e   : > { %v468_v36 = vmul.f32 0.25, %v389_v34  ;;  %v476_v37 = vmul.f32 0.25, %v429_v35 }
 0x11f   : > { %485 = vst [vmem:[#allocation2 + $0x8] sm:$0xff] %v469_v32  ;;  %493 = vst [vmem:[#allocation2 + $0x48] sm:$0xff] %v477_v33 }
 0x120   : > { %484 = vst [vmem:[#allocation2] sm:$0xff] %v468_v36  ;;  %492 = vst [vmem:[#allocation2 + $0x40] sm:$0xff] %v476_v37  ;;  %v2977_v38 = vpop.f32.mrb[2].mxu0  ;;  %v2989_v39 = vpop.f32.mrb[2].mxu1 }
 0x121   : > { %v471_v40 = vmul.f32 0.25, %v2977_v38  ;;  %v479_v41 = vmul.f32 0.25, %v2989_v39  ;;  %v399_v42 = vpop.f32.mrb[3].mxu0  ;;  %v439_v43 = vpop.f32.mrb[3].mxu1 }
 0x122   : > { %v470_v44 = vmul.f32 0.25, %v399_v42  ;;  %v478_v45 = vmul.f32 0.25, %v439_v43 }
 0x123   : > { %487 = vst [vmem:[#allocation2 + $0x18] sm:$0xff] %v471_v40  ;;  %495 = vst [vmem:[#allocation2 + $0x58] sm:$0xff] %v479_v41 }
 0x124   : > { %486 = vst [vmem:[#allocation2 + $0x10] sm:$0xff] %v470_v44  ;;  %494 = vst [vmem:[#allocation2 + $0x50] sm:$0xff] %v478_v45  ;;  %v2980_v46 = vpop.f32.mrb[4].mxu0  ;;  %v2992_v47 = vpop.f32.mrb[4].mxu1 }
 0x125   : > { %v473_v48 = vmul.f32 0.25, %v2980_v46  ;;  %v481_v49 = vmul.f32 0.25, %v2992_v47  ;;  %v409_v50 = vpop.f32.mrb[5].mxu0  ;;  %v449_v51 = vpop.f32.mrb[5].mxu1 }
 0x126   : > { %v472_v52 = vmul.f32 0.25, %v409_v50  ;;  %v480_v53 = vmul.f32 0.25, %v449_v51 }
 0x127   : > { %489 = vst [vmem:[#allocation2 + $0x28] sm:$0xff] %v473_v48  ;;  %497 = vst [vmem:[#allocation2 + $0x68] sm:$0xff] %v481_v49 }
 0x128   : > { %488 = vst [vmem:[#allocation2 + $0x20] sm:$0xff] %v472_v52  ;;  %496 = vst [vmem:[#allocation2 + $0x60] sm:$0xff] %v480_v53  ;;  %v2983_v54 = vpop.f32.mrb[6].mxu0  ;;  %v2995_v55 = vpop.f32.mrb[6].mxu1 }
 0x129   : > { %v475_v56 = vmul.f32 0.25, %v2983_v54  ;;  %v483_v57 = vmul.f32 0.25, %v2995_v55  ;;  %v419_v58 = vpop.f32.mrb[7].mxu0  ;;  %v459_v59 = vpop.f32.mrb[7].mxu1 }
 0x12a   : > { %v474_v60 = vmul.f32 0.25, %v419_v58  ;;  %v482_v61 = vmul.f32 0.25, %v459_v59 }
 0x12b   : > { %491 = vst [vmem:[#allocation2 + $0x38] sm:$0xff] %v475_v56  ;;  %499 = vst [vmem:[#allocation2 + $0x78] sm:$0xff] %v483_v57 }
 0x12c   : > { %490 = vst [vmem:[#allocation2 + $0x30] sm:$0xff] %v474_v60  ;;  %498 = vst [vmem:[#allocation2 + $0x70] sm:$0xff] %v482_v61 }
 0x12d PF: > { %p2772_p11 = scmp.ne.s32.totalorder %s3894_s23, %s3890_s21 }
 0x12e   : > { %v521_v62 = vld [vmem:[%s5003_s3 + $0x10] sm:$0xff] (!%p2772_p11)  ;;  %v523_v63 = vld [vmem:[%s5003_s3 + $0x28] sm:$0xff] (!%p2772_p11)  ;;  %v522_v2 = vld [vmem:[%s5003_s3 + $0x20] sm:$0xff] (!%p2772_p11)  ;;  %v3776_v5 = vmov (!%p2772_p11), 0.0   ;;  %vm536_vm2 = vcmask (!%p2772_p11), 523264   ;;  %s2789_s18 = sshll.u32 (!%p2772_p11), %s3894_s23, 7 }
 0x12f   : > { %503 = sbr.rel (%p2772_p11) target bundleno = 1447 (0x5a7), region = 36  ;;  %v520_v0 = vld [vmem:[%s5003_s3 + $0x8] sm:$0xff] (!%p2772_p11)  ;;  %v3236_v1 = vpack.c.bf16 (!%p2772_p11), %v523_v63, %v521_v62  ;;  %v525_v3 = vld [vmem:[%s5003_s3 + $0x40] sm:$0xff] (!%p2772_p11)  ;;  %v527_v4 = vld [vmem:[%s5003_s3 + $0x58] sm:$0xff] (!%p2772_p11)  ;;  %649 = vmatprep.mubr.f32.mxu0 (!%p2772_p11), %v3776_v5  ;;  %s747_s20 = sshra.s32 (!%p2772_p11), %s2789_s18, 3 }
 0x130   : > { %v3238_v6 = vpack.c.bf16 (!%p2772_p11), %v522_v2, %v520_v0  ;;  %v3240_v7 = vpack.c.bf16 (!%p2772_p11), %v527_v4, %v525_v3  ;;  %v524_v8 = vld [vmem:[%s5003_s3 + $0x38] sm:$0xff] (!%p2772_p11)  ;;  %v526_v9 = vld [vmem:[%s5003_s3 + $0x50] sm:$0xff] (!%p2772_p11)  ;;  %v531_v11 = vld [vmem:[%s5003_s3 + $0x88] sm:$0xff] (!%p2772_p11)  ;;  %s2802_s0 = sshll.u32 (!%p2772_p11), %s747_s20, 4 }
 0x131   : > { %v529_v10 = vld [vmem:[%s5003_s3 + $0x70] sm:$0xff] (!%p2772_p11)  ;;  %3237 = vmatprep.subr.bf16.mxu0 (!%p2772_p11), %v3236_v1  ;;  %v3242_v12 = vpack.c.bf16 (!%p2772_p11), %v526_v9, %v524_v8  ;;  %v528_v14 = vld [vmem:[%s5003_s3 + $0x68] sm:$0xff] (!%p2772_p11)  ;;  %v530_v15 = vld [vmem:[%s5003_s3 + $0x80] sm:$0xff] (!%p2772_p11)  ;;  %s4091_s5 = scalar_lea.vmem (!%p2772_p11), [#allocation6], %s2802_s0 }
 0x132   : > { %3239 = vmatpush1.bf16.msra.mxu0 (!%p2772_p11), %v3238_v6  ;;  %v3244_v13 = vpack.c.bf16 (!%p2772_p11), %v531_v11, %v529_v10  ;;  %v533_v16 = vld [vmem:[%s5003_s3 + $0xa0] sm:$0xff] (!%p2772_p11)  ;;  %v535_v17 = vld [vmem:[%s5003_s3 + $0xb8] sm:$0xff] (!%p2772_p11)  ;;  %v3246_v18 = vpack.c.bf16 (!%p2772_p11), %v530_v15, %v528_v14  ;;  %v534_v21 = vld [vmem:[%s5003_s3 + $0xb0] sm:$0xff] (!%p2772_p11) }
 0x133   : > { %3241 = vmatprep.subr.bf16.mxu0 (!%p2772_p11), %v3240_v7  ;;  %v3248_v19 = vpack.c.bf16 (!%p2772_p11), %v535_v17, %v533_v16  ;;  %v532_v20 = vld [vmem:[%s5003_s3 + $0x98] sm:$0xff] (!%p2772_p11)  ;;  %v504_v23 = vld [vmem:[%s3899_s14] sm:$0xff] (!%p2772_p11)  ;;  %v505_v24 = vld [vmem:[%s3899_s14 + $0x8] sm:$0xff] (!%p2772_p11) }
 0x134   : > { %v3250_v22 = vpack.c.bf16 (!%p2772_p11), %v534_v21, %v532_v20  ;;  %v506_v25 = vld [vmem:[%s3899_s14 + $0x10] sm:$0xff] (!%p2772_p11)  ;;  %v507_v26 = vld [vmem:[%s3899_s14 + $0x18] sm:$0xff] (!%p2772_p11)  ;;  %v508_v27 = vld [vmem:[%s3899_s14 + $0x20] sm:$0xff] (!%p2772_p11) }
 0x135   : > { %v509_v28 = vld [vmem:[%s3899_s14 + $0x28] sm:$0xff] (!%p2772_p11)  ;;  %v510_v29 = vld [vmem:[%s3899_s14 + $0x30] sm:$0xff] (!%p2772_p11)  ;;  %v511_v30 = vld [vmem:[%s3899_s14 + $0x38] sm:$0xff] (!%p2772_p11) }
 0x136   : > { %3243 = vmatpush1.bf16.msra.mxu0 %v3242_v12  ;;  %v512_v31 = vld [vmem:[%s3899_s14 + $0x40] sm:$0xff]  ;;  %v513_v32 = vld [vmem:[%s3899_s14 + $0x48] sm:$0xff]  ;;  %v514_v33 = vld [vmem:[%s3899_s14 + $0x50] sm:$0xff] }
 0x137   : > { %3245 = vmatprep.subr.bf16.mxu0 %v3244_v13  ;;  %v515_v34 = vld [vmem:[%s3899_s14 + $0x58] sm:$0xff]  ;;  %v516_v35 = vld [vmem:[%s3899_s14 + $0x60] sm:$0xff]  ;;  %v517_v36 = vld [vmem:[%s3899_s14 + $0x68] sm:$0xff] }
 0x138   : > { %v518_v37 = vld [vmem:[%s3899_s14 + $0x70] sm:$0xff]  ;;  %v519_v38 = vld [vmem:[%s3899_s14 + $0x78] sm:$0xff]  ;;  %v784_v39 = vld [vmem:[#allocation2] sm:$0xff] }
 0x139   : > { %3028 = vmatprep.mubr.f32.mxu1 %v784_v39  ;;  %v945_v39 = vlaneseq }
 0x13a   : > { %3247 = vmatpush1.bf16.msra.mxu0 %v3246_v18 }
 0x13b   : > { %3249 = vmatprep.subr.bf16.mxu0 %v3248_v19 }
 0x13e   : > { %3251 = vmatpush1.bf16.msra.mxu0 %v3250_v22 }
 0x141   : > { %2773 = vmatmul.mubr.msk.f32.vlgmr.msra.gmra.mrb[0].mxu0 %vm536_vm2, %v504_v23 }
 0x142   : > { %655 = vmatprep.mubr.f32.mxu0 %v3776_v5 }
 0x145   : > { %2774 = vmatmul.mubr.msk.f32.gmra.mrb[2].mxu0 %vm536_vm2, %v505_v24  ;;  %v785_v24 = vld [vmem:[#allocation2 + $0x8] sm:$0xff] }
 0x146   : > { %661 = vmatprep.mubr.f32.mxu0 %v3776_v5 }
 0x149   : > { %2775 = vmatmul.mubr.msk.f32.gmra.mrb[4].mxu0 %vm536_vm2, %v506_v25  ;;  %v786_v25 = vld [vmem:[#allocation2 + $0x10] sm:$0xff] }
 0x14a   : > { %667 = vmatprep.mubr.f32.mxu0 %v3776_v5 }
 0x14d   : > { %2776 = vmatmul.mubr.msk.f32.gmra.mrb[6].mxu0 %vm536_vm2, %v507_v26  ;;  %v787_v26 = vld [vmem:[#allocation2 + $0x18] sm:$0xff] }
 0x14e   : > { %673 = vmatprep.mubr.f32.mxu0 %v3776_v5 }
 0x151   : > { %2777 = vmatmul.mubr.msk.f32.gmra.mrb[8].mxu0 %vm536_vm2, %v508_v27  ;;  %v788_v27 = vld [vmem:[#allocation2 + $0x20] sm:$0xff] }
 0x152   : > { %679 = vmatprep.mubr.f32.mxu0 %v3776_v5 }
 0x155   : > { %2778 = vmatmul.mubr.msk.f32.gmra.mrb[10].mxu0 %vm536_vm2, %v509_v28  ;;  %v789_v28 = vld [vmem:[#allocation2 + $0x28] sm:$0xff] }
 0x156   : > { %685 = vmatprep.mubr.f32.mxu0 %v3776_v5 }
 0x159   : > { %2779 = vmatmul.mubr.msk.f32.gmra.mrb[12].mxu0 %vm536_vm2, %v510_v29  ;;  %v790_v29 = vld [vmem:[#allocation2 + $0x30] sm:$0xff] }
 0x15a   : > { %691 = vmatprep.mubr.f32.mxu0 %v3776_v5 }
 0x15d   : > { %2780 = vmatmul.mubr.msk.f32.gmra.mrb[14].mxu0 %vm536_vm2, %v511_v30  ;;  %v791_v30 = vld [vmem:[#allocation2 + $0x38] sm:$0xff] }
 0x15e   : > { %697 = vmatprep.mubr.f32.mxu0 %v3776_v5 }
 0x161   : > { %2781 = vmatmul.mubr.msk.f32.gmra.mrb[16].mxu0 %vm536_vm2, %v512_v31  ;;  %v792_v31 = vld [vmem:[#allocation2 + $0x40] sm:$0xff] }
 0x162   : > { %703 = vmatprep.mubr.f32.mxu0 %v3776_v5 }
 0x165   : > { %2782 = vmatmul.mubr.msk.f32.gmra.mrb[18].mxu0 %vm536_vm2, %v513_v32  ;;  %v793_v32 = vld [vmem:[#allocation2 + $0x48] sm:$0xff] }
 0x166   : > { %709 = vmatprep.mubr.f32.mxu0 %v3776_v5 }
 0x169   : > { %2783 = vmatmul.mubr.msk.f32.gmra.mrb[20].mxu0 %vm536_vm2, %v514_v33  ;;  %v794_v33 = vld [vmem:[#allocation2 + $0x50] sm:$0xff] }
 0x16a   : > { %715 = vmatprep.mubr.f32.mxu0 %v3776_v5 }
 0x16d   : > { %2784 = vmatmul.mubr.msk.f32.gmra.mrb[22].mxu0 %vm536_vm2, %v515_v34  ;;  %v795_v34 = vld [vmem:[#allocation2 + $0x58] sm:$0xff] }
 0x16e   : > { %721 = vmatprep.mubr.f32.mxu0 %v3776_v5 }
 0x171   : > { %2785 = vmatmul.mubr.msk.f32.gmra.mrb[24].mxu0 %vm536_vm2, %v516_v35  ;;  %v796_v35 = vld [vmem:[#allocation2 + $0x60] sm:$0xff] }
 0x172   : > { %727 = vmatprep.mubr.f32.mxu0 %v3776_v5 }
 0x175   : > { %2786 = vmatmul.mubr.msk.f32.gmra.mrb[26].mxu0 %vm536_vm2, %v517_v36  ;;  %v797_v36 = vld [vmem:[#allocation2 + $0x68] sm:$0xff] }
 0x176   : > { %733 = vmatprep.mubr.f32.mxu0 %v3776_v5 }
 0x179   : > { %2787 = vmatmul.mubr.msk.f32.gmra.mrb[28].mxu0 %vm536_vm2, %v518_v37  ;;  %v798_v37 = vld [vmem:[#allocation2 + $0x70] sm:$0xff] }
 0x17a   : > { %739 = vmatprep.mubr.f32.mxu0 %v3776_v5 }
 0x17d   : > { %2788 = vmatmul.mubr.msk.f32.gmra.mrb[30].mxu0 %vm536_vm2, %v519_v38  ;;  %v799_v38 = vld [vmem:[#allocation2 + $0x78] sm:$0xff] }
 0x214   : > { %v651_v40 = vpop.f32.mrb[0].mxu0 }
 0x215   : > { %752 = vst [vmem:[%s4091_s5] sm:$0xff] %v651_v40  ;;  %v653_v41 = vpop.f32.mrb[1].mxu0 }
 0x216   : > { %753 = vst [vmem:[%s4091_s5 + $0x8] sm:$0xff] %v653_v41 }
 0x218   : > { %v657_v42 = vpop.f32.mrb[2].mxu0 }
 0x219   : > { %754 = vst [vmem:[%s4091_s5 + $0x10] sm:$0xff] %v657_v42  ;;  %v659_v43 = vpop.f32.mrb[3].mxu0  ;;  %v3252_v44 = vpack.c.bf16 %v657_v42, %v651_v40  ;;  %v4161_v40 = vshrl.u32 %v945_v39, 7  ;;  %v4164_v42 = vand.u32 127, %v945_v39  ;;  %v4277_v39 = vld [vmem:[#allocation3 + $0x20] sm:$0xff] }
 0x21a   : > { %755 = vst [vmem:[%s4091_s5 + $0x18] sm:$0xff] %v659_v43  ;;  %v4097_v45 = vpack.c.bf16 %v659_v43, %v653_v41 }
 0x21b   : > { %3253 = vmatprep.subr.bf16.mxu1 %v3252_v44  ;;  %v947_v41 = vadd.s32 8, %v4161_v40  ;;  %v949_v43 = vadd.s32 24, %v4161_v40  ;;  %vm964_vm4 = vcmp.le.s32.totalorder %v4164_v42, %v4161_v40 }
 0x21c   : > { %v663_v46 = vpop.f32.mrb[4].mxu0  ;;  %3255 = vmatpush3.bf16.xpose.msra.mxu1 %v3252_v44  ;;  %3285 = vmatprep.subr.bf16.mxu0 %v4097_v45 }
 0x21d   : > { %756 = vst [vmem:[%s4091_s5 + $0x20] sm:$0xff] %v663_v46  ;;  %v665_v47 = vpop.f32.mrb[5].mxu0  ;;  %3287 = vmatpush3.bf16.msra.mxu0 %v4097_v45  ;;  %vm965_vm3 = vcmp.le.s32.totalorder %v4164_v42, %v947_v41  ;;  %vm967_vm5 = vcmp.le.s32.totalorder %v4164_v42, %v949_v43 }
 0x21e   : > { %757 = vst [vmem:[%s4091_s5 + $0x28] sm:$0xff] %v665_v47 }
 0x220   : > { %v669_v48 = vpop.f32.mrb[6].mxu0 }
 0x221   : > { %758 = vst [vmem:[%s4091_s5 + $0x30] sm:$0xff] %v669_v48  ;;  %v3256_v49 = vpack.c.bf16 %v669_v48, %v663_v46  ;;  %v671_v50 = vpop.f32.mrb[7].mxu0  ;;  %v950_v48 = vadd.s32 32, %v4161_v40 }
 0x222   : > { %759 = vst [vmem:[%s4091_s5 + $0x38] sm:$0xff] %v671_v50  ;;  %v4105_v51 = vpack.c.bf16 %v671_v50, %v665_v47  ;;  %v948_v47 = vadd.s32 16, %v4161_v40  ;;  %v951_v50 = vadd.s32 40, %v4161_v40 }
 0x223   : > { %3257 = vmatprep.subr.bf16.mxu1 %v3256_v49  ;;  %vm968_vm7 = vcmp.le.s32.totalorder %v4164_v42, %v950_v48 }
 0x224   : > { %v675_v52 = vpop.f32.mrb[8].mxu0  ;;  %3259 = vmatpush3.bf16.xpose.msra.mxu1 %v3256_v49  ;;  %3289 = vmatprep.subr.bf16.mxu0 %v4105_v51  ;;  %vm966_vm6 = vcmp.le.s32.totalorder %v4164_v42, %v948_v47  ;;  %vm969_vm8 = vcmp.le.s32.totalorder %v4164_v42, %v951_v50  ;;  %v4292_v47 = vld [vmem:[#allocation3 + $0x30] sm:$0xff] }
 0x225   : > { %760 = vst [vmem:[%s4091_s5 + $0x40] sm:$0xff] %v675_v52  ;;  %v677_v53 = vpop.f32.mrb[9].mxu0  ;;  %3291 = vmatpush3.bf16.msra.mxu0 %v4105_v51 }
 0x226   : > { %761 = vst [vmem:[%s4091_s5 + $0x48] sm:$0xff] %v677_v53 }
 0x228   : > { %v681_v54 = vpop.f32.mrb[10].mxu0 }
 0x229   : > { %762 = vst [vmem:[%s4091_s5 + $0x50] sm:$0xff] %v681_v54  ;;  %v3260_v55 = vpack.c.bf16 %v681_v54, %v675_v52  ;;  %v683_v56 = vpop.f32.mrb[11].mxu0  ;;  %v952_v54 = vadd.s32 48, %v4161_v40 }
 0x22a   : > { %763 = vst [vmem:[%s4091_s5 + $0x58] sm:$0xff] %v683_v56  ;;  %v4113_v57 = vpack.c.bf16 %v683_v56, %v677_v53  ;;  %v953_v56 = vadd.s32 56, %v4161_v40 }
 0x22b   : > { %3261 = vmatprep.subr.bf16.mxu1 %v3260_v55  ;;  %vm970_vm9 = vcmp.le.s32.totalorder %v4164_v42, %v952_v54 }
 0x22c   : > { %v687_v58 = vpop.f32.mrb[12].mxu0  ;;  %3263 = vmatpush3.bf16.xpose.msra.mxu1 %v3260_v55  ;;  %3293 = vmatprep.subr.bf16.mxu0 %v4113_v57  ;;  %vm971_vm10 = vcmp.le.s32.totalorder %v4164_v42, %v953_v56 }
 0x22d   : > { %764 = vst [vmem:[%s4091_s5 + $0x60] sm:$0xff] %v687_v58  ;;  %v689_v59 = vpop.f32.mrb[13].mxu0  ;;  %3295 = vmatpush3.bf16.msra.mxu0 %v4113_v57 }
 0x22e   : > { %765 = vst [vmem:[%s4091_s5 + $0x68] sm:$0xff] %v689_v59 }
 0x230   : > { %v693_v60 = vpop.f32.mrb[14].mxu0 }
 0x231   : > { %766 = vst [vmem:[%s4091_s5 + $0x70] sm:$0xff] %v693_v60  ;;  %v3264_v61 = vpack.c.bf16 %v693_v60, %v687_v58  ;;  %v695_v62 = vpop.f32.mrb[15].mxu0  ;;  %v955_v60 = vadd.s32 72, %v4161_v40 }
 0x232   : > { %767 = vst [vmem:[%s4091_s5 + $0x78] sm:$0xff] %v695_v62  ;;  %v4121_v63 = vpack.c.bf16 %v695_v62, %v689_v59 }
 0x233   : > { %3265 = vmatprep.subr.bf16.mxu1 %v3264_v61  ;;  %vm973_vm11 = vcmp.le.s32.totalorder %v4164_v42, %v955_v60 }
 0x234   : > { %v699_v0 = vpop.f32.mrb[16].mxu0  ;;  %3267 = vmatpush3.bf16.xpose.msra.mxu1 %v3264_v61  ;;  %3297 = vmatprep.subr.bf16.mxu0 %v4121_v63 }
 0x235   : > { %768 = vst [vmem:[%s4091_s5 + $0x80] sm:$0xff] %v699_v0  ;;  %v701_v1 = vpop.f32.mrb[17].mxu0  ;;  %3299 = vmatpush3.bf16.msra.mxu0 %v4121_v63 }
 0x236   : > { %769 = vst [vmem:[%s4091_s5 + $0x88] sm:$0xff] %v701_v1 }
 0x238   : > { %v705_v2 = vpop.f32.mrb[18].mxu0 }
 0x239   : > { %770 = vst [vmem:[%s4091_s5 + $0x90] sm:$0xff] %v705_v2  ;;  %v3268_v3 = vpack.c.bf16 %v705_v2, %v699_v0  ;;  %v707_v4 = vpop.f32.mrb[19].mxu0  ;;  %v954_v0 = vadd.s32 64, %v4161_v40 }
 0x23a   : > { %771 = vst [vmem:[%s4091_s5 + $0x98] sm:$0xff] %v707_v4  ;;  %v4129_v5 = vpack.c.bf16 %v707_v4, %v701_v1 }
 0x23b   : > { %3269 = vmatprep.subr.bf16.mxu1 %v3268_v3  ;;  %vm972_vm12 = vcmp.le.s32.totalorder %v4164_v42, %v954_v0 }
 0x23c   : > { %v711_v6 = vpop.f32.mrb[20].mxu0  ;;  %3271 = vmatpush3.bf16.xpose.msra.mxu1 %v3268_v3  ;;  %3301 = vmatprep.subr.bf16.mxu0 %v4129_v5 }
 0x23d   : > { %772 = vst [vmem:[%s4091_s5 + $0xa0] sm:$0xff] %v711_v6  ;;  %v713_v7 = vpop.f32.mrb[21].mxu0  ;;  %3303 = vmatpush3.bf16.msra.mxu0 %v4129_v5 }
 0x23e   : > { %773 = vst [vmem:[%s4091_s5 + $0xa8] sm:$0xff] %v713_v7 }
 0x240   : > { %v717_v8 = vpop.f32.mrb[22].mxu0 }
 0x241   : > { %774 = vst [vmem:[%s4091_s5 + $0xb0] sm:$0xff] %v717_v8  ;;  %v3272_v9 = vpack.c.bf16 %v717_v8, %v711_v6  ;;  %v719_v10 = vpop.f32.mrb[23].mxu0  ;;  %v956_v6 = vadd.s32 80, %v4161_v40  ;;  %v959_v8 = vadd.s32 104, %v4161_v40 }
 0x242   : > { %775 = vst [vmem:[%s4091_s5 + $0xb8] sm:$0xff] %v719_v10  ;;  %v4137_v11 = vpack.c.bf16 %v719_v10, %v713_v7  ;;  %v3777_v7 = vmov 0  }
 0x243   : > { %3273 = vmatprep.subr.bf16.mxu1 %v3272_v9  ;;  %3487 = vset.pattern.permute.xlu1 %v3777_v7  ;;  %vm974_vm13 = vcmp.le.s32.totalorder %v4164_v42, %v956_v6  ;;  %vm977_vm14 = vcmp.le.s32.totalorder %v4164_v42, %v959_v8  ;;  %v4328_v6 = vld [vmem:[#allocation3 + $0x40] sm:$0xff] }
 0x244   : > { %v723_v12 = vpop.f32.mrb[24].mxu0  ;;  %3275 = vmatpush3.bf16.xpose.msra.mxu1 %v3272_v9  ;;  %3305 = vmatprep.subr.bf16.mxu0 %v4137_v11 }
 0x245   : > { %776 = vst [vmem:[%s4091_s5 + $0xc0] sm:$0xff] %v723_v12  ;;  %v725_v13 = vpop.f32.mrb[25].mxu0  ;;  %3307 = vmatpush3.bf16.msra.mxu0 %v4137_v11  ;;  %3486 = vset.pattern.permute.xlu0 %v3777_v7 }
 0x246   : > { %777 = vst [vmem:[%s4091_s5 + $0xc8] sm:$0xff] %v725_v13 }
 0x248   : > { %v729_v14 = vpop.f32.mrb[26].mxu0 }
 0x249   : > { %778 = vst [vmem:[%s4091_s5 + $0xd0] sm:$0xff] %v729_v14  ;;  %v3276_v15 = vpack.c.bf16 %v729_v14, %v723_v12  ;;  %v731_v16 = vpop.f32.mrb[27].mxu0 }
 0x24a   : > { %779 = vst [vmem:[%s4091_s5 + $0xd8] sm:$0xff] %v731_v16  ;;  %v3308_v17 = vpack.c.bf16 %v731_v16, %v725_v13  ;;  %v957_v13 = vadd.s32 88, %v4161_v40  ;;  %v961_v16 = vadd.s32 120, %v4161_v40 }
 0x24b   : > { %3277 = vmatprep.subr.bf16.mxu1 %v3276_v15 }
 0x24c   : > { %v735_v18 = vpop.f32.mrb[28].mxu0  ;;  %3279 = vmatpush3.bf16.xpose.msra.mxu1 %v3276_v15  ;;  %3309 = vmatprep.subr.bf16.mxu0 %v3308_v17  ;;  %vm975_vm0 = vcmp.le.s32.totalorder %v4164_v42, %v957_v13  ;;  %vm979_vm1 = vcmp.le.s32.totalorder %v4164_v42, %v961_v16 }
 0x24d   : > { %780 = vst [vmem:[%s4091_s5 + $0xe0] sm:$0xff] %v735_v18  ;;  %v737_v19 = vpop.f32.mrb[29].mxu0  ;;  %3311 = vmatpush3.bf16.msra.mxu0 %v3308_v17 }
 0x24e   : > { %781 = vst [vmem:[%s4091_s5 + $0xe8] sm:$0xff] %v737_v19 }
 0x250   : > { %v741_v20 = vpop.f32.mrb[30].mxu0 }
 0x251   : > { %782 = vst [vmem:[%s4091_s5 + $0xf0] sm:$0xff] %v741_v20  ;;  %v3280_v21 = vpack.c.bf16 %v741_v20, %v735_v18  ;;  %v743_v22 = vpop.f32.mrb[31].mxu0 }
 0x252   : > { %783 = vst [vmem:[%s4091_s5 + $0xf8] sm:$0xff] %v743_v22  ;;  %v3312_v23 = vpack.c.bf16 %v743_v22, %v737_v19  ;;  %v960_v22 = vadd.s32 112, %v4161_v40 }
 0x253   : > { %3281 = vmatprep.subr.bf16.mxu1 %v3280_v21 }
 0x254   : > { %3283 = vmatpush3.bf16.xpose.msra.mxu1 %v3280_v21  ;;  %3313 = vmatprep.subr.bf16.mxu0 %v3312_v23  ;;  %vm978_vm2 = vcmp.le.s32.totalorder %v4164_v42, %v960_v22  ;;  %v4352_v22 = vld [vmem:[#allocation3 + $0x60] sm:$0xff] }
 0x255   : > { %3388 = vmatprep.subr.bf16.mxu1 %v4097_v45  ;;  %3315 = vmatpush3.bf16.msra.mxu0 %v3312_v23 }
 0x25b   : > { %3029 = vmatmul.mubr.f32.vlgmr.msra.gmra.mrb[0].mxu1 %v785_v24 }
 0x25c   : > { %3396 = vmatpush3.bf16.msra.mxu1 %v4097_v45  ;;  %3031 = vmatprep.mubr.f32.mxu1 %v786_v25 }
 0x25d   : > { %3389 = vmatprep.subr.bf16.mxu1 %v4105_v51 }
 0x25f   : > { %3032 = vmatmul.mubr.f32.gmra.mrb[2].mxu1 %v787_v26  ;;  %v4245_v26 = vld [vmem:[#allocation3 + $0x8] sm:$0xff] }
 0x260   : > { %3397 = vmatpush3.bf16.msra.mxu1 %v4105_v51  ;;  %3034 = vmatprep.mubr.f32.mxu1 %v788_v27 }
 0x261   : > { %3390 = vmatprep.subr.bf16.mxu1 %v4113_v57 }
 0x263   : > { %3035 = vmatmul.mubr.f32.gmra.mrb[4].mxu1 %v789_v28 }
 0x264   : > { %3398 = vmatpush3.bf16.msra.mxu1 %v4113_v57  ;;  %3037 = vmatprep.mubr.f32.mxu1 %v790_v29  ;;  %v4250_v29 = vld [vmem:[#allocation3] sm:$0xff] }
 0x265   : > { %3391 = vmatprep.subr.bf16.mxu1 %v4121_v63 }
 0x267   : > { %3038 = vmatmul.mubr.f32.gmra.mrb[6].mxu1 %v791_v30  ;;  %v4252_v30 = vld [vmem:[#allocation3 + $0x18] sm:$0xff] }
 0x268   : > { %3399 = vmatpush3.bf16.msra.mxu1 %v4121_v63  ;;  %3040 = vmatprep.mubr.f32.mxu1 %v792_v31 }
 0x269   : > { %3392 = vmatprep.subr.bf16.mxu1 %v4129_v5 }
 0x26b   : > { %3041 = vmatmul.mubr.f32.gmra.mrb[8].mxu1 %v793_v32 }
 0x26c   : > { %3400 = vmatpush3.bf16.msra.mxu1 %v4129_v5  ;;  %3043 = vmatprep.mubr.f32.mxu1 %v794_v33 }
 0x26d   : > { %3393 = vmatprep.subr.bf16.mxu1 %v4137_v11 }
 0x26f   : > { %3044 = vmatmul.mubr.f32.gmra.mrb[10].mxu1 %v795_v34 }
 0x270   : > { %3401 = vmatpush3.bf16.msra.mxu1 %v4137_v11  ;;  %3046 = vmatprep.mubr.f32.mxu1 %v796_v35  ;;  %v958_v11 = vadd.s32 96, %v4161_v40 }
 0x271   : > { %3394 = vmatprep.subr.bf16.mxu1 %v3308_v17 }
 0x272   : > { %vm976_vm15 = vcmp.le.s32.totalorder %v4164_v42, %v958_v11  ;;  %v4337_v11 = vld [vmem:[#allocation3 + $0x68] sm:$0xff] }
 0x273   : > { %3047 = vmatmul.mubr.f32.gmra.mrb[12].mxu1 %v797_v36  ;;  %v4265_v36 = vld [vmem:[#allocation3 + $0x10] sm:$0xff] }
 0x274   : > { %3402 = vmatpush3.bf16.msra.mxu1 %v3308_v17  ;;  %3049 = vmatprep.mubr.f32.mxu1 %v798_v37 }
 0x275   : > { %3395 = vmatprep.subr.bf16.mxu1 %v3312_v23 }
 0x277   : > { %3050 = vmatmul.mubr.f32.gmra.mrb[14].mxu1 %v799_v38 }
 0x278   : > { %3403 = vmatpush3.bf16.msra.mxu1 %v3312_v23 }
 0x32e   : > { %v3030_v44 = vpop.f32.mrb[0].mxu1 }
 0x32f   : > { %v866_v45 = vpop.f32.mrb[1].mxu1  ;;  %v4168_v46 = vsel %vm965_vm3, %v3030_v44, -1e+30  ;;  %vm1316_vm3 = vcmask 7168   ;;  %v4285_v44 = vld [vmem:[#allocation3 + $0x28] sm:$0xff] }
 0x330   : > { %1014 = vmax.xlane.f32.xlu0 %v4168_v46  ;;  %v4177_v52 = vsel %vm964_vm4, %v866_v45, -1e+30 }
 0x332   : > { %v3033_v49 = vpop.f32.mrb[2].mxu1 }
 0x333   : > { %v876_v51 = vpop.f32.mrb[3].mxu1  ;;  %v4179_v53 = vsel %vm967_vm5, %v3033_v49, -1e+30 }
 0x334   : > { %1012 = vmax.xlane.f32.xlu0 %v4177_v52  ;;  %1018 = vmax.xlane.f32.xlu1 %v4179_v53  ;;  %v4188_v58 = vsel %vm966_vm6, %v876_v51, -1e+30 }
 0x336   : > { %v3036_v55 = vpop.f32.mrb[4].mxu1 }
 0x337   : > { %v886_v57 = vpop.f32.mrb[5].mxu1  ;;  %v4195_v61 = vsel %vm969_vm8, %v3036_v55, -1e+30  ;;  %v4304_v55 = vld [vmem:[#allocation3 + $0x38] sm:$0xff] }
 0x338   : > { %1016 = vmax.xlane.f32.xlu1 %v4188_v58  ;;  %v4191_v59 = vsel %vm968_vm7, %v886_v57, -1e+30  ;;  %v4311_v57 = vld [vmem:[#allocation3 + $0x48] sm:$0xff] }
 0x339   : > { %1020 = vmax.xlane.f32.xlu0 %v4191_v59 }
 0x33a   : > { %v3039_v62 = vpop.f32.mrb[6].mxu1 }
 0x33b   : > { %v896_v63 = vpop.f32.mrb[7].mxu1  ;;  %v4205_v2 = vsel %vm971_vm10, %v3039_v62, -1e+30 }
 0x33c   : > { %1022 = vmax.xlane.f32.xlu1 %v4195_v61  ;;  %v4201_v1 = vsel %vm970_vm9, %v896_v63, -1e+30 }
 0x33d   : > { %1024 = vmax.xlane.f32.xlu0 %v4201_v1 }
 0x33e   : > { %v3042_v3 = vpop.f32.mrb[8].mxu1 }
 0x33f   : > { %v4207_v4 = vsel %vm973_vm11, %v3042_v3, -1e+30  ;;  %v906_v5 = vpop.f32.mrb[9].mxu1 }
 0x340   : > { %1026 = vmax.xlane.f32.xlu1 %v4205_v2  ;;  %v4214_v10 = vsel %vm972_vm12, %v906_v5, -1e+30 }
 0x341   : > { %1030 = vmax.xlane.f32.xlu0 %v4207_v4 }
 0x342   : > { %v3045_v9 = vpop.f32.mrb[10].mxu1 }
 0x343   : > { %v916_v12 = vpop.f32.mrb[11].mxu1  ;;  %v4232_v20 = vsel %vm975_vm0, %v3045_v9, -1e+30 }
 0x344   : > { %v4221_v15 = vsel %vm974_vm13, %v916_v12, -1e+30  ;;  %v4340_v12 = vld [vmem:[#allocation3 + $0x50] sm:$0xff] }
 0x345   : > { %1028 = vmax.xlane.f32.xlu0 %v4214_v10 }
 0x346   : > { %v3048_v14 = vpop.f32.mrb[12].mxu1 }
 0x347   : > { %v4225_v17 = vsel %vm977_vm14, %v3048_v14, -1e+30  ;;  %v926_v18 = vpop.f32.mrb[13].mxu1 }
 0x348   : > { %1038 = vmax.xlane.f32.xlu1 %v4225_v17  ;;  %v4230_v19 = vsel %vm976_vm15, %v926_v18, -1e+30 }
 0x349   : > { %1032 = vmax.xlane.f32.xlu0 %v4221_v15 }
 0x34a   : > { %v3051_v21 = vpop.f32.mrb[14].mxu1 }
 0x34b   : > { %v936_v23 = vpop.f32.mrb[15].mxu1  ;;  %v4238_v24 = vsel %vm979_vm1, %v3051_v21, -1e+30 }
 0x34c   : > { %1036 = vmax.xlane.f32.xlu1 %v4230_v19  ;;  %v4242_v25 = vsel %vm978_vm2, %v936_v23, -1e+30 }
 0x34d   : > { %1034 = vmax.xlane.f32.xlu0 %v4232_v20 }
 0x350   : > { %1042 = vmax.xlane.f32.xlu1 %v4238_v24 }
 0x354   : > { %1040 = vmax.xlane.f32.xlu1 %v4242_v25 }
 0x3bd   : > { %v1015_v27 = vpop.xlane.xlu0 %1014 }
 0x3be   : > { %v4248_v28 = vmax.f32 %v4245_v26, %v1015_v27  ;;  %v4360_v27 = vld [vmem:[#allocation3 + $0x58] sm:$0xff] }
 0x3c0   : > { %v1061_v31 = vsub.f32 %v4245_v26, %v4248_v28  ;;  %1623 = vst.msk [vmem:[#allocation3 + $0x8] sm:$0xff] %vm1316_vm3, %v4248_v28  ;;  %1115 = vperm.xlu1 %3487, %v4248_v28  }
 0x3c1   : > { %v1013_v32 = vpop.xlane.xlu0 %1012  ;;  %v1019_v33 = vpop.xlane.xlu1 %1018 }
 0x3c2   : > { %v4260_v34 = vmax.f32 %v4250_v29, %v1013_v32  ;;  %v4263_v35 = vmax.f32 %v4252_v30, %v1019_v33 }
 0x3c4   : > { %v1060_v37 = vsub.f32 %v4250_v29, %v4260_v34  ;;  %1622 = vst.msk [vmem:[#allocation3] sm:$0xff] %vm1316_vm3, %v4260_v34  ;;  %1625 = vst.msk [vmem:[#allocation3 + $0x18] sm:$0xff] %vm1316_vm3, %v4263_v35  ;;  %1110 = vperm.xlu0 %3486, %v4260_v34   ;;  %1125 = vperm.xlu1 %3487, %v4263_v35  }
 0x3c5   : > { %v1017_v40 = vpop.xlane.xlu1 %1016 }
 0x3c6   : > { %v4280_v41 = vmax.f32 %v4265_v36, %v1017_v40  ;;  %v1021_v42 = vpop.xlane.xlu0 %1020 }
 0x3c7   : > { %v4283_v43 = vmax.f32 %v4277_v39, %v1021_v42 }
 0x3c8   : > { %v1062_v45 = vsub.f32 %v4265_v36, %v4280_v41  ;;  %1624 = vst.msk [vmem:[#allocation3 + $0x10] sm:$0xff] %vm1316_vm3, %v4280_v41  ;;  %1120 = vperm.xlu1 %3487, %v4280_v41  }
 0x3c9   : > { %1626 = vst.msk [vmem:[#allocation3 + $0x20] sm:$0xff] %vm1316_vm3, %v4283_v43  ;;  %v1023_v49 = vpop.xlane.xlu1 %1022 }
 0x3ca   : > { %v4299_v50 = vmax.f32 %v4285_v44, %v1023_v49  ;;  %v1025_v51 = vpop.xlane.xlu0 %1024 }
 0x3cb   : > { %v4302_v54 = vmax.f32 %v4292_v47, %v1025_v51  ;;  %v4372_v51 = vld [vmem:[#allocation3 + $0x78] sm:$0xff] }
 0x3cc   : > { %1627 = vst.msk [vmem:[#allocation3 + $0x28] sm:$0xff] %vm1316_vm3, %v4299_v50  ;;  %1135 = vperm.xlu1 %3487, %v4299_v50   ;;  %v5011_v28 = vsub.f32 %v4285_v44, %v4299_v50 }
 0x3cd   : > { %1628 = vst.msk [vmem:[#allocation3 + $0x30] sm:$0xff] %vm1316_vm3, %v4302_v54  ;;  %v1027_v62 = vpop.xlane.xlu1 %1026 }
 0x3ce   : > { %v1031_v63 = vpop.xlane.xlu0 %1030  ;;  %v4318_v0 = vmax.f32 %v4304_v55, %v1027_v62  ;;  %v1086_v29 = vmul.f32 1.442695, %v5011_v28 }
 0x3cf   : > { %v4321_v3 = vmax.f32 %v4311_v57, %v1031_v63 }
 0x3d0   : > { %1130 = vperm.xlu1 %3487, %v4283_v43   ;;  %1629 = vst.msk [vmem:[#allocation3 + $0x38] sm:$0xff] %vm1316_vm3, %v4318_v0 }
 0x3d1   : > { %1631 = vst.msk [vmem:[#allocation3 + $0x48] sm:$0xff] %vm1316_vm3, %v4321_v3 }
 0x3d2   : > { %v1029_v8 = vpop.xlane.xlu0 %1028 }
 0x3d3   : > { %v4335_v9 = vmax.f32 %v4328_v6, %v1029_v8 }
 0x3d4   : > { %1145 = vperm.xlu1 %3487, %v4318_v0  }
 0x3d5   : > { %1630 = vst.msk [vmem:[#allocation3 + $0x40] sm:$0xff] %vm1316_vm3, %v4335_v9  ;;  %v1039_v14 = vpop.xlane.xlu1 %1038 }
 0x3d6   : > { %v4347_v16 = vmax.f32 %v4337_v11, %v1039_v14  ;;  %v1033_v18 = vpop.xlane.xlu0 %1032 }
 0x3d7   : > { %v4350_v21 = vmax.f32 %v4340_v12, %v1033_v18  ;;  %v4387_v18 = vld [vmem:[#allocation3 + $0x70] sm:$0xff] }
 0x3d8   : > { %1635 = vst.msk [vmem:[#allocation3 + $0x68] sm:$0xff] %vm1316_vm3, %v4347_v16  ;;  %1175 = vperm.xlu0 %3486, %v4347_v16   ;;  %1140 = vperm.xlu1 %3487, %v4302_v54  }
 0x3d9   : > { %1632 = vst.msk [vmem:[#allocation3 + $0x50] sm:$0xff] %vm1316_vm3, %v4350_v21  ;;  %v1037_v33 = vpop.xlane.xlu1 %1036  ;;  %v5016_v50 = vsub.f32 %v4340_v12, %v4350_v21  ;;  %v5019_v12 = vsub.f32 %v4337_v11, %v4347_v16 }
 0x3da   : > { %v4367_v40 = vmax.f32 %v4352_v22, %v1037_v33  ;;  %v1035_v42 = vpop.xlane.xlu0 %1034 }
 0x3db   : > { %v4370_v49 = vmax.f32 %v4360_v27, %v1035_v42 }
 0x3dc   : > { %1634 = vst.msk [vmem:[#allocation3 + $0x60] sm:$0xff] %vm1316_vm3, %v4367_v40  ;;  %1170 = vperm.xlu0 %3486, %v4367_v40   ;;  %1155 = vperm.xlu1 %3487, %v4321_v3  }
 0x3dd   : > { %1633 = vst.msk [vmem:[#allocation3 + $0x58] sm:$0xff] %vm1316_vm3, %v4370_v49  ;;  %v1043_v8 = vpop.xlane.xlu1 %1042 }
 0x3de   : > { %v4385_v14 = vmax.f32 %v4372_v51, %v1043_v8 }
 0x3e0   : > { %1637 = vst.msk [vmem:[#allocation3 + $0x78] sm:$0xff] %vm1316_vm3, %v4385_v14  ;;  %1150 = vperm.xlu1 %3487, %v4335_v9  }
 0x3e1   : > { %v1041_v42 = vpop.xlane.xlu1 %1040 }
 0x3e2   : > { %v4395_v23 = vmax.f32 %v4387_v18, %v1041_v42 }
 0x3e4   : > { %1636 = vst.msk [vmem:[#allocation3 + $0x70] sm:$0xff] %vm1316_vm3, %v4395_v23  ;;  %1160 = vperm.xlu1 %3487, %v4350_v21   ;;  %1180 = vperm.xlu0 %3486, %v4395_v23   ;;  %v1102_v21 = vmul.f32 1.442695, %v5019_v12 }
 0x3e8   : > { %1165 = vperm.xlu1 %3487, %v4370_v49   ;;  %1185 = vperm.xlu0 %3486, %v4385_v14  }
 0x43f   : > { %v1116_v8 = vpop.permute.xlu1 %1115 }
 0x440   : > { %v1189_v33 = vsub.f32 %v4168_v46, %v1116_v8 }
 0x442   : > { %v1206_v63 = vmul.f32 1.442695, %v1189_v33 }
 0x443   : > { %v1111_v42 = vpop.permute.xlu0 %1110  ;;  %v1126_v32 = vpop.permute.xlu1 %1125 }
 0x444   : > { %3488 = vpow2.f32 %v1206_v63  ;;  %v1188_v62 = vsub.f32 %v4177_v52, %v1111_v42  ;;  %v1191_v7 = vsub.f32 %v4179_v53, %v1126_v32 }
 0x446   : > { %v1204_v13 = vmul.f32 1.442695, %v1188_v62  ;;  %v1210_v5 = vmul.f32 1.442695, %v1191_v7 }
 0x447   : > { %v1121_v60 = vpop.permute.xlu1 %1120 }
 0x448   : > { %3490 = vpow2.f32 %v1204_v13  ;;  %v1190_v56 = vsub.f32 %v4188_v58, %v1121_v60 }
 0x449   : > { %3492 = vpow2.f32 %v1210_v5 }
 0x44a   : > { %v1208_v48 = vmul.f32 1.442695, %v1190_v56 }
 0x44b   : > { %v1136_v38 = vpop.permute.xlu1 %1135 }
 0x44c   : > { %3494 = vpow2.f32 %v1208_v48  ;;  %v1193_v46 = vsub.f32 %v4195_v61, %v1136_v38 }
 0x44e   : > { %v3489_v33 = vpop.eup %3488  ;;  %v1214_v8 = vmul.f32 1.442695, %v1193_v46 }
 0x44f   : > { %1270 = vadd.xlane.f32.xlu0 %v3489_v33  ;;  %v1131_v63 = vpop.permute.xlu1 %1130 }
 0x450   : > { %3496 = vpow2.f32 %v1214_v8  ;;  %v1192_v52 = vsub.f32 %v4191_v59, %v1131_v63 }
 0x452   : > { %v3491_v53 = vpop.eup %3490  ;;  %v1212_v32 = vmul.f32 1.442695, %v1192_v52 }
 0x453   : > { %3084 = vmatprep.mubr.f32.mxu0 %v3491_v53  ;;  %1268 = vadd.xlane.f32.xlu1 %v3491_v53  ;;  %v1146_v7 = vpop.permute.xlu1 %1145  ;;  %v3493_v56 = vpop.eup %3492 }
 0x454   : > { %3498 = vpow2.f32 %v1212_v32  ;;  %v1195_v58 = vsub.f32 %v4205_v2, %v1146_v7  ;;  %3085 = vmatmul.mubr.f32.vlgmr.msra.gmra.mrb[32].mxu0 %v3489_v33 }
 0x456   : > { %v3495_v48 = vpop.eup %3494  ;;  %v1218_v60 = vmul.f32 1.442695, %v1195_v58 }
 0x457   : > { %v1176_v61 = vpop.permute.xlu0 %1175  ;;  %1274 = vadd.xlane.f32.xlu1 %v3493_v56  ;;  %1272 = vadd.xlane.f32.xlu0 %v3495_v48  ;;  %v1141_v38 = vpop.permute.xlu1 %1140 }
 0x458   : > { %3500 = vpow2.f32 %v1218_v60  ;;  %v1201_v5 = vsub.f32 %v4225_v17, %v1176_v61  ;;  %v1194_v59 = vsub.f32 %v4201_v1, %v1141_v38  ;;  %3087 = vmatprep.mubr.f32.mxu0 %v3495_v48 }
 0x459   : > { %3088 = vmatmul.mubr.f32.gmra.mrb[34].mxu0 %v3493_v56 }
 0x45a   : > { %v3497_v13 = vpop.eup %3496  ;;  %v1216_v62 = vmul.f32 1.442695, %v1194_v59  ;;  %v1230_v42 = vmul.f32 1.442695, %v1201_v5 }
 0x45b   : > { %v1171_v46 = vpop.permute.xlu0 %1170  ;;  %1278 = vadd.xlane.f32.xlu1 %v3497_v13  ;;  %v1156_v2 = vpop.permute.xlu1 %1155 }
 0x45c   : > { %v1200_v33 = vsub.f32 %v4230_v19, %v1171_v46  ;;  %v1197_v8 = vsub.f32 %v4207_v4, %v1156_v2  ;;  %3502 = vpow2.f32 %v1216_v62 }
 0x45d   : > { %3504 = vpow2.f32 %v1230_v42 }
 0x45e   : > { %v3499_v63 = vpop.eup %3498  ;;  %v1228_v52 = vmul.f32 1.442695, %v1200_v33  ;;  %v1222_v53 = vmul.f32 1.442695, %v1197_v8  ;;  %v1078_v8 = vmul.f32 1.442695, %v1061_v31  ;;  %v5012_v31 = vsub.f32 %v4292_v47, %v4302_v54 }
 0x45f   : > { %1276 = vadd.xlane.f32.xlu0 %v3499_v63  ;;  %v1151_v17 = vpop.permute.xlu1 %1150  ;;  %3090 = vmatprep.mubr.f32.mxu0 %v3499_v63  ;;  %v1076_v63 = vmul.f32 1.442695, %v1060_v37  ;;  %v1096_v54 = vmul.f32 1.442695, %v5016_v50 }
 0x460   : > { %3506 = vpow2.f32 %v1228_v52  ;;  %v1196_v1 = vsub.f32 %v4214_v10, %v1151_v17  ;;  %3091 = vmatmul.mubr.f32.gmra.mrb[36].mxu0 %v3497_v13  ;;  %v1080_v52 = vmul.f32 1.442695, %v1062_v45  ;;  %v1088_v34 = vmul.f32 1.442695, %v5012_v31 }
 0x461   : > { %3508 = vpow2.f32 %v1222_v53  ;;  %v5009_v53 = vsub.f32 %v4252_v30, %v4263_v35  ;;  %v5013_v30 = vsub.f32 %v4304_v55, %v4318_v0  ;;  %v5017_v55 = vsub.f32 %v4360_v27, %v4370_v49 }
 0x462   : > { %v3501_v32 = vpop.eup %3500  ;;  %v1220_v7 = vmul.f32 1.442695, %v1196_v1  ;;  %v5010_v1 = vsub.f32 %v4277_v39, %v4283_v43  ;;  %v5014_v39 = vsub.f32 %v4328_v6, %v4335_v9  ;;  %v5015_v43 = vsub.f32 %v4311_v57, %v4321_v3 }
 0x463   : > { %v1181_v58 = vpop.permute.xlu0 %1180  ;;  %1282 = vadd.xlane.f32.xlu1 %v3501_v32  ;;  %v1161_v19 = vpop.permute.xlu1 %1160  ;;  %v1082_v17 = vmul.f32 1.442695, %v5009_v53  ;;  %v1090_v35 = vmul.f32 1.442695, %v5013_v30  ;;  %v1098_v0 = vmul.f32 1.442695, %v5017_v55  ;;  %v5018_v57 = vsub.f32 %v4352_v22, %v4367_v40 }
 0x464   : > { %3510 = vpow2.f32 %v1220_v7  ;;  %v1202_v4 = vsub.f32 %v4242_v25, %v1181_v58  ;;  %v1198_v56 = vsub.f32 %v4221_v15, %v1161_v19  ;;  %v1084_v26 = vmul.f32 1.442695, %v5010_v1  ;;  %v1244_v55 = vld [vmem:[#allocation4 + $0x40] sm:$0xff] }
 0x465   : > { %v1092_v41 = vmul.f32 1.442695, %v5014_v39  ;;  %v1094_v44 = vmul.f32 1.442695, %v5015_v43  ;;  %v1100_v3 = vmul.f32 1.442695, %v5018_v57  ;;  %v5020_v49 = vsub.f32 %v4387_v18, %v4395_v23 }
 0x466   : > { %v1232_v48 = vmul.f32 1.442695, %v1202_v4  ;;  %v1224_v60 = vmul.f32 1.442695, %v1198_v56  ;;  %v3503_v61 = vpop.eup %3502  ;;  %v5021_v22 = vsub.f32 %v4372_v51, %v4385_v14  ;;  %v1237_v4 = vld [vmem:[#allocation4 + $0x8] sm:$0xff] }
 0x467   : > { %v1186_v38 = vpop.permute.xlu0 %1185  ;;  %v1166_v5 = vpop.permute.xlu1 %1165  ;;  %1280 = vadd.xlane.f32.xlu0 %v3503_v61  ;;  %3093 = vmatprep.mubr.f32.mxu0 %v3503_v61  ;;  %v1104_v7 = vmul.f32 1.442695, %v5020_v49  ;;  %v1246_v49 = vld [vmem:[#allocation4 + $0x50] sm:$0xff] }
 0x468   : > { %3512 = vpow2.f32 %v1232_v48  ;;  %v1203_v10 = vsub.f32 %v4238_v24, %v1186_v38  ;;  %v1199_v59 = vsub.f32 %v4232_v20, %v1166_v5  ;;  %v3505_v13 = vpop.eup %3504  ;;  %3094 = vmatmul.mubr.f32.gmra.mrb[38].mxu0 %v3501_v32  ;;  %v1106_v40 = vmul.f32 1.442695, %v5021_v22 }
 0x469   : > { %3514 = vpow2.f32 %v1224_v60  ;;  %v1236_v60 = vld [vmem:[#allocation4] sm:$0xff] }
 0x46a   : > { %v3507_v62 = vpop.eup %3506  ;;  %v1234_v42 = vmul.f32 1.442695, %v1203_v10  ;;  %v1226_v25 = vmul.f32 1.442695, %v1199_v59  ;;  %v1238_v10 = vld [vmem:[#allocation4 + $0x10] sm:$0xff]  ;;  %v1239_v59 = vld [vmem:[#allocation4 + $0x18] sm:$0xff] }
 0x46b   : > { %v3509_v46 = vpop.eup %3508  ;;  %3102 = vmatprep.mubr.f32.mxu1 %v3507_v62 }
 0x46c   : > { %3516 = vpow2.f32 %v1234_v42  ;;  %1286 = vadd.xlane.f32.xlu1 %v3509_v46  ;;  %3103 = vmatmul.mubr.f32.vlgmr.msra.gmra.mrb[16].mxu1 %v3505_v13 }
 0x46d   : > { %3518 = vpow2.f32 %v1226_v25 }
 0x46e   : > { %v3511_v15 = vpop.eup %3510  ;;  %3520 = vpow2.f32 %v1078_v8 }
 0x46f   : > { %1284 = vadd.xlane.f32.xlu0 %v3511_v15  ;;  %3096 = vmatprep.mubr.f32.mxu0 %v3511_v15  ;;  %3522 = vpow2.f32 %v1076_v63  ;;  %v1241_v15 = vld [vmem:[#allocation4 + $0x28] sm:$0xff]  ;;  %v1240_v63 = vld [vmem:[#allocation4 + $0x20] sm:$0xff] }
 0x470   : > { %3097 = vmatmul.mubr.f32.gmra.mrb[40].mxu0 %v3509_v46  ;;  %3524 = vpow2.f32 %v1080_v52 }
 0x471   : > { %3526 = vpow2.f32 %v1082_v17 }
 0x472   : > { %v3513_v24 = vpop.eup %3512  ;;  %3528 = vpow2.f32 %v1084_v26  ;;  %v1243_v26 = vld [vmem:[#allocation4 + $0x38] sm:$0xff] }
 0x473   : > { %v3515_v2 = vpop.eup %3514  ;;  %3105 = vmatprep.mubr.f32.mxu1 %v3513_v24  ;;  %3530 = vpow2.f32 %v1086_v29 }
 0x474   : > { %1288 = vadd.xlane.f32.xlu0 %v3515_v2  ;;  %3099 = vmatprep.mubr.f32.mxu0 %v3515_v2  ;;  %3532 = vpow2.f32 %v1088_v34 }
 0x475   : > { %3534 = vpow2.f32 %v1090_v35 }
 0x476   : > { %v3517_v20 = vpop.eup %3516  ;;  %3536 = vpow2.f32 %v1092_v41 }
 0x477   : > { %v3519_v33 = vpop.eup %3518  ;;  %3106 = vmatmul.mubr.f32.gmra.mrb[18].mxu1 %v3517_v20  ;;  %3538 = vpow2.f32 %v1094_v44 }
 0x478   : > { %1292 = vadd.xlane.f32.xlu0 %v3507_v62  ;;  %1290 = vadd.xlane.f32.xlu1 %v3519_v33  ;;  %v3521_v36 = vpop.eup %3520  ;;  %3540 = vpow2.f32 %v1096_v54 }
 0x479   : > { %3100 = vmatmul.mubr.f32.gmra.mrb[42].mxu0 %v3519_v33  ;;  %v3523_v37 = vpop.eup %3522  ;;  %3542 = vpow2.f32 %v1098_v0  ;;  %v1253_v56 = vmul.f32 %v3521_v36, %v1237_v4  ;;  %v1248_v4 = vld [vmem:[#allocation4 + $0x60] sm:$0xff] }
 0x47a   : > { %v3525_v45 = vpop.eup %3524  ;;  %3544 = vpow2.f32 %v1100_v3  ;;  %v1252_v38 = vmul.f32 %v3523_v37, %v1236_v60 }
 0x47b   : > { %v3527_v47 = vpop.eup %3526  ;;  %3546 = vpow2.f32 %v1102_v21  ;;  %v1254_v62 = vmul.f32 %v3525_v45, %v1238_v10 }
 0x47c   : > { %1296 = vadd.xlane.f32.xlu0 %v3513_v24  ;;  %1294 = vadd.xlane.f32.xlu1 %v3505_v13  ;;  %v4457_v6 = vpop.eup %3528  ;;  %3548 = vpow2.f32 %v1104_v7  ;;  %v1255_v42 = vmul.f32 %v3527_v47, %v1239_v59  ;;  %v1250_v59 = vld [vmem:[#allocation4 + $0x70] sm:$0xff] }
 0x47d   : > { %v3531_v9 = vpop.eup %3530  ;;  %3550 = vpow2.f32 %v1106_v40  ;;  %v1256_v17 = vmul.f32 %v4457_v6, %v1240_v63 }
 0x47e   : > { %v4466_v32 = vpop.eup %3532  ;;  %v1257_v33 = vmul.f32 %v3531_v9, %v1241_v15  ;;  %v1251_v15 = vld [vmem:[#allocation4 + $0x78] sm:$0xff] }
 0x47f   : > { %v3535_v27 = vpop.eup %3534 }
 0x480   : > { %1298 = vadd.xlane.f32.xlu1 %v3517_v20  ;;  %v4475_v58 = vpop.eup %3536  ;;  %v1259_v34 = vmul.f32 %v3535_v27, %v1243_v26 }
 0x481   : > { %v4477_v11 = vpop.eup %3538  ;;  %v1260_v12 = vmul.f32 %v4475_v58, %v1244_v55 }
 0x482   : > { %v4481_v16 = vpop.eup %3540 }
 0x483   : > { %v4483_v23 = vpop.eup %3542  ;;  %v1262_v22 = vmul.f32 %v4481_v16, %v1246_v49 }
 0x484   : > { %v4487_v51 = vpop.eup %3544 }
 0x485   : > { %v4489_v14 = vpop.eup %3546  ;;  %v1264_v60 = vmul.f32 %v4487_v51, %v1248_v4 }
 0x486   : > { %v4493_v18 = vpop.eup %3548 }
 0x487   : > { %v4495_v19 = vpop.eup %3550 }
 0x491   : > { %1356 = vperm.xlu1 %3487, %v3521_v36  }
 0x492   : > { %1351 = vperm.xlu0 %3486, %v3523_v37   ;;  %v1242_v37 = vld [vmem:[#allocation4 + $0x30] sm:$0xff] }
 0x493   : > { %v1258_v41 = vmul.f32 %v4466_v32, %v1242_v37 }
 0x495   : > { %1361 = vperm.xlu1 %3487, %v3525_v45   ;;  %v1245_v45 = vld [vmem:[#allocation4 + $0x48] sm:$0xff] }
 0x496   : > { %1366 = vperm.xlu0 %3486, %v3527_v47   ;;  %v1261_v54 = vmul.f32 %v4477_v11, %v1245_v45  ;;  %v1333_v45 = vld [vmem:[#allocation5] sm:$0xff] }
 0x499   : > { %1371 = vperm.xlu1 %3487, %v4457_v6  }
 0x49a   : > { %1376 = vperm.xlu0 %3486, %v3531_v9  }
 0x49d   : > { %1381 = vperm.xlu1 %3487, %v4466_v32  }
 0x49e   : > { %1386 = vperm.xlu0 %3486, %v3535_v27  }
 0x4a1   : > { %1391 = vperm.xlu1 %3487, %v4475_v58  }
 0x4a2   : > { %1396 = vperm.xlu0 %3486, %v4477_v11  }
 0x4a5   : > { %1401 = vperm.xlu1 %3487, %v4481_v16   ;;  %v1249_v16 = vld [vmem:[#allocation4 + $0x68] sm:$0xff] }
 0x4a6   : > { %1406 = vperm.xlu0 %3486, %v4483_v23  }
 0x4a9   : > { %1411 = vperm.xlu1 %3487, %v4487_v51   ;;  %v1265_v51 = vmul.f32 %v4489_v14, %v1249_v16 }
 0x4aa   : > { %1416 = vperm.xlu0 %3486, %v4489_v14  }
 0x4ad   : > { %1421 = vperm.xlu1 %3487, %v4493_v18  }
 0x4ae   : > { %1426 = vperm.xlu0 %3486, %v4495_v19  }
 0x4dc   : > { %v1271_v48 = vpop.xlane.xlu0 %1270 }
 0x4dd   : > { %v1301_v61 = vadd.f32 %v1271_v48, %v1253_v56  ;;  %v1247_v56 = vld [vmem:[#allocation4 + $0x58] sm:$0xff] }
 0x4df   : > { %1318 = vst.msk [vmem:[#allocation4 + $0x8] sm:$0xff] %vm1316_vm3, %v1301_v61  ;;  %v1263_v61 = vmul.f32 %v4483_v23, %v1247_v56  ;;  %v1337_v56 = vld [vmem:[#allocation5 + $0x20] sm:$0xff] }
 0x4e0   : > { %v1269_v5 = vpop.xlane.xlu1 %1268 }
 0x4e1   : > { %v1300_v13 = vadd.f32 %v1269_v5, %v1252_v38 }
 0x4e3   : > { %1317 = vst.msk [vmem:[#allocation4] sm:$0xff] %vm1316_vm3, %v1300_v13 }
 0x4e4   : > { %v1273_v25 = vpop.xlane.xlu0 %1272  ;;  %v1275_v46 = vpop.xlane.xlu1 %1274 }
 0x4e5   : > { %v1302_v24 = vadd.f32 %v1273_v25, %v1254_v62  ;;  %v1303_v2 = vadd.f32 %v1275_v46, %v1255_v42  ;;  %v1266_v25 = vmul.f32 %v4493_v18, %v1250_v59 }
 0x4e6   : > { %v1639_v20 = vld [vmem:[#allocation4 + $0x8] sm:$0xff] }
 0x4e7   : > { %1319 = vst.msk [vmem:[#allocation4 + $0x10] sm:$0xff] %vm1316_vm3, %v1302_v24  ;;  %1320 = vst.msk [vmem:[#allocation4 + $0x18] sm:$0xff] %vm1316_vm3, %v1303_v2  ;;  %3552 = vrcp.f32 %v1639_v20 }
 0x4e8   : > { %v1279_v8 = vpop.xlane.xlu1 %1278 }
 0x4e9   : > { %v1305_v52 = vadd.f32 %v1279_v8, %v1257_v33  ;;  %v1267_v8 = vmul.f32 %v4495_v19, %v1251_v15 }
 0x4ea   : > { %v1638_v53 = vld [vmem:[#allocation4] sm:$0xff] }
 0x4eb   : > { %1322 = vst.msk [vmem:[#allocation4 + $0x28] sm:$0xff] %vm1316_vm3, %v1305_v52  ;;  %3554 = vrcp.f32 %v1638_v53 }
 0x4ec   : > { %v1277_v1 = vpop.xlane.xlu0 %1276 }
 0x4ed   : > { %v1304_v28 = vadd.f32 %v1277_v1, %v1256_v17 }
 0x4ee   : > { %v1640_v29 = vld [vmem:[#allocation4 + $0x10] sm:$0xff]  ;;  %v1641_v31 = vld [vmem:[#allocation4 + $0x18] sm:$0xff] }
 0x4ef   : > { %1321 = vst.msk [vmem:[#allocation4 + $0x20] sm:$0xff] %vm1316_vm3, %v1304_v28  ;;  %3556 = vrcp.f32 %v1640_v29 }
 0x4f0   : > { %v1283_v30 = vpop.xlane.xlu1 %1282  ;;  %3558 = vrcp.f32 %v1641_v31 }
 0x4f1   : > { %v3553_v35 = vpop.eup %3552  ;;  %v1307_v36 = vadd.f32 %v1283_v30, %v1259_v34 }
 0x4f2   : > { %1693 = vperm.xlu0 %3486, %v3553_v35   ;;  %v1643_v39 = vld [vmem:[#allocation4 + $0x28] sm:$0xff] }
 0x4f3   : > { %1324 = vst.msk [vmem:[#allocation4 + $0x38] sm:$0xff] %vm1316_vm3, %v1307_v36  ;;  %3560 = vrcp.f32 %v1643_v39 }
 0x4f4   : > { %v1281_v44 = vpop.xlane.xlu0 %1280 }
 0x4f5   : > { %v3555_v43 = vpop.eup %3554  ;;  %v1306_v47 = vadd.f32 %v1281_v44, %v1258_v41 }
 0x4f6   : > { %1688 = vperm.xlu1 %3487, %v3555_v43   ;;  %v1642_v50 = vld [vmem:[#allocation4 + $0x20] sm:$0xff]  ;;  %v1334_v43 = vld [vmem:[#allocation5 + $0x8] sm:$0xff] }
 0x4f7   : > { %3562 = vrcp.f32 %v1642_v50  ;;  %1323 = vst.msk [vmem:[#allocation4 + $0x30] sm:$0xff] %vm1316_vm3, %v1306_v47 }
 0x4f9   : > { %v3557_v0 = vpop.eup %3556  ;;  %v1287_v6 = vpop.xlane.xlu1 %1286 }
 0x4fa   : > { %v3559_v9 = vpop.eup %3558  ;;  %v1309_v57 = vadd.f32 %v1287_v6, %v1261_v54  ;;  %1698 = vperm.xlu1 %3487, %v3557_v0   ;;  %v1645_v3 = vld [vmem:[#allocation4 + $0x38] sm:$0xff] }
 0x4fb   : > { %1703 = vperm.xlu0 %3486, %v3559_v9   ;;  %3564 = vrcp.f32 %v1645_v3  ;;  %v1336_v0 = vld [vmem:[#allocation5 + $0x18] sm:$0xff] }
 0x4fc   : > { %1326 = vst.msk [vmem:[#allocation4 + $0x48] sm:$0xff] %vm1316_vm3, %v1309_v57  ;;  %v1285_v21 = vpop.xlane.xlu0 %1284 }
 0x4fd   : > { %v3561_v32 = vpop.eup %3560  ;;  %v1308_v27 = vadd.f32 %v1285_v21, %v1260_v12  ;;  %v1335_v12 = vld [vmem:[#allocation5 + $0x10] sm:$0xff] }
 0x4fe   : > { %v1644_v7 = vld [vmem:[#allocation4 + $0x30] sm:$0xff] }
 0x4ff   : > { %1325 = vst.msk [vmem:[#allocation4 + $0x40] sm:$0xff] %vm1316_vm3, %v1308_v27  ;;  %1713 = vperm.xlu0 %3486, %v3561_v32   ;;  %3566 = vrcp.f32 %v1644_v7 }
 0x501   : > { %v3563_v40 = vpop.eup %3562  ;;  %v1289_v11 = vpop.xlane.xlu0 %1288 }
 0x502   : > { %v1310_v48 = vadd.f32 %v1289_v11, %v1262_v22  ;;  %1708 = vperm.xlu1 %3487, %v3563_v40   ;;  %v1338_v40 = vld [vmem:[#allocation5 + $0x28] sm:$0xff] }
 0x503   : > { %v1647_v58 = vld [vmem:[#allocation4 + $0x48] sm:$0xff] }
 0x504   : > { %1327 = vst.msk [vmem:[#allocation4 + $0x50] sm:$0xff] %vm1316_vm3, %v1310_v48  ;;  %3568 = vrcp.f32 %v1647_v58 }
 0x505   : > { %v3565_v38 = vpop.eup %3564  ;;  %v1293_v5 = vpop.xlane.xlu0 %1292 }
 0x506   : > { %v1291_v10 = vpop.xlane.xlu1 %1290  ;;  %v1312_v13 = vadd.f32 %v1293_v5, %v1264_v60  ;;  %1723 = vperm.xlu0 %3486, %v3565_v38   ;;  %v1646_v42 = vld [vmem:[#allocation4 + $0x40] sm:$0xff] }
 0x507   : > { %v1311_v62 = vadd.f32 %v1291_v10, %v1263_v61  ;;  %3570 = vrcp.f32 %v1646_v42 }
 0x508   : > { %1329 = vst.msk [vmem:[#allocation4 + $0x60] sm:$0xff] %vm1316_vm3, %v1312_v13  ;;  %v1340_v13 = vld [vmem:[#allocation5 + $0x38] sm:$0xff] }
 0x509   : > { %1328 = vst.msk [vmem:[#allocation4 + $0x58] sm:$0xff] %vm1316_vm3, %v1311_v62  ;;  %v1297_v23 = vpop.xlane.xlu0 %1296  ;;  %v3567_v24 = vpop.eup %3566  ;;  %v1339_v62 = vld [vmem:[#allocation5 + $0x30] sm:$0xff] }
 0x50a   : > { %v1295_v46 = vpop.xlane.xlu1 %1294  ;;  %v1314_v2 = vadd.f32 %v1297_v23, %v1266_v25  ;;  %1718 = vperm.xlu1 %3487, %v3567_v24   ;;  %v1346_v25 = vld [vmem:[#allocation5 + $0x68] sm:$0xff] }
 0x50b   : > { %v1313_v20 = vadd.f32 %v1295_v46, %v1265_v51  ;;  %v1648_v33 = vld [vmem:[#allocation4 + $0x50] sm:$0xff]  ;;  %v1345_v46 = vld [vmem:[#allocation5 + $0x60] sm:$0xff] }
 0x50c   : > { %1331 = vst.msk [vmem:[#allocation4 + $0x70] sm:$0xff] %vm1316_vm3, %v1314_v2  ;;  %3572 = vrcp.f32 %v1648_v33 }
 0x50d   : > { %1330 = vst.msk [vmem:[#allocation4 + $0x68] sm:$0xff] %vm1316_vm3, %v1313_v20 }
 0x50e   : > { %v1299_v63 = vpop.xlane.xlu1 %1298  ;;  %v3569_v52 = vpop.eup %3568 }
 0x50f   : > { %v1315_v18 = vadd.f32 %v1299_v63, %v1267_v8  ;;  %1733 = vperm.xlu0 %3486, %v3569_v52   ;;  %v1650_v14 = vld [vmem:[#allocation4 + $0x60] sm:$0xff]  ;;  %v1342_v63 = vld [vmem:[#allocation5 + $0x48] sm:$0xff] }
 0x510   : > { %v1649_v53 = vld [vmem:[#allocation4 + $0x58] sm:$0xff]  ;;  %3574 = vrcp.f32 %v1650_v14  ;;  %v1341_v14 = vld [vmem:[#allocation5 + $0x40] sm:$0xff] }
 0x511   : > { %1332 = vst.msk [vmem:[#allocation4 + $0x78] sm:$0xff] %vm1316_vm3, %v1315_v18  ;;  %v3571_v17 = vpop.eup %3570  ;;  %3576 = vrcp.f32 %v1649_v53  ;;  %v1352_v29 = vpop.permute.xlu0 %1351 }
 0x512   : > { %1728 = vperm.xlu1 %3487, %v3571_v17   ;;  %v1357_v31 = vpop.permute.xlu1 %1356  ;;  %v1429_v54 = vmul.f32 %v1352_v29, %v1333_v45 }
 0x513   : > { %v1652_v1 = vld [vmem:[#allocation4 + $0x70] sm:$0xff]  ;;  %v1430_v50 = vmul.f32 %v1357_v31, %v1334_v43 }
 0x514   : > { %v1651_v26 = vld [vmem:[#allocation4 + $0x68] sm:$0xff]  ;;  %3578 = vrcp.f32 %v1652_v1 }
 0x515   : > { %3580 = vrcp.f32 %v1651_v26  ;;  %v1367_v35 = vpop.permute.xlu0 %1366 }
 0x516   : > { %v3573_v28 = vpop.eup %3572  ;;  %v1362_v37 = vpop.permute.xlu1 %1361  ;;  %v1432_v32 = vmul.f32 %v1367_v35, %v1336_v0 }
 0x517   : > { %1738 = vperm.xlu1 %3487, %v3573_v28   ;;  %v1431_v49 = vmul.f32 %v1362_v37, %v1335_v12 }
 0x518   : > { %v1653_v19 = vld [vmem:[#allocation4 + $0x78] sm:$0xff] }
 0x519   : > { %3582 = vrcp.f32 %v1653_v19  ;;  %v1377_v44 = vpop.permute.xlu0 %1376 }
 0x51a   : > { %v3575_v34 = vpop.eup %3574  ;;  %v1372_v47 = vpop.permute.xlu1 %1371  ;;  %v1434_v58 = vmul.f32 %v1377_v44, %v1338_v40 }
 0x51b   : > { %v3577_v30 = vpop.eup %3576  ;;  %1748 = vperm.xlu1 %3487, %v3575_v34   ;;  %v1433_v60 = vmul.f32 %v1372_v47, %v1337_v56 }
 0x51c   : > { %1743 = vperm.xlu0 %3486, %v3577_v30   ;;  %v1348_v30 = vld [vmem:[#allocation5 + $0x78] sm:$0xff] }
 0x51d   : > { %v1387_v57 = vpop.permute.xlu0 %1386 }
 0x51e   : > { %v3579_v36 = vpop.eup %3578  ;;  %v1382_v21 = vpop.permute.xlu1 %1381  ;;  %v1436_v42 = vmul.f32 %v1387_v57, %v1340_v13 }
 0x51f   : > { %v3581_v39 = vpop.eup %3580  ;;  %1758 = vperm.xlu1 %3487, %v3579_v36   ;;  %v1435_v23 = vmul.f32 %v1382_v21, %v1339_v62  ;;  %v1347_v36 = vld [vmem:[#allocation5 + $0x70] sm:$0xff] }
 0x520   : > { %1753 = vperm.xlu0 %3486, %v3581_v39   ;;  %v1344_v39 = vld [vmem:[#allocation5 + $0x58] sm:$0xff] }
 0x521   : > { %v1397_v11 = vpop.permute.xlu0 %1396 }
 0x522   : > { %v1392_v48 = vpop.permute.xlu1 %1391  ;;  %v1438_v26 = vmul.f32 %v1397_v11, %v1342_v63 }
 0x523   : > { %v3583_v41 = vpop.eup %3582  ;;  %v1437_v28 = vmul.f32 %v1392_v48, %v1341_v14 }
 0x524   : > { %1763 = vperm.xlu0 %3486, %v3583_v41   ;;  %v1343_v41 = vld [vmem:[#allocation5 + $0x50] sm:$0xff] }
 0x525   : > { %v1407_v10 = vpop.permute.xlu0 %1406 }
 0x526   : > { %v1402_v16 = vpop.permute.xlu1 %1401  ;;  %v1440_v47 = vmul.f32 %v1407_v10, %v1344_v39 }
 0x527   : > { %v3086_v55 = vpop.f32.mrb[32].mxu0 }
 0x528   : > { %v4525_v6 = vadd.f32 %v3086_v55, %v1430_v50  ;;  %v1511_v9 = vpop.f32.mrb[33].mxu0  ;;  %v1439_v55 = vmul.f32 %v1402_v16, %v1343_v41 }
 0x529   : > { %v4527_v3 = vadd.f32 %v1511_v9, %v1429_v54  ;;  %v1417_v51 = vpop.permute.xlu0 %1416 }
 0x52a   : > { %1607 = vst [vmem:[#allocation5 + $0x8] sm:$0xff] %v4525_v6  ;;  %v1412_v15 = vpop.permute.xlu1 %1411  ;;  %v1442_v33 = vmul.f32 %v1417_v51, %v1346_v25 }
 0x52b   : > { %1606 = vst [vmem:[#allocation5] sm:$0xff] %v4527_v3  ;;  %v1441_v52 = vmul.f32 %v1412_v15, %v1345_v46 }
 0x52c   : > { %v3089_v27 = vpop.f32.mrb[34].mxu0 }
 0x52d   : > { %v4531_v7 = vadd.f32 %v3089_v27, %v1432_v32  ;;  %v1521_v22 = vpop.f32.mrb[35].mxu0  ;;  %v1427_v35 = vpop.permute.xlu0 %1426 }
 0x52e   : > { %v4534_v4 = vadd.f32 %v1521_v22, %v1431_v49  ;;  %v1422_v37 = vpop.permute.xlu1 %1421  ;;  %v1444_v43 = vmul.f32 %v1427_v35, %v1348_v30 }
 0x52f   : > { %1609 = vst [vmem:[#allocation5 + $0x18] sm:$0xff] %v4531_v7  ;;  %v1443_v44 = vmul.f32 %v1422_v37, %v1347_v36 }
 0x530   : > { %1608 = vst [vmem:[#allocation5 + $0x10] sm:$0xff] %v4534_v4 }
 0x533   : > { %v3092_v61 = vpop.f32.mrb[36].mxu0 }
 0x534   : > { %v4537_v38 = vadd.f32 %v3092_v61, %v1434_v58  ;;  %v1531_v5 = vpop.f32.mrb[37].mxu0 }
 0x535   : > { %v4539_v59 = vadd.f32 %v1531_v5, %v1433_v60 }
 0x536   : > { %1611 = vst [vmem:[#allocation5 + $0x28] sm:$0xff] %v4537_v38 }
 0x537   : > { %1610 = vst [vmem:[#allocation5 + $0x20] sm:$0xff] %v4539_v59 }
 0x53b   : > { %v3095_v24 = vpop.f32.mrb[38].mxu0 }
 0x53c   : > { %v4543_v2 = vadd.f32 %v3095_v24, %v1436_v42  ;;  %v1541_v20 = vpop.f32.mrb[39].mxu0 }
 0x53d   : > { %v4545_v8 = vadd.f32 %v1541_v20, %v1435_v23 }
 0x53e   : > { %1613 = vst [vmem:[#allocation5 + $0x38] sm:$0xff] %v4543_v2 }
 0x53f   : > { %v3104_v18 = vpop.f32.mrb[16].mxu1  ;;  %1612 = vst [vmem:[#allocation5 + $0x30] sm:$0xff] %v4545_v8 }
 0x540   : > { %v4549_v53 = vadd.f32 %v3104_v18, %v1442_v33  ;;  %v1571_v17 = vpop.f32.mrb[17].mxu1 }
 0x541   : > { %v4551_v1 = vadd.f32 %v1571_v17, %v1441_v52 }
 0x542   : > { %1619 = vst [vmem:[#allocation5 + $0x68] sm:$0xff] %v4549_v53 }
 0x543   : > { %1618 = vst [vmem:[#allocation5 + $0x60] sm:$0xff] %v4551_v1  ;;  %v3098_v29 = vpop.f32.mrb[40].mxu0 }
 0x544   : > { %v1599_v19 = vadd.f32 %v3098_v29, %v1438_v26  ;;  %v1551_v31 = vpop.f32.mrb[41].mxu0 }
 0x545   : > { %v1598_v34 = vadd.f32 %v1551_v31, %v1437_v28 }
 0x546   : > { %1615 = vst [vmem:[#allocation5 + $0x48] sm:$0xff] %v1599_v19 }
 0x547   : > { %1614 = vst [vmem:[#allocation5 + $0x40] sm:$0xff] %v1598_v34 }
 0x54a   : > { %v3107_v45 = vpop.f32.mrb[18].mxu1 }
 0x54b   : > { %v1605_v50 = vadd.f32 %v3107_v45, %v1444_v43  ;;  %v1581_v54 = vpop.f32.mrb[19].mxu1 }
 0x54c   : > { %v3101_v0 = vpop.f32.mrb[42].mxu0  ;;  %v1604_v9 = vadd.f32 %v1581_v54, %v1443_v44 }
 0x54d   : > { %v1601_v57 = vadd.f32 %v3101_v0, %v1440_v47  ;;  %1621 = vst [vmem:[#allocation5 + $0x78] sm:$0xff] %v1605_v50  ;;  %v1561_v12 = vpop.f32.mrb[43].mxu0 }
 0x54e   : > { %v1600_v21 = vadd.f32 %v1561_v12, %v1439_v55  ;;  %1620 = vst [vmem:[#allocation5 + $0x70] sm:$0xff] %v1604_v9 }
 0x54f   : > { %1617 = vst [vmem:[#allocation5 + $0x58] sm:$0xff] %v1601_v57 }
 0x550   : > { %1616 = vst [vmem:[#allocation5 + $0x50] sm:$0xff] %v1600_v21 }
 0x571   : > { %v1694_v32 = vpop.permute.xlu0 %1693 }
 0x572   : > { %v1767_v27 = vmul.f32 %v1694_v32, %v4525_v6 }
 0x574   : > { %1783 = vst [vmem:[%s3901_s15 + $0x8] sm:$0xff] %v1767_v27 }
 0x575   : > { %v1689_v49 = vpop.permute.xlu1 %1688 }
 0x576   : > { %v1766_v22 = vmul.f32 %v1689_v49, %v4527_v3 }
 0x578   : > { %1782 = vst [vmem:[%s3901_s15] sm:$0xff] %v1766_v22 }
 0x579   : > { %v1699_v40 = vpop.permute.xlu1 %1698 }
 0x57a   : > { %v1704_v11 = vpop.permute.xlu0 %1703  ;;  %v1768_v56 = vmul.f32 %v1699_v40, %v4534_v4 }
 0x57b   : > { %v1769_v48 = vmul.f32 %v1704_v11, %v4531_v7 }
 0x57c   : > { %1784 = vst [vmem:[%s3901_s15 + $0x10] sm:$0xff] %v1768_v56 }
 0x57d   : > { %1785 = vst [vmem:[%s3901_s15 + $0x18] sm:$0xff] %v1769_v48 }
 0x57e   : > { %v1714_v58 = vpop.permute.xlu0 %1713 }
 0x57f   : > { %v1771_v6 = vmul.f32 %v1714_v58, %v4537_v38 }
 0x581   : > { %1787 = vst [vmem:[%s3901_s15 + $0x28] sm:$0xff] %v1771_v6  ;;  %v1709_v60 = vpop.permute.xlu1 %1708 }
 0x582   : > { %v1770_v3 = vmul.f32 %v1709_v60, %v4539_v59 }
 0x584   : > { %1786 = vst [vmem:[%s3901_s15 + $0x20] sm:$0xff] %v1770_v3 }
 0x585   : > { %v1724_v61 = vpop.permute.xlu0 %1723 }
 0x586   : > { %v1773_v5 = vmul.f32 %v1724_v61, %v4543_v2 }
 0x588   : > { %1789 = vst [vmem:[%s3901_s15 + $0x38] sm:$0xff] %v1773_v5 }
 0x589   : > { %v1719_v4 = vpop.permute.xlu1 %1718 }
 0x58a   : > { %v1772_v7 = vmul.f32 %v1719_v4, %v4545_v8 }
 0x58c   : > { %1788 = vst [vmem:[%s3901_s15 + $0x30] sm:$0xff] %v1772_v7 }
 0x58e   : > { %v1734_v10 = vpop.permute.xlu0 %1733 }
 0x58f   : > { %v1775_v16 = vmul.f32 %v1734_v10, %v1599_v19 }
 0x591   : > { %1791 = vst [vmem:[%s3901_s15 + $0x48] sm:$0xff] %v1775_v16  ;;  %v1729_v38 = vpop.permute.xlu1 %1728 }
 0x592   : > { %v1774_v13 = vmul.f32 %v1729_v38, %v1598_v34 }
 0x594   : > { %1790 = vst [vmem:[%s3901_s15 + $0x40] sm:$0xff] %v1774_v13 }
 0x596   : > { %v1739_v59 = vpop.permute.xlu1 %1738 }
 0x597   : > { %v1776_v62 = vmul.f32 %v1739_v59, %v1600_v21 }
 0x599   : > { %1792 = vst [vmem:[%s3901_s15 + $0x50] sm:$0xff] %v1776_v62 }
 0x59a   : > { %v1749_v42 = vpop.permute.xlu1 %1748 }
 0x59b   : > { %v1744_v25 = vpop.permute.xlu0 %1743  ;;  %v1778_v51 = vmul.f32 %v1749_v42, %v4551_v1 }
 0x59c   : > { %v1777_v23 = vmul.f32 %v1744_v25, %v1601_v57 }
 0x59d   : > { %1794 = vst [vmem:[%s3901_s15 + $0x60] sm:$0xff] %v1778_v51 }
 0x59e   : > { %1793 = vst [vmem:[%s3901_s15 + $0x58] sm:$0xff] %v1777_v23  ;;  %v1759_v46 = vpop.permute.xlu1 %1758 }
 0x59f   : > { %v1754_v15 = vpop.permute.xlu0 %1753  ;;  %v1780_v24 = vmul.f32 %v1759_v46, %v1604_v9 }
 0x5a0   : > { %v1779_v2 = vmul.f32 %v1754_v15, %v4549_v53 }
 0x5a1   : > { %1796 = vst [vmem:[%s3901_s15 + $0x70] sm:$0xff] %v1780_v24 }
 0x5a2   : > { %1795 = vst [vmem:[%s3901_s15 + $0x68] sm:$0xff] %v1779_v2 }
 0x5a3   : > { %v1764_v20 = vpop.permute.xlu0 %1763 }
 0x5a4   : > { %v1781_v33 = vmul.f32 %v1764_v20, %v1605_v50 }
 0x5a6   : > { %1797 = vst [vmem:[%s3901_s15 + $0x78] sm:$0xff] %v1781_v33 }
 0x5a7 PF: > { %p2792_p12 = scmp.eq.s32.totalorder %s3894_s23, %s3890_s21 }
 0x5a8   : > { %s2793_s14 = sshll.u32 (!%p2792_p12), %s3894_s23, 7  ;;  %v1840_v8 = vld [vmem:[#allocation2] sm:$0xff] (!%p2792_p12)  ;;  %v1841_v54 = vld [vmem:[#allocation2 + $0x8] sm:$0xff] (!%p2792_p12)  ;;  %v1842_v55 = vld [vmem:[#allocation2 + $0x10] sm:$0xff] (!%p2792_p12)  ;;  %v3778_v38 = vmov (!%p2792_p12), 0   ;;  %vm2321_vm4 = vcmask (!%p2792_p12), 7168  }
 0x5a9   : > { %1801 = sbr.rel (%p2792_p12) target bundleno = 2280 (0x8e8), region = 40  ;;  %s1803_s6 = sshra.s32 (!%p2792_p12), %s2793_s14, 3  ;;  %3140 = vmatprep.mubr.f32.mxu0 (!%p2792_p12), %v1840_v8  ;;  %v1843_v0 = vld [vmem:[#allocation2 + $0x18] sm:$0xff] (!%p2792_p12)  ;;  %v1844_v9 = vld [vmem:[#allocation2 + $0x20] sm:$0xff] (!%p2792_p12)  ;;  %v1845_v57 = vld [vmem:[#allocation2 + $0x28] sm:$0xff] (!%p2792_p12)  ;;  %3584 = vset.pattern.permute.xlu0 (!%p2792_p12), %v3778_v38 }
 0x5aa   : > { %s2803_s9 = sshll.u32 (!%p2792_p12), %s1803_s6, 4  ;;  %v1846_v12 = vld [vmem:[#allocation2 + $0x30] sm:$0xff] (!%p2792_p12)  ;;  %v1847_v21 = vld [vmem:[#allocation2 + $0x38] sm:$0xff] (!%p2792_p12)  ;;  %v1848_v32 = vld [vmem:[#allocation2 + $0x40] sm:$0xff] (!%p2792_p12)  ;;  %3585 = vset.pattern.permute.xlu1 (!%p2792_p12), %v3778_v38 }
 0x5ab   : > { %s4584_s10 = scalar_lea.vmem (!%p2792_p12), [#allocation6], %s2803_s9  ;;  %v1849_v27 = vld [vmem:[#allocation2 + $0x48] sm:$0xff] (!%p2792_p12)  ;;  %v1850_v49 = vld [vmem:[#allocation2 + $0x50] sm:$0xff] (!%p2792_p12)  ;;  %v1851_v22 = vld [vmem:[#allocation2 + $0x58] sm:$0xff] (!%p2792_p12) }
 0x5ac   : > { %v1808_v63 = vld [vmem:[%s4584_s10] sm:$0xff] (!%p2792_p12)  ;;  %v1810_v52 = vld [vmem:[%s4584_s10 + $0x10] sm:$0xff] (!%p2792_p12)  ;;  %v1853_v11 = vld [vmem:[#allocation2 + $0x68] sm:$0xff] (!%p2792_p12) }
 0x5ad   : > { %v1812_v18 = vld [vmem:[%s4584_s10 + $0x20] sm:$0xff] (!%p2792_p12)  ;;  %v3316_v14 = vpack.c.bf16 (!%p2792_p12), %v1810_v52, %v1808_v63  ;;  %v1814_v53 = vld [vmem:[%s4584_s10 + $0x30] sm:$0xff] (!%p2792_p12)  ;;  %v1855_v48 = vld [vmem:[#allocation2 + $0x78] sm:$0xff] (!%p2792_p12) }
 0x5ae   : > { %v3320_v17 = vpack.c.bf16 (!%p2792_p12), %v1814_v53, %v1812_v18  ;;  %v1816_v1 = vld [vmem:[%s4584_s10 + $0x40] sm:$0xff] (!%p2792_p12)  ;;  %v1818_v26 = vld [vmem:[%s4584_s10 + $0x50] sm:$0xff] (!%p2792_p12)  ;;  %v1809_v23 = vld [vmem:[%s4584_s10 + $0x8] sm:$0xff] (!%p2792_p12) }
 0x5af   : > { %3317 = vmatprep.subr.bf16.mxu0 (!%p2792_p12), %v3316_v14  ;;  %v3324_v28 = vpack.c.bf16 (!%p2792_p12), %v1818_v26, %v1816_v1  ;;  %v1820_v29 = vld [vmem:[%s4584_s10 + $0x60] sm:$0xff] (!%p2792_p12)  ;;  %v1822_v19 = vld [vmem:[%s4584_s10 + $0x70] sm:$0xff] (!%p2792_p12)  ;;  %v1811_v46 = vld [vmem:[%s4584_s10 + $0x18] sm:$0xff] (!%p2792_p12) }
 0x5b0   : > { %3319 = vmatpush3.bf16.xpose.msra.mxu0 %v3316_v14  ;;  %v3328_v31 = vpack.c.bf16 %v1822_v19, %v1820_v29  ;;  %v1824_v34 = vld [vmem:[%s4584_s10 + $0x80] sm:$0xff]  ;;  %v1826_v30 = vld [vmem:[%s4584_s10 + $0x90] sm:$0xff]  ;;  %v1813_v15 = vld [vmem:[%s4584_s10 + $0x28] sm:$0xff]  ;;  %v3348_v24 = vpack.c.bf16 %v1811_v46, %v1809_v23 }
 0x5b1   : > { %3321 = vmatprep.subr.bf16.mxu0 %v3320_v17  ;;  %v3332_v35 = vpack.c.bf16 %v1826_v30, %v1824_v34  ;;  %v1828_v36 = vld [vmem:[%s4584_s10 + $0xa0] sm:$0xff]  ;;  %v1830_v37 = vld [vmem:[%s4584_s10 + $0xb0] sm:$0xff]  ;;  %v1815_v2 = vld [vmem:[%s4584_s10 + $0x38] sm:$0xff] }
 0x5b2   : > { %v3336_v39 = vpack.c.bf16 %v1830_v37, %v1828_v36  ;;  %v1832_v41 = vld [vmem:[%s4584_s10 + $0xc0] sm:$0xff]  ;;  %v1834_v43 = vld [vmem:[%s4584_s10 + $0xd0] sm:$0xff]  ;;  %v3352_v20 = vpack.c.bf16 %v1815_v2, %v1813_v15  ;;  %v1817_v33 = vld [vmem:[%s4584_s10 + $0x48] sm:$0xff]  ;;  %3349 = vmatprep.subr.bf16.mxu1 %v3348_v24 }
 0x5b3   : > { %v3340_v44 = vpack.c.bf16 %v1834_v43, %v1832_v41  ;;  %v1836_v45 = vld [vmem:[%s4584_s10 + $0xe0] sm:$0xff]  ;;  %v1838_v47 = vld [vmem:[%s4584_s10 + $0xf0] sm:$0xff]  ;;  %v1819_v8 = vld [vmem:[%s4584_s10 + $0x58] sm:$0xff]  ;;  %3351 = vmatpush3.bf16.msra.mxu1 %v3348_v24 }
 0x5b4   : > { %v3344_v50 = vpack.c.bf16 %v1838_v47, %v1836_v45  ;;  %v1852_v40 = vld [vmem:[#allocation2 + $0x60] sm:$0xff]  ;;  %v1854_v56 = vld [vmem:[#allocation2 + $0x70] sm:$0xff]  ;;  %3353 = vmatprep.subr.bf16.mxu1 %v3352_v20  ;;  %v3356_v63 = vpack.c.bf16 %v1819_v8, %v1817_v33  ;;  %v1821_v52 = vld [vmem:[%s4584_s10 + $0x68] sm:$0xff] }
 0x5b5   : > { %v1823_v18 = vld [vmem:[%s4584_s10 + $0x78] sm:$0xff]  ;;  %v4658_v53 = vld [vmem:[#allocation3] sm:$0xff]  ;;  %v1825_v19 = vld [vmem:[%s4584_s10 + $0x88] sm:$0xff] }
 0x5b6   : > { %v3360_v14 = vpack.c.bf16 %v1823_v18, %v1821_v52  ;;  %v4663_v26 = vld [vmem:[#allocation3 + $0x18] sm:$0xff]  ;;  %v4678_v37 = vld [vmem:[#allocation3 + $0x10] sm:$0xff]  ;;  %v1829_v43 = vld [vmem:[%s4584_s10 + $0xa8] sm:$0xff] }
 0x5b7   : > { %3355 = vmatpush3.bf16.msra.mxu1 %v3352_v20  ;;  %v2010_v15 = vld [vmem:[#allocation3 + $0x48] sm:$0xff]  ;;  %v4725_v2 = vld [vmem:[#allocation3 + $0x50] sm:$0xff]  ;;  %v2012_v52 = vld [vmem:[#allocation3 + $0x58] sm:$0xff] }
 0x5b8   : > { %3323 = vmatpush3.bf16.xpose.msra.mxu0 %v3320_v17  ;;  %3357 = vmatprep.subr.bf16.mxu1 %v3356_v63 }
 0x5b9   : > { %3325 = vmatprep.subr.bf16.mxu0 %v3324_v28 }
 0x5bb   : > { %3359 = vmatpush3.bf16.msra.mxu1 %v3356_v63 }
 0x5bc   : > { %3361 = vmatprep.subr.bf16.mxu1 %v3360_v14 }
 0x5bf   : > { %3363 = vmatpush3.bf16.msra.mxu1 %v3360_v14  ;;  %v4735_v14 = vld [vmem:[#allocation3 + $0x60] sm:$0xff] }
 0x5c0   : > { %3327 = vmatpush3.bf16.xpose.msra.mxu0 %v3324_v28  ;;  %v4665_v28 = vld [vmem:[#allocation3 + $0x8] sm:$0xff] }
 0x5c1   : > { %3329 = vmatprep.subr.bf16.mxu0 %v3328_v31 }
 0x5c8   : > { %3331 = vmatpush3.bf16.xpose.msra.mxu0 %v3328_v31  ;;  %v1827_v31 = vld [vmem:[%s4584_s10 + $0x98] sm:$0xff] }
 0x5c9   : > { %3333 = vmatprep.subr.bf16.mxu0 %v3332_v35 }
 0x5d0   : > { %3335 = vmatpush3.bf16.xpose.msra.mxu0 %v3332_v35  ;;  %v3364_v35 = vpack.c.bf16 %v1827_v31, %v1825_v19  ;;  %v2014_v31 = vld [vmem:[#allocation3 + $0x68] sm:$0xff] }
 0x5d1   : > { %3337 = vmatprep.subr.bf16.mxu0 %v3336_v39 }
 0x5d2   : > { %3365 = vmatprep.subr.bf16.mxu1 %v3364_v35 }
 0x5d3   : > { %3367 = vmatpush3.bf16.msra.mxu1 %v3364_v35  ;;  %v4746_v35 = vld [vmem:[#allocation3 + $0x70] sm:$0xff] }
 0x5d8   : > { %3339 = vmatpush3.bf16.xpose.msra.mxu0 %v3336_v39  ;;  %v4682_v39 = vld [vmem:[#allocation3 + $0x20] sm:$0xff] }
 0x5d9   : > { %3341 = vmatprep.subr.bf16.mxu0 %v3340_v44 }
 0x5e0   : > { %3343 = vmatpush3.bf16.xpose.msra.mxu0 %v3340_v44  ;;  %v1831_v44 = vld [vmem:[%s4584_s10 + $0xb8] sm:$0xff] }
 0x5e1   : > { %3345 = vmatprep.subr.bf16.mxu0 %v3344_v50 }
 0x5e8   : > { %3347 = vmatpush3.bf16.xpose.msra.mxu0 %v3344_v50  ;;  %v3368_v50 = vpack.c.bf16 %v1831_v44, %v1829_v43 }
 0x5ea   : > { %3369 = vmatprep.subr.bf16.mxu1 %v3368_v50 }
 0x5eb   : > { %3371 = vmatpush3.bf16.msra.mxu1 %v3368_v50 }
 0x5ef   : > { %3141 = vmatmul.mubr.f32.vlgmr.msra.gmra.mrb[0].mxu0 %v1841_v54  ;;  %v4692_v54 = vld [vmem:[#allocation3 + $0x28] sm:$0xff] }
 0x5f0   : > { %3143 = vmatprep.mubr.f32.mxu0 %v1842_v55 }
 0x5f3   : > { %3144 = vmatmul.mubr.f32.gmra.mrb[2].mxu0 %v1843_v0  ;;  %v4699_v0 = vld [vmem:[#allocation3 + $0x30] sm:$0xff] }
 0x5f4   : > { %3146 = vmatprep.mubr.f32.mxu0 %v1844_v9 }
 0x5f7   : > { %3147 = vmatmul.mubr.f32.gmra.mrb[4].mxu0 %v1845_v57  ;;  %v1833_v57 = vld [vmem:[%s4584_s10 + $0xc8] sm:$0xff] }
 0x5f8   : > { %3149 = vmatprep.mubr.f32.mxu0 %v1846_v12  ;;  %v1835_v12 = vld [vmem:[%s4584_s10 + $0xd8] sm:$0xff] }
 0x5fb   : > { %3150 = vmatmul.mubr.f32.gmra.mrb[6].mxu0 %v1847_v21 }
 0x5fc   : > { %3152 = vmatprep.mubr.f32.mxu0 %v1848_v32 }
 0x5ff   : > { %3153 = vmatmul.mubr.f32.gmra.mrb[8].mxu0 %v1849_v27  ;;  %v3372_v27 = vpack.c.bf16 %v1835_v12, %v1833_v57 }
 0x600   : > { %3155 = vmatprep.mubr.f32.mxu0 %v1850_v49  ;;  %v4707_v49 = vld [vmem:[#allocation3 + $0x38] sm:$0xff] }
 0x601   : > { %3373 = vmatprep.subr.bf16.mxu1 %v3372_v27 }
 0x602   : > { %3375 = vmatpush3.bf16.msra.mxu1 %v3372_v27 }
 0x603   : > { %3156 = vmatmul.mubr.f32.gmra.mrb[10].mxu0 %v1851_v22 }
 0x604   : > { %3158 = vmatprep.mubr.f32.mxu0 %v1852_v40  ;;  %v4713_v40 = vld [vmem:[#allocation3 + $0x40] sm:$0xff] }
 0x607   : > { %3159 = vmatmul.mubr.f32.gmra.mrb[12].mxu0 %v1853_v11 }
 0x608   : > { %3161 = vmatprep.mubr.f32.mxu0 %v1854_v56  ;;  %v1837_v56 = vld [vmem:[%s4584_s10 + $0xe8] sm:$0xff] }
 0x60b   : > { %3162 = vmatmul.mubr.f32.gmra.mrb[14].mxu0 %v1855_v48  ;;  %v1839_v48 = vld [vmem:[%s4584_s10 + $0xf8] sm:$0xff] }
 0x60c   : > { %v3376_v46 = vpack.c.bf16 %v1839_v48, %v1837_v56 }
 0x60e   : > { %3377 = vmatprep.subr.bf16.mxu1 %v3376_v46 }
 0x60f   : > { %3379 = vmatpush3.bf16.msra.mxu1 %v3376_v46 }
 0x6c2   : > { %v4602_v58 = vpop.f32.mrb[0].mxu0 }
 0x6c3   : > { %v4604_v6 = vpop.f32.mrb[1].mxu0 }
 0x6c4   : > { %2017 = vmax.xlane.f32.xlu0 %v4604_v6 }
 0x6c6   : > { %v4607_v60 = vpop.f32.mrb[2].mxu0 }
 0x6c7   : > { %2023 = vmax.xlane.f32.xlu1 %v4607_v60  ;;  %v4610_v3 = vpop.f32.mrb[3].mxu0 }
 0x6c8   : > { %2019 = vmax.xlane.f32.xlu0 %v4602_v58 }
 0x6ca   : > { %v4613_v61 = vpop.f32.mrb[4].mxu0 }
 0x6cb   : > { %2021 = vmax.xlane.f32.xlu1 %v4610_v3  ;;  %v4616_v5 = vpop.f32.mrb[5].mxu0 }
 0x6cc   : > { %2025 = vmax.xlane.f32.xlu0 %v4616_v5 }
 0x6ce   : > { %v4619_v4 = vpop.f32.mrb[6].mxu0 }
 0x6cf   : > { %2027 = vmax.xlane.f32.xlu1 %v4613_v61  ;;  %v4622_v7 = vpop.f32.mrb[7].mxu0 }
 0x6d0   : > { %2029 = vmax.xlane.f32.xlu0 %v4622_v7 }
 0x6d2   : > { %v4625_v10 = vpop.f32.mrb[8].mxu0 }
 0x6d3   : > { %2031 = vmax.xlane.f32.xlu1 %v4619_v4  ;;  %v4628_v16 = vpop.f32.mrb[9].mxu0 }
 0x6d4   : > { %2033 = vmax.xlane.f32.xlu0 %v4628_v16 }
 0x6d6   : > { %v4631_v13 = vpop.f32.mrb[10].mxu0 }
 0x6d7   : > { %2035 = vmax.xlane.f32.xlu1 %v4625_v10  ;;  %v4634_v59 = vpop.f32.mrb[11].mxu0 }
 0x6d8   : > { %2037 = vmax.xlane.f32.xlu0 %v4634_v59 }
 0x6da   : > { %v4637_v62 = vpop.f32.mrb[12].mxu0 }
 0x6db   : > { %2039 = vmax.xlane.f32.xlu1 %v4631_v13  ;;  %v4640_v42 = vpop.f32.mrb[13].mxu0 }
 0x6dc   : > { %2041 = vmax.xlane.f32.xlu0 %v4640_v42 }
 0x6de   : > { %v4643_v25 = vpop.f32.mrb[14].mxu0 }
 0x6df   : > { %2043 = vmax.xlane.f32.xlu1 %v4637_v62  ;;  %v4646_v51 = vpop.f32.mrb[15].mxu0 }
 0x6e0   : > { %2045 = vmax.xlane.f32.xlu0 %v4646_v51 }
 0x6e3   : > { %2047 = vmax.xlane.f32.xlu1 %v4643_v25 }
 0x751   : > { %v2018_v17 = vpop.xlane.xlu0 %2017 }
 0x752   : > { %v4661_v1 = vmax.f32 %v4658_v53, %v2018_v17 }
 0x754   : > { %2627 = vst.msk [vmem:[#allocation3] sm:$0xff] %vm2321_vm4, %v4661_v1  ;;  %v2024_v29 = vpop.xlane.xlu1 %2023  ;;  %2115 = vperm.xlu0 %3584, %v4661_v1   ;;  %v2065_v20 = vsub.f32 %v4658_v53, %v4661_v1 }
 0x755   : > { %v4673_v34 = vmax.f32 %v4663_v26, %v2024_v29  ;;  %v2020_v30 = vpop.xlane.xlu0 %2019 }
 0x756   : > { %v4676_v36 = vmax.f32 %v4665_v28, %v2020_v30  ;;  %v2081_v17 = vmul.f32 1.442695, %v2065_v20 }
 0x757   : > { %2630 = vst.msk [vmem:[#allocation3 + $0x18] sm:$0xff] %vm2321_vm4, %v4673_v34  ;;  %v2068_v53 = vsub.f32 %v4663_v26, %v4673_v34 }
 0x758   : > { %2628 = vst.msk [vmem:[#allocation3 + $0x8] sm:$0xff] %vm2321_vm4, %v4676_v36  ;;  %v2022_v41 = vpop.xlane.xlu1 %2021  ;;  %2120 = vperm.xlu1 %3585, %v4676_v36   ;;  %3586 = vpow2.f32 %v2081_v17 }
 0x759   : > { %v4690_v45 = vmax.f32 %v4678_v37, %v2022_v41  ;;  %v2026_v47 = vpop.xlane.xlu0 %2025  ;;  %v2087_v41 = vmul.f32 1.442695, %v2068_v53 }
 0x75a   : > { %v4695_v55 = vmax.f32 %v4682_v39, %v2026_v47  ;;  %v4751_v47 = vld [vmem:[#allocation3 + $0x78] sm:$0xff] }
 0x75b   : > { %2629 = vst.msk [vmem:[#allocation3 + $0x10] sm:$0xff] %vm2321_vm4, %v4690_v45  ;;  %3588 = vpow2.f32 %v2087_v41 }
 0x75c   : > { %v2028_v9 = vpop.xlane.xlu1 %2027  ;;  %2130 = vperm.xlu1 %3585, %v4673_v34   ;;  %2631 = vst.msk [vmem:[#allocation3 + $0x20] sm:$0xff] %vm2321_vm4, %v4695_v55  ;;  %v2069_v46 = vsub.f32 %v4682_v39, %v4695_v55 }
 0x75d   : > { %v2054_v21 = vmax.f32 %v4692_v54, %v2028_v9  ;;  %v2030_v32 = vpop.xlane.xlu0 %2029 }
 0x75e   : > { %v4710_v22 = vmax.f32 %v4699_v0, %v2030_v32  ;;  %v2089_v20 = vmul.f32 1.442695, %v2069_v46 }
 0x75f   : > { %2632 = vst.msk [vmem:[#allocation3 + $0x28] sm:$0xff] %vm2321_vm4, %v2054_v21  ;;  %v2070_v26 = vsub.f32 %v4692_v54, %v2054_v21 }
 0x760   : > { %v2032_v11 = vpop.xlane.xlu1 %2031  ;;  %2125 = vperm.xlu1 %3585, %v4690_v45   ;;  %2633 = vst.msk [vmem:[#allocation3 + $0x30] sm:$0xff] %vm2321_vm4, %v4710_v22 }
 0x761   : > { %v2056_v38 = vmax.f32 %v4707_v49, %v2032_v11  ;;  %v2034_v23 = vpop.xlane.xlu0 %2033  ;;  %v2091_v9 = vmul.f32 1.442695, %v2070_v26 }
 0x762   : > { %v4722_v24 = vmax.f32 %v4713_v40, %v2034_v23 }
 0x763   : > { %2634 = vst.msk [vmem:[#allocation3 + $0x38] sm:$0xff] %vm2321_vm4, %v2056_v38  ;;  %v2072_v57 = vsub.f32 %v4707_v49, %v2056_v38  ;;  %3590 = vpow2.f32 %v2091_v9 }
 0x764   : > { %v2036_v33 = vpop.xlane.xlu1 %2035  ;;  %2140 = vperm.xlu1 %3585, %v2054_v21   ;;  %2635 = vst.msk [vmem:[#allocation3 + $0x40] sm:$0xff] %vm2321_vm4, %v4722_v24  ;;  %v2066_v21 = vsub.f32 %v4665_v28, %v4676_v36  ;;  %v2067_v28 = vsub.f32 %v4678_v37, %v4690_v45  ;;  %v4776_v36 = vpop.eup %3586 }
 0x765   : > { %v2058_v8 = vmax.f32 %v2010_v15, %v2036_v33  ;;  %v2038_v63 = vpop.xlane.xlu0 %2037  ;;  %v2095_v49 = vmul.f32 1.442695, %v2072_v57  ;;  %v2071_v33 = vsub.f32 %v4699_v0, %v4710_v22 }
 0x766   : > { %v4732_v18 = vmax.f32 %v4725_v2, %v2038_v63  ;;  %v2083_v56 = vmul.f32 1.442695, %v2066_v21  ;;  %v2085_v23 = vmul.f32 1.442695, %v2067_v28  ;;  %v2073_v63 = vsub.f32 %v4713_v40, %v4722_v24 }
 0x767   : > { %2636 = vst.msk [vmem:[#allocation3 + $0x48] sm:$0xff] %vm2321_vm4, %v2058_v8  ;;  %2160 = vperm.xlu0 %3584, %v2058_v8   ;;  %v2074_v11 = vsub.f32 %v2010_v15, %v2058_v8  ;;  %3592 = vpow2.f32 %v2095_v49  ;;  %v4782_v15 = vpop.eup %3588 }
 0x768   : > { %v2040_v1 = vpop.xlane.xlu1 %2039  ;;  %2135 = vperm.xlu1 %3585, %v4695_v55   ;;  %2637 = vst.msk [vmem:[#allocation3 + $0x50] sm:$0xff] %vm2321_vm4, %v4732_v18  ;;  %3594 = vpow2.f32 %v2083_v56  ;;  %v2093_v55 = vmul.f32 1.442695, %v2071_v33  ;;  %v2097_v0 = vmul.f32 1.442695, %v2073_v63 }
 0x769   : > { %v2060_v29 = vmax.f32 %v2012_v52, %v2040_v1  ;;  %v2042_v19 = vpop.xlane.xlu0 %2041  ;;  %v2099_v48 = vmul.f32 1.442695, %v2074_v11 }
 0x76a   : > { %v4743_v30 = vmax.f32 %v4735_v14, %v2042_v19 }
 0x76b   : > { %2638 = vst.msk [vmem:[#allocation3 + $0x58] sm:$0xff] %vm2321_vm4, %v2060_v29  ;;  %2170 = vperm.xlu0 %3584, %v2060_v29   ;;  %3596 = vpow2.f32 %v2099_v48 }
 0x76c   : > { %v2044_v34 = vpop.xlane.xlu1 %2043  ;;  %2150 = vperm.xlu1 %3585, %v2056_v38   ;;  %2639 = vst.msk [vmem:[#allocation3 + $0x60] sm:$0xff] %vm2321_vm4, %v4743_v30  ;;  %v2076_v38 = vsub.f32 %v2012_v52, %v2060_v29  ;;  %3598 = vpow2.f32 %v2085_v23 }
 0x76d   : > { %v2062_v43 = vmax.f32 %v2014_v31, %v2044_v34  ;;  %v2046_v44 = vpop.xlane.xlu0 %2045  ;;  %v4788_v8 = vpop.eup %3590 }
 0x76e   : > { %v4754_v50 = vmax.f32 %v4746_v35, %v2046_v44  ;;  %v2103_v37 = vmul.f32 1.442695, %v2076_v38 }
 0x76f   : > { %2640 = vst.msk [vmem:[#allocation3 + $0x68] sm:$0xff] %vm2321_vm4, %v2062_v43  ;;  %2180 = vperm.xlu0 %3584, %v2062_v43   ;;  %v2078_v45 = vsub.f32 %v2014_v31, %v2062_v43 }
 0x770   : > { %2145 = vperm.xlu1 %3585, %v4710_v22   ;;  %v2048_v54 = vpop.xlane.xlu1 %2047  ;;  %v2079_v12 = vsub.f32 %v4746_v35, %v4754_v50  ;;  %2641 = vst.msk [vmem:[#allocation3 + $0x70] sm:$0xff] %vm2321_vm4, %v4754_v50  ;;  %3600 = vpow2.f32 %v2103_v37  ;;  %v2075_v22 = vsub.f32 %v4725_v2, %v4732_v18 }
 0x771   : > { %v4766_v32 = vmax.f32 %v4751_v47, %v2048_v54  ;;  %v2107_v39 = vmul.f32 1.442695, %v2078_v45  ;;  %3602 = vpow2.f32 %v2089_v20  ;;  %v4794_v52 = vpop.eup %3592 }
 0x772   : > { %v4796_v17 = vpop.eup %3594  ;;  %v2101_v40 = vmul.f32 1.442695, %v2075_v22 }
 0x773   : > { %v2080_v27 = vsub.f32 %v4751_v47, %v4766_v32  ;;  %2642 = vst.msk [vmem:[#allocation3 + $0x78] sm:$0xff] %vm2321_vm4, %v4766_v32  ;;  %2190 = vperm.xlu0 %3584, %v4766_v32   ;;  %3604 = vpow2.f32 %v2107_v39 }
 0x774   : > { %2155 = vperm.xlu1 %3585, %v4722_v24   ;;  %3606 = vpow2.f32 %v2093_v55  ;;  %v2077_v24 = vsub.f32 %v4735_v14, %v4743_v30 }
 0x775   : > { %v4802_v53 = vpop.eup %3596  ;;  %3608 = vpow2.f32 %v2097_v0 }
 0x776   : > { %v4804_v1 = vpop.eup %3598  ;;  %3610 = vpow2.f32 %v2101_v40  ;;  %v2105_v2 = vmul.f32 1.442695, %v2077_v24 }
 0x777   : > { %2356 = vperm.xlu0 %3584, %v4776_v36  }
 0x778   : > { %2165 = vperm.xlu1 %3585, %v4732_v18   ;;  %3612 = vpow2.f32 %v2105_v2 }
 0x77a   : > { %v4810_v29 = vpop.eup %3600 }
 0x77b   : > { %2371 = vperm.xlu0 %3584, %v4782_v15   ;;  %v4812_v19 = vpop.eup %3602 }
 0x77c   : > { %2175 = vperm.xlu1 %3585, %v4743_v30  }
 0x77d   : > { %v4816_v18 = vpop.eup %3604 }
 0x77e   : > { %v4818_v31 = vpop.eup %3606 }
 0x77f   : > { %2381 = vperm.xlu0 %3584, %v4788_v8   ;;  %v4822_v14 = vpop.eup %3608 }
 0x780   : > { %2185 = vperm.xlu1 %3585, %v4754_v50   ;;  %v4825_v30 = vpop.eup %3610 }
 0x782   : > { %v4828_v41 = vpop.eup %3612 }
 0x783   : > { %2391 = vperm.xlu0 %3584, %v4794_v52  }
 0x784   : > { %2361 = vperm.xlu1 %3585, %v4796_v17  }
 0x787   : > { %2401 = vperm.xlu0 %3584, %v4802_v53  }
 0x788   : > { %2366 = vperm.xlu1 %3585, %v4804_v1  }
 0x78b   : > { %2411 = vperm.xlu0 %3584, %v4810_v29  }
 0x78c   : > { %2376 = vperm.xlu1 %3585, %v4812_v19  }
 0x78f   : > { %2421 = vperm.xlu0 %3584, %v4816_v18  }
 0x790   : > { %2386 = vperm.xlu1 %3585, %v4818_v31  }
 0x794   : > { %2396 = vperm.xlu1 %3585, %v4822_v14  }
 0x798   : > { %2406 = vperm.xlu1 %3585, %v4825_v30  }
 0x79c   : > { %2416 = vperm.xlu1 %3585, %v4828_v41  }
 0x7d3   : > { %v2116_v26 = vpop.permute.xlu0 %2115 }
 0x7d4   : > { %v2193_v34 = vsub.f32 %v4604_v6, %v2116_v26 }
 0x7d6   : > { %v2209_v43 = vmul.f32 1.442695, %v2193_v34 }
 0x7d7   : > { %v2121_v44 = vpop.permute.xlu1 %2120 }
 0x7d8   : > { %3614 = vpow2.f32 %v2209_v43  ;;  %v2194_v9 = vsub.f32 %v4602_v58, %v2121_v44 }
 0x7da   : > { %v2211_v57 = vmul.f32 1.442695, %v2194_v9 }
 0x7db   : > { %v2131_v54 = vpop.permute.xlu1 %2130 }
 0x7dc   : > { %3616 = vpow2.f32 %v2211_v57  ;;  %v2196_v21 = vsub.f32 %v4607_v60, %v2131_v54 }
 0x7de   : > { %v2215_v49 = vmul.f32 1.442695, %v2196_v21 }
 0x7df   : > { %v2126_v11 = vpop.permute.xlu1 %2125 }
 0x7e0   : > { %3618 = vpow2.f32 %v2215_v49  ;;  %v2195_v56 = vsub.f32 %v4610_v3, %v2126_v11 }
 0x7e2   : > { %v3615_v28 = vpop.eup %3614  ;;  %v2213_v48 = vmul.f32 1.442695, %v2195_v56 }
 0x7e3   : > { %v2141_v38 = vpop.permute.xlu1 %2140  ;;  %2273 = vadd.xlane.f32.xlu1 %v3615_v28  ;;  %3196 = vmatprep.mubr.f32.mxu1 %v3615_v28 }
 0x7e4   : > { %3620 = vpow2.f32 %v2213_v48  ;;  %v2198_v6 = vsub.f32 %v4613_v61, %v2141_v38 }
 0x7e6   : > { %v3617_v23 = vpop.eup %3616  ;;  %v2219_v58 = vmul.f32 1.442695, %v2198_v6  ;;  %v2161_v46 = vpop.permute.xlu0 %2160 }
 0x7e7   : > { %v2136_v37 = vpop.permute.xlu1 %2135  ;;  %2275 = vadd.xlane.f32.xlu0 %v3617_v23  ;;  %3197 = vmatmul.mubr.f32.vlgmr.msra.gmra.mrb[0].mxu1 %v3617_v23  ;;  %v2202_v55 = vsub.f32 %v4625_v10, %v2161_v46 }
 0x7e8   : > { %3622 = vpow2.f32 %v2219_v58  ;;  %v2197_v60 = vsub.f32 %v4616_v5, %v2136_v37 }
 0x7e9   : > { %v2227_v5 = vmul.f32 1.442695, %v2202_v55 }
 0x7ea   : > { %v3619_v45 = vpop.eup %3618  ;;  %v2217_v20 = vmul.f32 1.442695, %v2197_v60  ;;  %v2171_v3 = vpop.permute.xlu0 %2170 }
 0x7eb   : > { %v2151_v33 = vpop.permute.xlu1 %2150  ;;  %2279 = vadd.xlane.f32.xlu1 %v3619_v45  ;;  %v2204_v24 = vsub.f32 %v4631_v13, %v2171_v3 }
 0x7ec   : > { %3624 = vpow2.f32 %v2217_v20  ;;  %v2200_v39 = vsub.f32 %v4619_v4, %v2151_v33  ;;  %v2111_v20 = vmul.f32 1.442695, %v2080_v27 }
 0x7ed   : > { %v2231_v10 = vmul.f32 1.442695, %v2204_v24 }
 0x7ee   : > { %v3621_v61 = vpop.eup %3620  ;;  %v2223_v63 = vmul.f32 1.442695, %v2200_v39  ;;  %v2181_v22 = vpop.permute.xlu0 %2180 }
 0x7ef   : > { %v2146_v0 = vpop.permute.xlu1 %2145  ;;  %2277 = vadd.xlane.f32.xlu0 %v3621_v61  ;;  %3199 = vmatprep.mubr.f32.mxu1 %v3621_v61  ;;  %v2206_v43 = vsub.f32 %v4637_v62, %v2181_v22 }
 0x7f0   : > { %3626 = vpow2.f32 %v2223_v63  ;;  %v2199_v40 = vsub.f32 %v4622_v7, %v2146_v0  ;;  %3200 = vmatmul.mubr.f32.gmra.mrb[2].mxu1 %v3619_v45  ;;  %v2109_v45 = vmul.f32 1.442695, %v2079_v12 }
 0x7f1   : > { %v2235_v13 = vmul.f32 1.442695, %v2206_v43 }
 0x7f2   : > { %v3623_v2 = vpop.eup %3622  ;;  %v2221_v26 = vmul.f32 1.442695, %v2199_v40  ;;  %v2191_v9 = vpop.permute.xlu0 %2190 }
 0x7f3   : > { %v2156_v34 = vpop.permute.xlu1 %2155  ;;  %2283 = vadd.xlane.f32.xlu1 %v3623_v2  ;;  %v2208_v21 = vsub.f32 %v4643_v25, %v2191_v9 }
 0x7f4   : > { %3628 = vpow2.f32 %v2221_v26  ;;  %v2201_v4 = vsub.f32 %v4628_v16, %v2156_v34  ;;  %v2242_v34 = vld [vmem:[#allocation4 + $0x8] sm:$0xff] }
 0x7f5   : > { %3630 = vpow2.f32 %v2227_v5  ;;  %v2239_v56 = vmul.f32 1.442695, %v2208_v21  ;;  %v2241_v5 = vld [vmem:[#allocation4] sm:$0xff] }
 0x7f6   : > { %v3625_v44 = vpop.eup %3624  ;;  %v2225_v57 = vmul.f32 1.442695, %v2201_v4  ;;  %v4861_v35 = vpop.permute.xlu0 %2356  ;;  %v2257_v24 = vmul.f32 %v4776_v36, %v2241_v5  ;;  %v2251_v5 = vld [vmem:[#allocation4 + $0x50] sm:$0xff] }
 0x7f7   : > { %v2166_v54 = vpop.permute.xlu1 %2165  ;;  %2281 = vadd.xlane.f32.xlu0 %v3625_v44  ;;  %3202 = vmatprep.mubr.f32.mxu1 %v3625_v44  ;;  %v2244_v44 = vld [vmem:[#allocation4 + $0x18] sm:$0xff] }
 0x7f8   : > { %3632 = vpow2.f32 %v2225_v57  ;;  %v2203_v7 = vsub.f32 %v4634_v59, %v2166_v54  ;;  %3203 = vmatmul.mubr.f32.gmra.mrb[4].mxu1 %v3623_v2  ;;  %v2260_v57 = vmul.f32 %v4782_v15, %v2244_v44 }
 0x7f9   : > { %3634 = vpow2.f32 %v2231_v10  ;;  %v2258_v10 = vmul.f32 %v4796_v17, %v2242_v34  ;;  %v2267_v34 = vmul.f32 %v4825_v30, %v2251_v5  ;;  %v2255_v30 = vld [vmem:[#allocation4 + $0x70] sm:$0xff] }
 0x7fa   : > { %v3627_v49 = vpop.eup %3626  ;;  %v2229_v16 = vmul.f32 1.442695, %v2203_v7  ;;  %v4865_v12 = vpop.permute.xlu0 %2371  ;;  %v2243_v7 = vld [vmem:[#allocation4 + $0x10] sm:$0xff] }
 0x7fb   : > { %v2176_v11 = vpop.permute.xlu1 %2175  ;;  %2287 = vadd.xlane.f32.xlu1 %v3627_v49  ;;  %v2259_v36 = vmul.f32 %v4804_v1, %v2243_v7 }
 0x7fc   : > { %3636 = vpow2.f32 %v2229_v16  ;;  %v2205_v62 = vsub.f32 %v4640_v42, %v2176_v11 }
 0x7fd   : > { %3638 = vpow2.f32 %v2235_v13 }
 0x7fe   : > { %v3629_v28 = vpop.eup %3628  ;;  %v2233_v48 = vmul.f32 1.442695, %v2205_v62  ;;  %v4869_v47 = vpop.permute.xlu0 %2381  ;;  %v2245_v62 = vld [vmem:[#allocation4 + $0x20] sm:$0xff] }
 0x7ff   : > { %v3631_v38 = vpop.eup %3630  ;;  %2285 = vadd.xlane.f32.xlu0 %v3629_v28  ;;  %v2186_v6 = vpop.permute.xlu1 %2185  ;;  %3205 = vmatprep.mubr.f32.mxu1 %v3629_v28  ;;  %v2261_v15 = vmul.f32 %v4812_v19, %v2245_v62 }
 0x800   : > { %3640 = vpow2.f32 %v2233_v48  ;;  %v2207_v59 = vsub.f32 %v4646_v51, %v2186_v6  ;;  %2291 = vadd.xlane.f32.xlu1 %v3631_v38  ;;  %3206 = vmatmul.mubr.f32.gmra.mrb[6].mxu1 %v3627_v49  ;;  %v2246_v49 = vld [vmem:[#allocation4 + $0x28] sm:$0xff]  ;;  %v2248_v48 = vld [vmem:[#allocation4 + $0x38] sm:$0xff] }
 0x801   : > { %3642 = vpow2.f32 %v2239_v56  ;;  %v2262_v17 = vmul.f32 %v4788_v8, %v2246_v49  ;;  %v2264_v1 = vmul.f32 %v4794_v52, %v2248_v48  ;;  %v2341_v48 = vld [vmem:[#allocation5 + $0x18] sm:$0xff] }
 0x802   : > { %v3633_v25 = vpop.eup %3632  ;;  %v2237_v23 = vmul.f32 1.442695, %v2207_v59  ;;  %v4873_v27 = vpop.permute.xlu0 %2391  ;;  %v2247_v59 = vld [vmem:[#allocation4 + $0x30] sm:$0xff] }
 0x803   : > { %v3635_v58 = vpop.eup %3634  ;;  %2289 = vadd.xlane.f32.xlu0 %v3633_v25  ;;  %3208 = vmatprep.mubr.f32.mxu1 %v3633_v25  ;;  %v4859_v39 = vpop.permute.xlu1 %2361  ;;  %v2263_v8 = vmul.f32 %v4818_v31, %v2247_v59 }
 0x804   : > { %3644 = vpow2.f32 %v2237_v23  ;;  %2295 = vadd.xlane.f32.xlu1 %v3635_v58  ;;  %3209 = vmatmul.mubr.f32.gmra.mrb[8].mxu1 %v3631_v38  ;;  %v2250_v23 = vld [vmem:[#allocation4 + $0x48] sm:$0xff] }
 0x805   : > { %3646 = vpow2.f32 %v2109_v45 }
 0x806   : > { %v3637_v42 = vpop.eup %3636  ;;  %3648 = vpow2.f32 %v2111_v20  ;;  %v4877_v63 = vpop.permute.xlu0 %2401 }
 0x807   : > { %v3639_v46 = vpop.eup %3638  ;;  %2293 = vadd.xlane.f32.xlu0 %v3637_v42  ;;  %3211 = vmatprep.mubr.f32.mxu1 %v3637_v42  ;;  %v4863_v50 = vpop.permute.xlu1 %2366 }
 0x808   : > { %2299 = vadd.xlane.f32.xlu1 %v3639_v46  ;;  %3212 = vmatmul.mubr.f32.gmra.mrb[10].mxu1 %v3635_v58  ;;  %v2266_v58 = vmul.f32 %v4802_v53, %v2250_v23 }
 0x80a   : > { %v3641_v37 = vpop.eup %3640  ;;  %v4881_v22 = vpop.permute.xlu0 %2411 }
 0x80b   : > { %v3643_v60 = vpop.eup %3642  ;;  %2297 = vadd.xlane.f32.xlu0 %v3641_v37  ;;  %3214 = vmatprep.mubr.f32.mxu1 %v3641_v37  ;;  %v4867_v55 = vpop.permute.xlu1 %2376 }
 0x80c   : > { %2303 = vadd.xlane.f32.xlu1 %v3643_v60  ;;  %3215 = vmatmul.mubr.f32.gmra.mrb[12].mxu1 %v3639_v46  ;;  %v2249_v46 = vld [vmem:[#allocation4 + $0x40] sm:$0xff] }
 0x80d   : > { %v2265_v52 = vmul.f32 %v4822_v14, %v2249_v46  ;;  %v2253_v14 = vld [vmem:[#allocation4 + $0x60] sm:$0xff] }
 0x80e   : > { %v3645_v51 = vpop.eup %3644  ;;  %v4886_v2 = vpop.permute.xlu0 %2421 }
 0x80f   : > { %2301 = vadd.xlane.f32.xlu0 %v3645_v51  ;;  %3217 = vmatprep.mubr.f32.mxu1 %v3645_v51  ;;  %v4853_v3 = vpop.eup %3646  ;;  %v4871_v32 = vpop.permute.xlu1 %2386 }
 0x810   : > { %3218 = vmatmul.mubr.f32.gmra.mrb[14].mxu1 %v3643_v60  ;;  %v4856_v33 = vpop.eup %3648  ;;  %v2252_v60 = vld [vmem:[#allocation4 + $0x58] sm:$0xff] }
 0x811   : > { %v2268_v45 = vmul.f32 %v4810_v29, %v2252_v60 }
 0x813   : > { %v4875_v61 = vpop.permute.xlu1 %2396 }
 0x817   : > { %v4879_v0 = vpop.permute.xlu1 %2406 }
 0x81b   : > { %v4883_v40 = vpop.permute.xlu1 %2416 }
 0x81d   : > { %2426 = vperm.xlu1 %3585, %v4853_v3  }
 0x825   : > { %2431 = vperm.xlu0 %3584, %v4856_v33  }
 0x870   : > { %v2274_v26 = vpop.xlane.xlu1 %2273 }
 0x871   : > { %v2305_v4 = vadd.f32 %v2274_v26, %v2257_v24  ;;  %v2254_v26 = vld [vmem:[#allocation4 + $0x68] sm:$0xff] }
 0x873   : > { %2322 = vst.msk [vmem:[#allocation4] sm:$0xff] %vm2321_vm4, %v2305_v4  ;;  %v2270_v4 = vmul.f32 %v4816_v18, %v2254_v26  ;;  %v2271_v18 = vmul.f32 %v4853_v3, %v2255_v30  ;;  %v2340_v3 = vld [vmem:[#allocation5 + $0x10] sm:$0xff] }
 0x874   : > { %v2276_v43 = vpop.xlane.xlu0 %2275 }
 0x875   : > { %v2306_v9 = vadd.f32 %v2276_v43, %v2258_v10 }
 0x877   : > { %2323 = vst.msk [vmem:[#allocation4 + $0x8] sm:$0xff] %vm2321_vm4, %v2306_v9  ;;  %v2256_v9 = vld [vmem:[#allocation4 + $0x78] sm:$0xff] }
 0x878   : > { %v2280_v54 = vpop.xlane.xlu1 %2279 }
 0x879   : > { %v2308_v13 = vadd.f32 %v2280_v54, %v2260_v57  ;;  %v2269_v57 = vmul.f32 %v4828_v41, %v2253_v14  ;;  %v2272_v54 = vmul.f32 %v4856_v33, %v2256_v9  ;;  %v2339_v41 = vld [vmem:[#allocation5 + $0x8] sm:$0xff]  ;;  %v2350_v9 = vld [vmem:[#allocation5 + $0x60] sm:$0xff] }
 0x87b   : > { %2325 = vst.msk [vmem:[#allocation4 + $0x18] sm:$0xff] %vm2321_vm4, %v2308_v13 }
 0x87c   : > { %v2278_v21 = vpop.xlane.xlu0 %2277 }
 0x87d   : > { %v2307_v16 = vadd.f32 %v2278_v21, %v2259_v36 }
 0x87f   : > { %2324 = vst.msk [vmem:[#allocation4 + $0x10] sm:$0xff] %vm2321_vm4, %v2307_v16 }
 0x880   : > { %v2284_v11 = vpop.xlane.xlu1 %2283 }
 0x881   : > { %v2310_v56 = vadd.f32 %v2284_v11, %v2262_v17  ;;  %v2338_v17 = vld [vmem:[#allocation5] sm:$0xff]  ;;  %v2435_v11 = vmul.f32 %v4859_v39, %v2339_v41  ;;  %v2343_v39 = vld [vmem:[#allocation5 + $0x28] sm:$0xff] }
 0x882   : > { %v2434_v33 = vmul.f32 %v4861_v35, %v2338_v17  ;;  %v2342_v35 = vld [vmem:[#allocation5 + $0x20] sm:$0xff] }
 0x883   : > { %2327 = vst.msk [vmem:[#allocation4 + $0x28] sm:$0xff] %vm2321_vm4, %v2310_v56 }
 0x884   : > { %v2282_v28 = vpop.xlane.xlu0 %2281 }
 0x885   : > { %v2309_v38 = vadd.f32 %v2282_v28, %v2261_v15 }
 0x887   : > { %2326 = vst.msk [vmem:[#allocation4 + $0x20] sm:$0xff] %vm2321_vm4, %v2309_v38  ;;  %v2437_v38 = vmul.f32 %v4865_v12, %v2341_v48  ;;  %v2345_v12 = vld [vmem:[#allocation5 + $0x38] sm:$0xff] }
 0x888   : > { %v2288_v6 = vpop.xlane.xlu1 %2287  ;;  %v2441_v60 = vmul.f32 %v4873_v27, %v2345_v12 }
 0x889   : > { %v2312_v25 = vadd.f32 %v2288_v6, %v2264_v1  ;;  %v2436_v1 = vmul.f32 %v4863_v50, %v2340_v3  ;;  %v2344_v50 = vld [vmem:[#allocation5 + $0x30] sm:$0xff] }
 0x88b   : > { %2329 = vst.msk [vmem:[#allocation4 + $0x38] sm:$0xff] %vm2321_vm4, %v2312_v25 }
 0x88c   : > { %v2286_v42 = vpop.xlane.xlu0 %2285 }
 0x88d   : > { %v2292_v19 = vpop.xlane.xlu1 %2291  ;;  %v2311_v37 = vadd.f32 %v2286_v42, %v2263_v8  ;;  %v2439_v8 = vmul.f32 %v4869_v47, %v2343_v39 }
 0x88e   : > { %v2314_v51 = vadd.f32 %v2292_v19, %v2266_v58  ;;  %v2438_v58 = vmul.f32 %v4867_v55, %v2342_v35 }
 0x88f   : > { %2328 = vst.msk [vmem:[#allocation4 + $0x30] sm:$0xff] %vm2321_vm4, %v2311_v37 }
 0x890   : > { %2331 = vst.msk [vmem:[#allocation4 + $0x48] sm:$0xff] %vm2321_vm4, %v2314_v51  ;;  %v2290_v20 = vpop.xlane.xlu0 %2289  ;;  %v2347_v51 = vld [vmem:[#allocation5 + $0x48] sm:$0xff] }
 0x891   : > { %v2296_v24 = vpop.xlane.xlu1 %2295  ;;  %v2313_v31 = vadd.f32 %v2290_v20, %v2265_v52  ;;  %v2440_v52 = vmul.f32 %v4871_v32, %v2344_v50  ;;  %v2346_v20 = vld [vmem:[#allocation5 + $0x40] sm:$0xff]  ;;  %v2443_v55 = vmul.f32 %v4877_v63, %v2347_v51  ;;  %v2351_v32 = vld [vmem:[#allocation5 + $0x68] sm:$0xff] }
 0x892   : > { %v2316_v53 = vadd.f32 %v2296_v24, %v2268_v45  ;;  %v2442_v26 = vmul.f32 %v4875_v61, %v2346_v20  ;;  %v2447_v61 = vmul.f32 %v4886_v2, %v2351_v32 }
 0x893   : > { %2330 = vst.msk [vmem:[#allocation4 + $0x40] sm:$0xff] %vm2321_vm4, %v2313_v31  ;;  %v2349_v31 = vld [vmem:[#allocation5 + $0x58] sm:$0xff] }
 0x894   : > { %2333 = vst.msk [vmem:[#allocation4 + $0x58] sm:$0xff] %vm2321_vm4, %v2316_v53  ;;  %v2294_v10 = vpop.xlane.xlu0 %2293  ;;  %v2445_v14 = vmul.f32 %v4881_v22, %v2349_v31  ;;  %v2352_v22 = vld [vmem:[#allocation5 + $0x70] sm:$0xff] }
 0x895   : > { %v2300_v43 = vpop.xlane.xlu1 %2299  ;;  %v2315_v44 = vadd.f32 %v2294_v10, %v2267_v34  ;;  %v2348_v34 = vld [vmem:[#allocation5 + $0x50] sm:$0xff] }
 0x896   : > { %v2318_v29 = vadd.f32 %v2300_v43, %v2270_v4  ;;  %v2444_v43 = vmul.f32 %v4879_v0, %v2348_v34 }
 0x897   : > { %2332 = vst.msk [vmem:[#allocation4 + $0x50] sm:$0xff] %vm2321_vm4, %v2315_v44 }
 0x898   : > { %2335 = vst.msk [vmem:[#allocation4 + $0x68] sm:$0xff] %vm2321_vm4, %v2318_v29  ;;  %v2298_v7 = vpop.xlane.xlu0 %2297 }
 0x899   : > { %v2304_v13 = vpop.xlane.xlu1 %2303  ;;  %v2317_v36 = vadd.f32 %v2298_v7, %v2269_v57  ;;  %v2353_v7 = vld [vmem:[#allocation5 + $0x78] sm:$0xff] }
 0x89a   : > { %v2320_v21 = vadd.f32 %v2304_v13, %v2272_v54  ;;  %v2446_v54 = vmul.f32 %v4883_v40, %v2350_v9 }
 0x89b   : > { %2334 = vst.msk [vmem:[#allocation4 + $0x60] sm:$0xff] %vm2321_vm4, %v2317_v36 }
 0x89c   : > { %2337 = vst.msk [vmem:[#allocation4 + $0x78] sm:$0xff] %vm2321_vm4, %v2320_v21  ;;  %v2302_v49 = vpop.xlane.xlu0 %2301 }
 0x89d   : > { %v2319_v16 = vadd.f32 %v2302_v49, %v2271_v18  ;;  %v2427_v36 = vpop.permute.xlu1 %2426 }
 0x89f   : > { %2336 = vst.msk [vmem:[#allocation4 + $0x70] sm:$0xff] %vm2321_vm4, %v2319_v16  ;;  %v2448_v16 = vmul.f32 %v2427_v36, %v2352_v22 }
 0x8a4   : > { %v2432_v30 = vpop.permute.xlu0 %2431 }
 0x8a5   : > { %v2449_v49 = vmul.f32 %v2432_v30, %v2353_v7 }
 0x8ba   : > { %v3198_v62 = vpop.f32.mrb[0].mxu1 }
 0x8bb   : > { %v2596_v56 = vadd.f32 %v3198_v62, %v2435_v11  ;;  %v2516_v15 = vpop.f32.mrb[1].mxu1 }
 0x8bc   : > { %v2595_v28 = vadd.f32 %v2516_v15, %v2434_v33 }
 0x8bd   : > { %2612 = vst [vmem:[#allocation5 + $0x8] sm:$0xff] %v2596_v56 }
 0x8be   : > { %2611 = vst [vmem:[#allocation5] sm:$0xff] %v2595_v28 }
 0x8c3   : > { %v3201_v6 = vpop.f32.mrb[2].mxu1 }
 0x8c4   : > { %v2598_v59 = vadd.f32 %v3201_v6, %v2437_v38  ;;  %v2526_v25 = vpop.f32.mrb[3].mxu1 }
 0x8c5   : > { %v2597_v23 = vadd.f32 %v2526_v25, %v2436_v1 }
 0x8c6   : > { %2614 = vst [vmem:[#allocation5 + $0x18] sm:$0xff] %v2598_v59 }
 0x8c7   : > { %2613 = vst [vmem:[#allocation5 + $0x10] sm:$0xff] %v2597_v23 }
 0x8cb   : > { %v3204_v42 = vpop.f32.mrb[4].mxu1 }
 0x8cc   : > { %v2600_v46 = vadd.f32 %v3204_v42, %v2439_v8  ;;  %v2536_v19 = vpop.f32.mrb[5].mxu1 }
 0x8cd   : > { %v2599_v37 = vadd.f32 %v2536_v19, %v2438_v58 }
 0x8ce   : > { %2616 = vst [vmem:[#allocation5 + $0x28] sm:$0xff] %v2600_v46 }
 0x8cf   : > { %2615 = vst [vmem:[#allocation5 + $0x20] sm:$0xff] %v2599_v37 }
 0x8d3   : > { %v3207_v45 = vpop.f32.mrb[6].mxu1 }
 0x8d4   : > { %v2602_v5 = vadd.f32 %v3207_v45, %v2441_v60  ;;  %v2546_v24 = vpop.f32.mrb[7].mxu1 }
 0x8d5   : > { %v2601_v47 = vadd.f32 %v2546_v24, %v2440_v52 }
 0x8d6   : > { %2618 = vst [vmem:[#allocation5 + $0x38] sm:$0xff] %v2602_v5 }
 0x8d7   : > { %2617 = vst [vmem:[#allocation5 + $0x30] sm:$0xff] %v2601_v47  ;;  %v3210_v53 = vpop.f32.mrb[8].mxu1 }
 0x8d8   : > { %v2604_v4 = vadd.f32 %v3210_v53, %v2443_v55  ;;  %v2556_v10 = vpop.f32.mrb[9].mxu1 }
 0x8d9   : > { %v2603_v27 = vadd.f32 %v2556_v10, %v2442_v26 }
 0x8da   : > { %2620 = vst [vmem:[#allocation5 + $0x48] sm:$0xff] %v2604_v4 }
 0x8db   : > { %2619 = vst [vmem:[#allocation5 + $0x40] sm:$0xff] %v2603_v27  ;;  %v3213_v44 = vpop.f32.mrb[10].mxu1 }
 0x8dc   : > { %v2606_v63 = vadd.f32 %v3213_v44, %v2445_v14  ;;  %v2566_v29 = vpop.f32.mrb[11].mxu1 }
 0x8dd   : > { %v2605_v57 = vadd.f32 %v2566_v29, %v2444_v43 }
 0x8de   : > { %2622 = vst [vmem:[#allocation5 + $0x58] sm:$0xff] %v2606_v63 }
 0x8df   : > { %2621 = vst [vmem:[#allocation5 + $0x50] sm:$0xff] %v2605_v57  ;;  %v3216_v13 = vpop.f32.mrb[12].mxu1 }
 0x8e0   : > { %v2608_v21 = vadd.f32 %v3216_v13, %v2447_v61  ;;  %v2576_v18 = vpop.f32.mrb[13].mxu1 }
 0x8e1   : > { %v2607_v0 = vadd.f32 %v2576_v18, %v2446_v54 }
 0x8e2   : > { %2624 = vst [vmem:[#allocation5 + $0x68] sm:$0xff] %v2608_v21 }
 0x8e3   : > { %2623 = vst [vmem:[#allocation5 + $0x60] sm:$0xff] %v2607_v0  ;;  %v3219_v41 = vpop.f32.mrb[14].mxu1 }
 0x8e4   : > { %v2610_v17 = vadd.f32 %v3219_v41, %v2449_v49  ;;  %v2586_v11 = vpop.f32.mrb[15].mxu1 }
 0x8e5   : > { %v2609_v2 = vadd.f32 %v2586_v11, %v2448_v16 }
 0x8e6   : > { %2626 = vst [vmem:[#allocation5 + $0x78] sm:$0xff] %v2610_v17 }
 0x8e7   : > { %2625 = vst [vmem:[#allocation5 + $0x70] sm:$0xff] %v2609_v2 }
 0x8e8 PF: > { %s3404_s21 = scalar_select %p3866_p1, [#allocation8], [#allocation12] }
 0x8e9   : > { %s5039_s26 = smov (!%p3866_p1, %s3754_s26), 0  ;;  %s2660_s13 = sshll.u32 %s3901_s15, 4  ;;  %s4940_s13 = int_to_ptr.vmem [resolvable:$true] %s2660_s13 }
 0x8ea   : > { %s2651_s23 = sld [smem:[%s3404_s21 + %s5039_s26]]  ;;  %s2798_s16 = sshll.u32 %s3758_s27, 5 }
 0x8eb   : > { %s5022_s14 = sand.u32 1, %s3746_s24   ;;  %s3674_s9 = scalar_lea.vmem %s4940_s13, 2048 }
 0x8ec   : > { %s4949_s6 = scalar_lea.sflag [#allocation11], %s5022_s14  ;;  %p3675_p13 = scmp.ne.s32.totalorder %s4940_s13, %s3674_s9 }
 0x8ed   : > { %s3779_s26 = smov [#allocation10]  }
 0x8ee   : > { %p3676_p0 = pnand %p3675_p13, %p3866_p1  ;;  %s3678_s27 = sshll.u32 %s3779_s26, 4  ;;  %s3679_s27 = int_to_ptr.vmem [resolvable:$false] %s3678_s27 }
 0x8ef   : > { %s3680_s15 = scalar_lea.vmem %s3679_s27, 4096  ;;  %p3681_p4 = scmp.lt.s32.totalorder %s4940_s13, %s3679_s27 }
 0x8f0   : > { %s2797_s19 = sshll.u32 %s2651_s23, 4  ;;  %p3677_p2 = pneg %p3676_p0 }
 0x8f1   : > { %s2657_s22 = sadd.s32 %s2798_s16, %s2797_s19  ;;  %p3682_p5 = scmp.lt.s32.totalorder %s3680_s15, %s3674_s9 }
 0x8f2   : > { %s2799_s18 = sshll.u32 %s2657_s22, 7 }
 0x8f3   : > { %s4945_s5 = scalar_lea.hbm %s5004_s4, %s2799_s18  ;;  %p3683_p6 = por %p3682_p5, %p3681_p4 }
 0x8f5   : > { %p3684_p7 = pnand %p3683_p6, %p3677_p2 }
 0x8f7   : > { %3687 = shalt.err (!%p3684_p7)
}
 0x8f8   : > { %s3688_s10 = scalar_lea.hbm %s4945_s5, 2048  ;;  %s3692_s16 = scalar_lea.hbm %s5004_s4, 8192 }
 0x8f9   : > { %p3689_p8 = scmp.ne.s32.totalorder %s4945_s5, %s3688_s10  ;;  %p3693_p11 = scmp.lt.u32.totalorder %s4945_s5, %s5004_s4 }
 0x8fa   : > { %p3694_p12 = scmp.lt.u32.totalorder %s3692_s16, %s3688_s10  ;;  %p3696_p0 = scmp.lt.u32.totalorder %s3688_s10, %s4945_s5 }
 0x8fb   : > { %p3690_p9 = pnand %p3689_p8, %p3866_p1 }
 0x8fc   : > { %p3695_p13 = por %p3694_p12, %p3693_p11 }
 0x8fd   : > { %p3691_p10 = pneg %p3690_p9 }
 0x8fe   : > { %p3697_p2 = por %p3696_p0, %p3695_p13 }
 0x900   : > { %p3698_p4 = pnand %p3697_p2, %p3691_p10 }
 0x902   : > { %3701 = shalt.err (!%p3698_p4)
}
 0x903   : > { %s3780_s18 = smov 128   ;;  %s3781_s20 = smov 8  }
 0x904   : > { %3406 = dma.vmem_to_hbm [thread:$0]  (%p3866_p1), %s4940_s13, 2048, %s4945_s5, %s4949_s6, %s3780_s18, %s3780_s18, %s3781_s20  }
 0x905 PF: > { %p3412_p5 = scmp.ge.s32.totalorder %s3770_s30, 2  ;;  %s2675_s0 = sand.u32 1, %s3742_s1  }
 0x906   : > { %s2676_s14 = scalar_lea.sflag [#allocation11], %s2675_s0 }
 0x907   : > { %p3409_p6 = pnand %p3412_p5, %p3872_p3 }
 0x909   : > { %3737 = dma.done.wait (!%p3409_p6), %s2676_s14, 2048  }
 0x90a   : > { %3739 = vsyncadd (!%p3409_p6), %s2676_s14, 4294965248  ;;  %s27_s30 = sadd.s32 1, %s3770_s30   ;;  %s5023_s1 = smov %s3746_s24 }
 0x90b   : > { %p24_p7 = scmp.ge.s32.totalorder %s27_s30, 8   ;;  %s5024_s24 = smov %s3750_s25 }
 0x90c   : > { %s5025_s25 = smov %s3882_s17  ;;  %s5026_s26 = smov %s3762_s28 }
 0x90d   : > { %s5027_s27 = smov %s3766_s29  ;;  %s5028_s28 = smov %s5031_s7 }
 0x90e   : > { %s5029_s29 = smov %s5035_s8  ;;  %26 = sbr.rel (!%p24_p7) target bundleno = 30 (0x1e), region = 77 }
 0x915   :  { %2681 = vsyncpa [#allocation11], 1 }
 0x916   :  { %2683 = vsyncpa [#allocation11 + $0x1], 1 }

</bundles_post_ra>
